<compile_context>
chip_gen: v7x
topology: tpu7x:2x2x1
jax: 0.10.0
libtpu: 0.0.40
codegen_flags: <defaults>
</compile_context>

<pallas_src>
import jax
import jax.numpy as jnp
from jax.experimental import pallas as pl
from jax.experimental.pallas import tpu as pltpu


LN_EPS = 1e-5
_INV_SQRT2 = 0.7071067811865476


def _gelu_exact(x):
    # PyTorch nn.GELU() default: exact erf-based GELU.
    return 0.5 * x * (1.0 + jax.lax.erf(x * _INV_SQRT2))


def feedforward_kernel(x_ref, gamma_ref, beta_ref, w1_ref, b1_ref, w2_ref, b2_ref,
                       o_ref):
    # x_ref: (tile_rows, D) fp32
    x = x_ref[...]

    # --- LayerNorm over last dim (biased variance, like torch.nn.LayerNorm), fp32 ---
    mean = jnp.mean(x, axis=-1, keepdims=True)
    centered = x - mean
    var = jnp.mean(centered * centered, axis=-1, keepdims=True)
    inv = jax.lax.rsqrt(var + LN_EPS)
    xn = centered * inv * gamma_ref[...] + beta_ref[...]        # (tile_rows, D) fp32

    # --- Linear(dim -> hidden) + GELU; bf16 MXU operands, fp32 accumulation ---
    h = jnp.dot(xn.astype(w1_ref.dtype), w1_ref[...],
                preferred_element_type=jnp.float32)
    h = h + b1_ref[...]                                          # broadcast (1, H)
    h = _gelu_exact(h)

    # Dropout(p=0.0) -> identity

    # --- Linear(hidden -> dim); bf16 MXU operands, fp32 accumulation ---
    y = jnp.dot(h.astype(w2_ref.dtype), w2_ref[...],
                preferred_element_type=jnp.float32)
    y = y + b2_ref[...]                                          # broadcast (1, D)

    # Dropout(p=0.0) -> identity
    o_ref[...] = y.astype(o_ref.dtype)


def feedforward(x, gamma, beta, w1, b1, w2, b2, *, tile_rows=256,
                matmul_dtype=jnp.bfloat16):
    """x: (B, S, D) float32. Returns (B, S, D)."""
    B, S, D = x.shape
    H = w1.shape[1]
    rows = B * S

    # Pad rows up to a multiple of tile_rows (padded rows sliced off below).
    n_tiles = pl.cdiv(rows, tile_rows)
    rows_p = n_tiles * tile_rows

    x2 = x.reshape(rows, D).astype(jnp.float32)
    if rows_p != rows:
        x2 = jnp.pad(x2, ((0, rows_p - rows), (0, 0)))

    gamma2 = gamma.reshape(1, D).astype(jnp.float32)
    beta2 = beta.reshape(1, D).astype(jnp.float32)
    w1c = w1.astype(matmul_dtype)                 # (D, H) bf16 -> halves DMA bytes
    w2c = w2.astype(matmul_dtype)                 # (H, D) bf16
    b1_2 = b1.reshape(1, H).astype(jnp.float32)
    b2_2 = b2.reshape(1, D).astype(jnp.float32)

    grid = (n_tiles,)

    # Advisory cost hint for the XLA scheduler.
    flops = 4 * rows_p * D * H + 10 * rows_p * D          # 2 matmuls + LN/affine
    bytes_accessed = (
        (rows_p * D) * 4 * 2                               # x in + y out (fp32)
        + (w1c.size + w2c.size) * w1c.dtype.itemsize       # weights (bf16)
        + (gamma2.size + beta2.size + b1_2.size + b2_2.size) * 4
    )
    cost = pl.CostEstimate(flops=flops, transcendentals=rows_p * H,
                           bytes_accessed=bytes_accessed)

    out = pl.pallas_call(
        feedforward_kernel,
        out_shape=jax.ShapeDtypeStruct((rows_p, D), x.dtype),
        grid_spec=pltpu.PrefetchScalarGridSpec(
            num_scalar_prefetch=0,
            grid=grid,
            in_specs=[
                pl.BlockSpec((tile_rows, D), lambda i: (i, 0)),  # x tile
                pl.BlockSpec((1, D), lambda i: (0, 0)),          # gamma (resident)
                pl.BlockSpec((1, D), lambda i: (0, 0)),          # beta  (resident)
                pl.BlockSpec((D, H), lambda i: (0, 0)),          # W1 bf16 (resident)
                pl.BlockSpec((1, H), lambda i: (0, 0)),          # b1    (resident)
                pl.BlockSpec((H, D), lambda i: (0, 0)),          # W2 bf16 (resident)
                pl.BlockSpec((1, D), lambda i: (0, 0)),          # b2    (resident)
            ],
            out_specs=pl.BlockSpec((tile_rows, D), lambda i: (i, 0)),
        ),
        compiler_params=pltpu.CompilerParams(
            dimension_semantics=("parallel",),
            vmem_limit_bytes=32 * 1024 * 1024,   # headroom; safe on v5e/v6e/v7x
        ),
        cost_estimate=cost,
    )(x2, gamma2, beta2, w1c, b1_2, w2c, b2_2)

    if rows_p != rows:
        out = out[:rows]
    return out.reshape(B, S, D)


def feedforward_ref(x, gamma, beta, w1, b1, w2, b2, matmul_dtype=jnp.float32):
    """Pure-JAX reference. matmul_dtype lets us mirror the kernel's bf16 operands."""
    mean = jnp.mean(x, axis=-1, keepdims=True)
    var = jnp.mean((x - mean) ** 2, axis=-1, keepdims=True)
    xn = (x - mean) * jax.lax.rsqrt(var + LN_EPS) * gamma + beta
    h = jnp.dot(xn.astype(matmul_dtype), w1.astype(matmul_dtype),
                preferred_element_type=jnp.float32) + b1
    h = 0.5 * h * (1.0 + jax.lax.erf(h * _INV_SQRT2))
    y = jnp.dot(h.astype(matmul_dtype), w2.astype(matmul_dtype),
                preferred_element_type=jnp.float32) + b2
    return y


if __name__ == "__main__":
    # Lane-dense dims (multiples of 128); rows = 512 -> 2 row tiles of 256
    # (even grid, so both v7x TensorCores get work).
    B, S, D, H = 2, 256, 128, 512

    key = jax.random.PRNGKey(0)
    kx, kw1, kb1, kw2, kb2 = jax.random.split(key, 5)

    x = jax.random.normal(kx, (B, S, D), dtype=jnp.float32)

    # Deterministic parameter init (shapes follow the nn.Module __init__).
    gamma = jnp.ones((D,), dtype=jnp.float32)    # LayerNorm weight
    beta = jnp.zeros((D,), dtype=jnp.float32)    # LayerNorm bias
    w1 = jax.random.normal(kw1, (D, H), dtype=jnp.float32) * (1.0 / jnp.sqrt(D))
    b1 = jax.random.normal(kb1, (H,), dtype=jnp.float32) * 0.02
    w2 = jax.random.normal(kw2, (H, D), dtype=jnp.float32) * (1.0 / jnp.sqrt(H))
    b2 = jax.random.normal(kb2, (D,), dtype=jnp.float32) * 0.02

    y = feedforward(x, gamma, beta, w1, b1, w2, b2)
    y = jax.block_until_ready(y)
    assert y.shape == (B, S, D)

    # Tight check against a reference that mirrors the kernel's bf16 matmul operands.
    y_ref_bf16 = feedforward_ref(x, gamma, beta, w1, b1, w2, b2,
                                 matmul_dtype=jnp.bfloat16)
    assert jnp.allclose(y, y_ref_bf16, atol=1e-3, rtol=1e-3), \
        "mismatch vs bf16-matched reference"

    # Loose check against the full-fp32 module semantics (bf16 operand rounding only).
    y_ref_f32 = feedforward_ref(x, gamma, beta, w1, b1, w2, b2,
                                matmul_dtype=jnp.float32)
    assert jnp.allclose(y, y_ref_f32, atol=5e-2, rtol=5e-2), \
        "mismatch vs fp32 reference"

    print("KERNEL_OK")
</pallas_src>

<mosaic_0001>
module attributes {stable_mosaic.version = 11 : i64} {
  func.func @feedforward_kernel(%arg0: i32, %arg1: memref<256x128xf32, #tpu.memory_space<vmem>>, %arg2: memref<1x128xf32, #tpu.memory_space<vmem>>, %arg3: memref<1x128xf32, #tpu.memory_space<vmem>>, %arg4: memref<128x512xbf16, #tpu.memory_space<vmem>>, %arg5: memref<1x512xf32, #tpu.memory_space<vmem>>, %arg6: memref<512x128xbf16, #tpu.memory_space<vmem>>, %arg7: memref<1x128xf32, #tpu.memory_space<vmem>>, %arg8: memref<256x128xf32, #tpu.memory_space<vmem>>) attributes {dimension_semantics = [#tpu.dimension_semantics<parallel>], iteration_bounds = array<i64: 2>, scalar_prefetch = 0 : i64, scratch_operands = 0 : i64, tpu.core_type = #tpu.core_type<tc>, window_params = [{transform_indices = @transform_0, window_bounds = array<i64: 256, 128>}, {pipeline_mode = #tpu.pipeline_mode<synchronous>, transform_indices = @transform_1, window_bounds = array<i64: 1, 128>}, {pipeline_mode = #tpu.pipeline_mode<synchronous>, transform_indices = @transform_2, window_bounds = array<i64: 1, 128>}, {pipeline_mode = #tpu.pipeline_mode<synchronous>, transform_indices = @transform_3, window_bounds = array<i64: 128, 512>}, {pipeline_mode = #tpu.pipeline_mode<synchronous>, transform_indices = @transform_4, window_bounds = array<i64: 1, 512>}, {pipeline_mode = #tpu.pipeline_mode<synchronous>, transform_indices = @transform_5, window_bounds = array<i64: 512, 128>}, {pipeline_mode = #tpu.pipeline_mode<synchronous>, transform_indices = @transform_6, window_bounds = array<i64: 1, 128>}, {transform_indices = @transform_7, window_bounds = array<i64: 256, 128>}]} {
    %c0 = arith.constant 0 : index
    %c0_0 = arith.constant 0 : index
    %0 = vector.load %arg1[%c0, %c0_0] : memref<256x128xf32, #tpu.memory_space<vmem>>, vector<256x128xf32>
    %cst = arith.constant dense<0.000000e+00> : vector<256xf32>
    %1 = vector.multi_reduction <add>, %0, %cst [1] : vector<256x128xf32> to vector<256xf32>
    %2 = vector.shape_cast %1 : vector<256xf32> to vector<256x1xf32>
    %cst_1 = arith.constant 1.280000e+02 : f32
    %3 = vector.broadcast %cst_1 : f32 to vector<256x1xf32>
    %4 = arith.divf %2, %3 : vector<256x1xf32>
    %5 = vector.broadcast %4 : vector<256x1xf32> to vector<256x128xf32>
    %6 = arith.subf %0, %5 : vector<256x128xf32>
    %7 = arith.mulf %6, %6 : vector<256x128xf32>
    %cst_2 = arith.constant dense<0.000000e+00> : vector<256xf32>
    %8 = vector.multi_reduction <add>, %7, %cst_2 [1] : vector<256x128xf32> to vector<256xf32>
    %9 = vector.shape_cast %8 : vector<256xf32> to vector<256x1xf32>
    %cst_3 = arith.constant 1.280000e+02 : f32
    %10 = vector.broadcast %cst_3 : f32 to vector<256x1xf32>
    %11 = arith.divf %9, %10 : vector<256x1xf32>
    %cst_4 = arith.constant 9.99999974E-6 : f32
    %12 = vector.broadcast %cst_4 : f32 to vector<256x1xf32>
    %13 = arith.addf %11, %12 : vector<256x1xf32>
    %14 = math.rsqrt %13 : vector<256x1xf32>
    %15 = vector.broadcast %14 : vector<256x1xf32> to vector<256x128xf32>
    %16 = arith.mulf %6, %15 : vector<256x128xf32>
    %c0_5 = arith.constant 0 : index
    %c0_6 = arith.constant 0 : index
    %17 = vector.load %arg2[%c0_5, %c0_6] : memref<1x128xf32, #tpu.memory_space<vmem>>, vector<1x128xf32>
    %18 = vector.broadcast %17 : vector<1x128xf32> to vector<256x128xf32>
    %19 = arith.mulf %16, %18 : vector<256x128xf32>
    %c0_7 = arith.constant 0 : index
    %c0_8 = arith.constant 0 : index
    %20 = vector.load %arg3[%c0_7, %c0_8] : memref<1x128xf32, #tpu.memory_space<vmem>>, vector<1x128xf32>
    %21 = vector.broadcast %20 : vector<1x128xf32> to vector<256x128xf32>
    %22 = arith.addf %19, %21 : vector<256x128xf32>
    %23 = arith.truncf %22 : vector<256x128xf32> to vector<256x128xbf16>
    %c0_9 = arith.constant 0 : index
    %c0_10 = arith.constant 0 : index
    %24 = vector.load %arg4[%c0_9, %c0_10] : memref<128x512xbf16, #tpu.memory_space<vmem>>, vector<128x512xbf16>
    %cst_11 = arith.constant dense<0.000000e+00> : vector<256x512xf32>
    %25 = tpu.matmul %23, %24, %cst_11 {dimension_numbers = #tpu.dot_dimension_numbers<[1], [0], [0], [1], [0, 0, 1, 1], [], []>} : vector<256x128xbf16>, vector<128x512xbf16>, vector<256x512xf32> -> vector<256x512xf32>
    %c0_12 = arith.constant 0 : index
    %c0_13 = arith.constant 0 : index
    %26 = vector.load %arg5[%c0_12, %c0_13] : memref<1x512xf32, #tpu.memory_space<vmem>>, vector<1x512xf32>
    %27 = vector.broadcast %26 : vector<1x512xf32> to vector<256x512xf32>
    %28 = arith.addf %25, %27 : vector<256x512xf32>
    %cst_14 = arith.constant 5.000000e-01 : f32
    %29 = vector.broadcast %cst_14 : f32 to vector<256x512xf32>
    %30 = arith.mulf %29, %28 : vector<256x512xf32>
    %cst_15 = arith.constant 0.707106769 : f32
    %31 = vector.broadcast %cst_15 : f32 to vector<256x512xf32>
    %32 = arith.mulf %28, %31 : vector<256x512xf32>
    %33 = math.erf %32 : vector<256x512xf32>
    %cst_16 = arith.constant 1.000000e+00 : f32
    %34 = vector.broadcast %cst_16 : f32 to vector<256x512xf32>
    %35 = arith.addf %34, %33 : vector<256x512xf32>
    %36 = arith.mulf %30, %35 : vector<256x512xf32>
    %37 = arith.truncf %36 : vector<256x512xf32> to vector<256x512xbf16>
    %c0_17 = arith.constant 0 : index
    %c0_18 = arith.constant 0 : index
    %38 = vector.load %arg6[%c0_17, %c0_18] : memref<512x128xbf16, #tpu.memory_space<vmem>>, vector<512x128xbf16>
    %cst_19 = arith.constant dense<0.000000e+00> : vector<256x128xf32>
    %39 = tpu.matmul %37, %38, %cst_19 {dimension_numbers = #tpu.dot_dimension_numbers<[1], [0], [0], [1], [0, 0, 1, 1], [], []>} : vector<256x512xbf16>, vector<512x128xbf16>, vector<256x128xf32> -> vector<256x128xf32>
    %c0_20 = arith.constant 0 : index
    %c0_21 = arith.constant 0 : index
    %40 = vector.load %arg7[%c0_20, %c0_21] : memref<1x128xf32, #tpu.memory_space<vmem>>, vector<1x128xf32>
    %41 = vector.broadcast %40 : vector<1x128xf32> to vector<256x128xf32>
    %42 = arith.addf %39, %41 : vector<256x128xf32>
    %c0_22 = arith.constant 0 : index
    %c0_23 = arith.constant 0 : index
    %43 = vector.load %arg8[%c0_22, %c0_23] : memref<256x128xf32, #tpu.memory_space<vmem>>, vector<256x128xf32>
    tpu.vector_store %arg8[%c0_22, %c0_23], %42 {strides = array<i32>} : memref<256x128xf32, #tpu.memory_space<vmem>>, vector<256x128xf32>,
    return
  }
  func.func @transform_0(%arg0: i32) -> (i32, i32) {
    %c0_i32 = arith.constant 0 : i32
    %c0_i32_0 = arith.constant 0 : i32
    return %arg0, %c0_i32 : i32, i32
  }
  func.func @transform_1(%arg0: i32) -> (i32, i32) {
    %c0_i32 = arith.constant 0 : i32
    %c0_i32_0 = arith.constant 0 : i32
    %c0_i32_1 = arith.constant 0 : i32
    return %c0_i32, %c0_i32_0 : i32, i32
  }
  func.func @transform_2(%arg0: i32) -> (i32, i32) {
    %c0_i32 = arith.constant 0 : i32
    %c0_i32_0 = arith.constant 0 : i32
    %c0_i32_1 = arith.constant 0 : i32
    return %c0_i32, %c0_i32_0 : i32, i32
  }
  func.func @transform_3(%arg0: i32) -> (i32, i32) {
    %c0_i32 = arith.constant 0 : i32
    %c0_i32_0 = arith.constant 0 : i32
    %c0_i32_1 = arith.constant 0 : i32
    return %c0_i32, %c0_i32_0 : i32, i32
  }
  func.func @transform_4(%arg0: i32) -> (i32, i32) {
    %c0_i32 = arith.constant 0 : i32
    %c0_i32_0 = arith.constant 0 : i32
    %c0_i32_1 = arith.constant 0 : i32
    return %c0_i32, %c0_i32_0 : i32, i32
  }
  func.func @transform_5(%arg0: i32) -> (i32, i32) {
    %c0_i32 = arith.constant 0 : i32
    %c0_i32_0 = arith.constant 0 : i32
    %c0_i32_1 = arith.constant 0 : i32
    return %c0_i32, %c0_i32_0 : i32, i32
  }
  func.func @transform_6(%arg0: i32) -> (i32, i32) {
    %c0_i32 = arith.constant 0 : i32
    %c0_i32_0 = arith.constant 0 : i32
    %c0_i32_1 = arith.constant 0 : i32
    return %c0_i32, %c0_i32_0 : i32, i32
  }
  func.func @transform_7(%arg0: i32) -> (i32, i32) {
    %c0_i32 = arith.constant 0 : i32
    %c0_i32_0 = arith.constant 0 : i32
    return %arg0, %c0_i32 : i32, i32
  }
}

</mosaic_0001>

<bundles_post_ra>
// kernel: tpu_custom_call.1
= control target key start
LH: loop header
LB: loop body
LE: loop exit
PB: predicated region body
PF: predicated region fallthrough
CT: control target
= control target key end

     0   :  { %12 = vsyncpa [#allocation3], 0  ;;  %s5519_s0 = inlined_call_operand.hbm [shape: f32[512,128], index: 0, kind: input, shape index: {}]   ;;  %s5520_s1 = inlined_call_operand.vmem [shape: f32[1,128], index: 1, kind: input, shape index: {}]   ;;  %s5521_s2 = inlined_call_operand.vmem [shape: f32[1,128], index: 2, kind: input, shape index: {}]   ;;  %s5522_s3 = inlined_call_operand.hbm [shape: bf16[128,512], index: 3, kind: input, shape index: {}]   ;;  %s5523_s4 = inlined_call_operand.vmem [shape: f32[1,512], index: 4, kind: input, shape index: {}]   ;;  %s5524_s5 = inlined_call_operand.hbm [shape: bf16[512,128], index: 5, kind: input, shape index: {}]   ;;  %s5525_s6 = inlined_call_operand.vmem [shape: f32[1,128], index: 6, kind: input, shape index: {}]   ;;  %s5526_s7 = inlined_call_operand.hbm [shape: f32[512,128], index: 7, kind: output, shape index: {}]  }
   0x1   :  { %14 = vsyncpa [#allocation3 + $0x1], 0 }
   0x2   :  { %15 = vsyncpa [#allocation6], 0 }
   0x3   :  { %16 = vsyncpa [#allocation4], 0 }
   0x4   :  { %18 = vsyncpa [#allocation4 + $0x1], 0  ;;  %s3833_s24 = smov 0   ;;  %s3835_s25 = smov 0  }
   0x5   :  { %s3837_s26 = smov 0   ;;  %s3839_s27 = smov 0  }
   0x6 LB: > { %s3854_s28 = sadd.s32 4294967295, %s3778_s27   ;;  %s2835_s29 = sadd.s32 4294967294, %s3778_s27   ;;  %s3778_s27 = sphi %s3839_s27, %s5574_s27   ;;  %s3774_s26 = sphi %s3837_s26, %s5573_s26   ;;  %s3770_s25 = sphi %s3835_s25, %s5572_s25   ;;  %s3766_s24 = sphi %s3833_s24, %s5571_s24  }
   0x7   : > { %p44_p0 = scmp.ne.s32.totalorder %s3770_s25, %s3766_s24  ;;  %p5527_p1 = scmp.eq.s32.totalorder %s3854_s28, 0 }
   0x8   : > { %p200_p3 = scmp.eq.s32.totalorder %s2835_s29, 1  ;;  %p2836_p5 = scmp.ge.s32.totalorder %s3778_s27, 1 }
   0x9   : > { %p3863_p4 = por %p5527_p1, %p44_p0  ;;  %p207_p7 = scmp.lt.s32.totalorder %s3778_s27, 3 }
   0xa   : > { %p3868_p6 = por %p200_p3, %p44_p0  ;;  %s3780_s10 = smov [#allocation5]  }
   0xb   : > { %s5530_s30 = scalar_select %p3863_p4, 1, 0 }
   0xc   : > { %s5531_s8 = scalar_select %p3868_p6, 1, 0 }
   0xd   : > { %p3873_p8 = pnand %p2836_p5, %p207_p7  ;;  %s225_s11 = sshll.u32 %s3780_s10, 4  ;;  %s3877_s11 = int_to_ptr.vmem [resolvable:$true] %s225_s11 }
   0xe   : > { %s3781_s13 = smov [#allocation7]   ;;  %s3622_s17 = scalar_lea.hbm %s5522_s3, 4096 }
   0xf   : > { %p3158_p9 = pneg %p3873_p8  ;;  %s241_s14 = sshll.u32 %s3781_s13, 4  ;;  %s3888_s14 = int_to_ptr.vmem [resolvable:$true] %s241_s14 }
  0x10   : > { %p3623_p12 = scmp.ne.s32.totalorder %s5522_s3, %s3622_s17  ;;  %p3629_p5 = scmp.lt.u32.totalorder %s3622_s17, %s5522_s3 }
  0x11   : > { %p3884_p11 = pnand %p3158_p9, %p5527_p1 }
  0x13   : > { %p3624_p13 = pneg %p3884_p11 }
  0x15   : > { %p3625_p0 = pnand %p3624_p13, %p3623_p12 }
  0x17   : > { %p3626_p3 = pneg %p3625_p0 }
  0x19   : > { %p3631_p7 = pnand %p3629_p5, %p3626_p3 }
  0x1b   : > { %3634 = shalt.err (!%p3631_p7)
}
  0x1c   : > { %s3635_s22 = scalar_lea.vmem %s3877_s11, 4096  ;;  %p3643_p2 = scmp.lt.s32.totalorder %s3877_s11, %s3877_s11 }
  0x1d   : > { %p3636_p9 = scmp.ne.s32.totalorder %s3877_s11, %s3635_s22  ;;  %p3644_p12 = scmp.lt.s32.totalorder %s3635_s22, %s3635_s22 }
  0x1f   : > { %p3638_p10 = pnand %p3636_p9, %p3624_p13  ;;  %p3645_p0 = por %p3644_p12, %p3643_p2 }
  0x21   : > { %p3639_p1 = pneg %p3638_p10 }
  0x23   : > { %p3646_p6 = pnand %p3645_p0, %p3639_p1 }
  0x25   : > { %3649 = shalt.err (!%p3646_p6)
}
  0x26   : > { %s3782_s23 = smov 256   ;;  %s3783_s29 = smov 16  }
  0x27   : > { %3161 = dma.hbm_to_vmem [thread:$0]  (!%p3884_p11), %s5522_s3, 4096, %s3877_s11, [#allocation6], %s3782_s23, %s3782_s23, %s3783_s29  }
  0x28   : > { %s3650_s17 = scalar_lea.hbm %s5524_s5, 4096 }
  0x29   : > { %p3651_p2 = scmp.ne.s32.totalorder %s5524_s5, %s3650_s17  ;;  %p3657_p10 = scmp.lt.u32.totalorder %s3650_s17, %s5524_s5 }
  0x2b   : > { %p3653_p1 = pnand %p3651_p2, %p3624_p13 }
  0x2d   : > { %p3654_p6 = pneg %p3653_p1 }
  0x2f   : > { %p3659_p3 = pnand %p3657_p10, %p3654_p6 }
  0x31   : > { %3662 = shalt.err (!%p3659_p3)
}
  0x32   : > { %s3663_s11 = scalar_lea.vmem %s3888_s14, 4096  ;;  %p3671_p12 = scmp.lt.s32.totalorder %s3888_s14, %s3888_s14 }
  0x33   : > { %p3664_p5 = scmp.ne.s32.totalorder %s3888_s14, %s3663_s11  ;;  %p3672_p0 = scmp.lt.s32.totalorder %s3663_s11, %s3663_s11 }
  0x35   : > { %p3666_p7 = pnand %p3664_p5, %p3624_p13  ;;  %p3673_p2 = por %p3672_p0, %p3671_p12 }
  0x37   : > { %p3667_p9 = pneg %p3666_p7 }
  0x39   : > { %p3674_p1 = pnand %p3673_p2, %p3667_p9 }
  0x3b   : > { %3677 = shalt.err (!%p3674_p1)
}
  0x3c   : > { %s3784_s22 = smov 64   ;;  %s3785_s23 = smov 4  }
  0x3d   : > { %3164 = dma.hbm_to_vmem [thread:$0]  (!%p3884_p11), %s5524_s5, 4096, %s3888_s14, [#allocation6], %s3784_s22, %s3784_s22, %s3785_s23  }
  0x3e   : > { %s3943_s13 = sadd.s32 1, %s3778_s27   ;;  %s31_s16 = sadd.s32 1, %s3774_s26 }
  0x3f   : > { %s28_s15 = ssub.s32 %s3778_s27, %s3943_s13  ;;  %p38_p6 = scmp.ne.s32.totalorder %s3774_s26, %s3770_s25 }
  0x40   : > { %p29_p13 = scmp.eq.s32.totalorder %s28_s15, 0  ;;  %p39_p10 = scmp.eq.s32.totalorder %s3778_s27, 0 }
  0x41   : > { %p5534_p5 = scmp.eq.s32.totalorder %s3854_s28, 1  ;;  %p3175_p9 = scmp.lt.s32.totalorder %s3778_s27, 2 }
  0x42   : > { %s3952_s17 = scalar_select %p29_p13, %s3774_s26, %s31_s16  }
  0x43   : > { %p40_p3 = por %p39_p10, %p38_p6  ;;  %p3956_p7 = por %p5534_p5, %p38_p6 }
  0x44   : > { %s258_s12 = sand.u32 1, %s3774_s26   ;;  %s2920_s14 = sshll.u32 %s3778_s27, 12 }
  0x45   : > { %s5535_s18 = scalar_select %p3956_p7, 1, 0 }
  0x46   : > { %s2840_s19 = sshll.u32 %s258_s12, 8  ;;  %s3966_s11 = scalar_lea.hbm %s5519_s0, %s2920_s14 }
  0x47   : > { %s262_s22 = scalar_lea.vmem [#allocation2], %s2840_s19  ;;  %p3970_p11 = pnand %p3175_p9, %p40_p3 }
  0x48   : > { %s269_s23 = sshll.u32 %s262_s22, 4  ;;  %s3974_s10 = scalar_lea.sflag [#allocation3], %s258_s12  ;;  %s3968_s23 = int_to_ptr.vmem [resolvable:$true] %s269_s23 }
  0x49   : > { %s3678_s15 = scalar_lea.hbm %s3966_s11, 4096  ;;  %p3680_p0 = pneg %p3970_p11 }
  0x4a   : > { %p3679_p12 = scmp.ne.s32.totalorder %s3966_s11, %s3678_s15  ;;  %s3683_s14 = scalar_lea.hbm %s5519_s0, 8192 }
  0x4b   : > { %p3684_p13 = scmp.lt.u32.totalorder %s3966_s11, %s5519_s0  ;;  %p3685_p6 = scmp.lt.u32.totalorder %s3683_s14, %s3678_s15 }
  0x4c   : > { %p3681_p2 = pnand %p3680_p0, %p3679_p12  ;;  %p3687_p3 = scmp.lt.u32.totalorder %s3678_s15, %s3966_s11 }
  0x4d   : > { %p3686_p10 = por %p3685_p6, %p3684_p13 }
  0x4e   : > { %p3682_p1 = pneg %p3681_p2 }
  0x4f   : > { %p3688_p5 = por %p3687_p3, %p3686_p10 }
  0x51   : > { %p3689_p9 = pnand %p3688_p5, %p3682_p1 }
  0x53   : > { %3692 = shalt.err (!%p3689_p9)
}
  0x54   : > { %s3693_s12 = scalar_lea.vmem %s3968_s23, 4096  ;;  %s3786_s22 = smov [#allocation2]  }
  0x55   : > { %p3694_p12 = scmp.ne.s32.totalorder %s3968_s23, %s3693_s12  ;;  %s3698_s16 = sshll.u32 %s3786_s22, 4  ;;  %s3699_s16 = int_to_ptr.vmem [resolvable:$false] %s3698_s16 }
  0x56   : > { %s3700_s19 = scalar_lea.vmem %s3699_s16, 8192  ;;  %p3701_p4 = scmp.lt.s32.totalorder %s3968_s23, %s3699_s16 }
  0x57   : > { %p3696_p2 = pnand %p3694_p12, %p3680_p0  ;;  %p3702_p13 = scmp.lt.s32.totalorder %s3700_s19, %s3693_s12 }
  0x59   : > { %p3697_p7 = pneg %p3696_p2  ;;  %p3703_p6 = por %p3702_p13, %p3701_p4 }
  0x5b   : > { %p3704_p10 = pnand %p3703_p6, %p3697_p7 }
  0x5d   : > { %3707 = shalt.err (!%p3704_p10)
}
  0x5e   : > { %s3787_s15 = smov 128   ;;  %s3788_s14 = smov 8  }
  0x5f   : > { %3168 = dma.hbm_to_vmem [thread:$0]  (!%p3970_p11), %s3966_s11, 4096, %s3968_s23, %s3974_s10, %s3787_s15, %s3787_s15, %s3788_s14  }
  0x60   : > { %281 = sbr.rel (%p3873_p8) target bundleno = 1117 (0x45d), region = 48 }
  0x67   : > { %s4005_s20 = sand.u32 1, %s3770_s25   ;;  %p5537_p4 = scmp.ne.s32.totalorder %s5530_s30, 0 }
  0x68   : > { %s2844_s21 = sshll.u32 %s4005_s20, 8  ;;  %s284_s12 = scalar_lea.sflag [#allocation3], %s4005_s20 }
  0x69   : > { %s4011_s22 = scalar_lea.vmem [#allocation2], %s2844_s21 }
  0x6a   : > { %3753 = dma.done.wait (%p5537_p4), %s284_s12, 4096  }
  0x6b   : > { %3755 = vsyncadd (%p5537_p4), %s284_s12, 4294963200  ;;  %p5538_p7 = scmp.eq.s32.totalorder %s3854_s28, 0 }
  0x6d   : > { %3757 = dma.done.wait (%p5538_p7), [#allocation6], 8192   ;;  %p5539_p8 = pmov %p5538_p7 }
  0x6e   : > { %v329_v0 = vld [vmem:[%s4011_s22] sm:$0xff]  ;;  %v331_v1 = vld [vmem:[%s4011_s22 + $0x10] sm:$0xff]  ;;  %v330_v2 = vld [vmem:[%s4011_s22 + $0x8] sm:$0xff]  ;;  %s5404_s15 = scalar_lea.vmem [#allocation8], %s2844_s21  ;;  %s2921_s14 = sshll.u32 %s3854_s28, 12 }
  0x6f   : > { %3759 = vsyncadd (%p5539_p8), [#allocation6], 4294959104  ;;  %361 = vadd.xlane.f32.xlu0 %v329_v0  ;;  %365 = vadd.xlane.f32.xlu1 %v331_v1  ;;  %v4025_v3 = vld [vmem:[%s4011_s22 + $0x18] sm:$0xff]  ;;  %v4029_v4 = vld [vmem:[%s4011_s22 + $0x20] sm:$0xff]  ;;  %s2743_s21 = sshll.u32 %s5404_s15, 4  ;;  %s5471_s30 = scalar_lea.hbm %s5526_s7, %s2921_s14  ;;  %s5473_s21 = int_to_ptr.vmem [resolvable:$true] %s2743_s21 }
  0x70   : > { %v4032_v5 = vld [vmem:[%s4011_s22 + $0x28] sm:$0xff]  ;;  %v4035_v6 = vld [vmem:[%s4011_s22 + $0x30] sm:$0xff]  ;;  %v4038_v7 = vld [vmem:[%s4011_s22 + $0x38] sm:$0xff]  ;;  %s2730_s28 = scalar_lea.sflag [#allocation4], %s4005_s20  ;;  %s3708_s9 = scalar_lea.vmem %s5473_s21, 4096 }
  0x71   : > { %v4043_v8 = vld [vmem:[%s4011_s22 + $0x40] sm:$0xff]  ;;  %v4046_v9 = vld [vmem:[%s4011_s22 + $0x48] sm:$0xff]  ;;  %v4051_v10 = vld [vmem:[%s4011_s22 + $0x50] sm:$0xff]  ;;  %p3709_p11 = scmp.ne.s32.totalorder %s5473_s21, %s3708_s9  ;;  %p5568_p0 = scmp.ne.s32.totalorder %s5535_s18, 0 }
  0x72   : > { %v4054_v11 = vld [vmem:[%s4011_s22 + $0x58] sm:$0xff]  ;;  %v4059_v12 = vld [vmem:[%s4011_s22 + $0x60] sm:$0xff]  ;;  %v4064_v13 = vld [vmem:[%s4011_s22 + $0x68] sm:$0xff]  ;;  %s3790_s11 = smov [#allocation8]  }
  0x73   : > { %363 = vadd.xlane.f32.xlu0 %v330_v2  ;;  %367 = vadd.xlane.f32.xlu1 %v4025_v3  ;;  %v4067_v14 = vld [vmem:[%s4011_s22 + $0x70] sm:$0xff]  ;;  %v4070_v15 = vld [vmem:[%s4011_s22 + $0x78] sm:$0xff]  ;;  %v4075_v16 = vld [vmem:[%s4011_s22 + $0x80] sm:$0xff]  ;;  %p3710_p1 = pnand %p3709_p11, %p5568_p0  ;;  %s3712_s23 = sshll.u32 %s3790_s11, 4  ;;  %s3713_s23 = int_to_ptr.vmem [resolvable:$false] %s3712_s23 }
  0x74   : > { %v4080_v17 = vld [vmem:[%s4011_s22 + $0x88] sm:$0xff]  ;;  %v4083_v18 = vld [vmem:[%s4011_s22 + $0x90] sm:$0xff]  ;;  %v4088_v19 = vld [vmem:[%s4011_s22 + $0x98] sm:$0xff]  ;;  %s3714_s29 = scalar_lea.vmem %s3713_s23, 8192  ;;  %p3715_p5 = scmp.lt.s32.totalorder %s5473_s21, %s3713_s23 }
  0x75   : > { %v3222_v20 = vld [vmem:[#allocation5 + $0x4] ss:$16 sps:$4 sm:$0xff]   ;;  %v3224_v21 = vld [vmem:[#allocation5 + $0xc] ss:$16 sps:$4 sm:$0xff]   ;;  %v3226_v22 = vld [vmem:[#allocation5] ss:$16 sps:$4 sm:$0xff]   ;;  %p3711_p3 = pneg %p3710_p1  ;;  %p3716_p9 = scmp.lt.s32.totalorder %s3714_s29, %s3708_s9 }
  0x76   : > { %v3227_v23 = vld [vmem:[#allocation5 + $0x8] ss:$16 sps:$4 sm:$0xff]   ;;  %v3228_v24 = vld [vmem:[#allocation5 + $0x24] ss:$16 sps:$4 sm:$0xff]   ;;  %v3230_v25 = vld [vmem:[#allocation5 + $0x2c] ss:$16 sps:$4 sm:$0xff]   ;;  %1022 = vmatprep.subr.bf16.mxu0 %v3222_v20  ;;  %1215 = vmatprep.subr.bf16.mxu1 %v3224_v21 }
  0x77   : > { %369 = vadd.xlane.f32.xlu0 %v4029_v4  ;;  %371 = vadd.xlane.f32.xlu1 %v4032_v5  ;;  %v4101_v38 = vld [vmem:[%s4011_s22 + $0xa0] sm:$0xff]  ;;  %v4112_v44 = vld [vmem:[%s4011_s22 + $0xa8] sm:$0xff]  ;;  %v4121_v49 = vld [vmem:[%s4011_s22 + $0xb0] sm:$0xff]  ;;  %p3717_p12 = por %p3716_p9, %p3715_p5 }
  0x78   : > { %1023 = vmatpush1.bf16.msra.mxu0 %v3226_v22  ;;  %1216 = vmatpush1.bf16.msra.mxu1 %v3227_v23  ;;  %v3232_v54 = vld [vmem:[#allocation5 + $0x20] ss:$16 sps:$4 sm:$0xff]   ;;  %v3233_v55 = vld [vmem:[#allocation5 + $0x28] ss:$16 sps:$4 sm:$0xff]   ;;  %v3234_v58 = vld [vmem:[#allocation5 + $0x44] ss:$16 sps:$4 sm:$0xff]  }
  0x79   : > { %1024 = vmatprep.subr.bf16.mxu0 %v3228_v24  ;;  %1217 = vmatprep.subr.bf16.mxu1 %v3230_v25  ;;  %v4130_v56 = vld [vmem:[%s4011_s22 + $0xb8] sm:$0xff]  ;;  %v3238_v63 = vld [vmem:[#allocation5 + $0x40] ss:$16 sps:$4 sm:$0xff]   ;;  %v4148_v23 = vld [vmem:[%s4011_s22 + $0xc8] sm:$0xff]  ;;  %p3718_p2 = pnand %p3717_p12, %p3711_p3 }
  0x7a   : > { %v3236_v59 = vld [vmem:[#allocation5 + $0x4c] ss:$16 sps:$4 sm:$0xff]   ;;  %v3244_v21 = vld [vmem:[#allocation5 + $0x60] ss:$16 sps:$4 sm:$0xff]   ;;  %v3245_v22 = vld [vmem:[#allocation5 + $0x68] ss:$16 sps:$4 sm:$0xff]  }
  0x7b   : > { %373 = vadd.xlane.f32.xlu0 %v4035_v6  ;;  %375 = vadd.xlane.f32.xlu1 %v4038_v7 }
  0x7c   : > { %1025 = vmatpush1.bf16.msra.mxu0 %v3232_v54  ;;  %1218 = vmatpush1.bf16.msra.mxu1 %v3233_v55 }
  0x7d   : > { %1026 = vmatprep.subr.bf16.mxu0 %v3234_v58  ;;  %1219 = vmatprep.subr.bf16.mxu1 %v3236_v59  ;;  %v3263_v58 = vld [vmem:[#allocation5 + $0xc8] ss:$16 sps:$4 sm:$0xff]   ;;  %v4175_v59 = vld [vmem:[%s4011_s22 + $0xe0] sm:$0xff] }
  0x7f   : > { %377 = vadd.xlane.f32.xlu0 %v4043_v8  ;;  %379 = vadd.xlane.f32.xlu1 %v4046_v9 }
  0x80   : > { %1027 = vmatpush1.bf16.msra.mxu0 %v3238_v63  ;;  %v3266_v63 = vld [vmem:[#allocation5 + $0xec] ss:$16 sps:$4 sm:$0xff]  }
  0x83   : > { %381 = vadd.xlane.f32.xlu0 %v4051_v10  ;;  %383 = vadd.xlane.f32.xlu1 %v4054_v11 }
  0x87   : > { %385 = vadd.xlane.f32.xlu0 %v4059_v12  ;;  %387 = vadd.xlane.f32.xlu1 %v4064_v13 }
  0x8b   : > { %389 = vadd.xlane.f32.xlu0 %v4067_v14  ;;  %391 = vadd.xlane.f32.xlu1 %v4070_v15 }
  0x8f   : > { %393 = vadd.xlane.f32.xlu0 %v4075_v16  ;;  %395 = vadd.xlane.f32.xlu1 %v4080_v17 }
  0x93   : > { %397 = vadd.xlane.f32.xlu0 %v4083_v18  ;;  %399 = vadd.xlane.f32.xlu1 %v4088_v19 }
  0xfc   : > { %v362_v26 = vpop.xlane.xlu0 %361  ;;  %v366_v27 = vpop.xlane.xlu1 %365 }
  0xfd   : > { %v426_v28 = vmul.f32 0.0078125, %v362_v26  ;;  %v428_v30 = vmul.f32 0.0078125, %v366_v27  ;;  %v3246_v26 = vld [vmem:[#allocation5 + $0x84] ss:$16 sps:$4 sm:$0xff]   ;;  %v3248_v27 = vld [vmem:[#allocation5 + $0x8c] ss:$16 sps:$4 sm:$0xff]  }
  0xff   : > { %v4092_v29 = vsub.f32 %v329_v0, %v426_v28  ;;  %v4098_v36 = vsub.f32 %v331_v1, %v428_v30  ;;  %v3239_v0 = vld [vmem:[#allocation5 + $0x48] ss:$16 sps:$4 sm:$0xff]   ;;  %v4139_v1 = vld [vmem:[%s4011_s22 + $0xc0] sm:$0xff] }
 0x100   : > { %v364_v31 = vpop.xlane.xlu0 %363  ;;  %v368_v32 = vpop.xlane.xlu1 %367  ;;  %1220 = vmatpush1.bf16.msra.mxu1 %v3239_v0 }
 0x101   : > { %v427_v33 = vmul.f32 0.0078125, %v364_v31  ;;  %v490_v34 = vmul.f32 %v4092_v29, %v4092_v29  ;;  %v429_v37 = vmul.f32 0.0078125, %v368_v32  ;;  %v492_v42 = vmul.f32 %v4098_v36, %v4098_v36  ;;  %v3250_v31 = vld [vmem:[#allocation5 + $0x80] ss:$16 sps:$4 sm:$0xff]   ;;  %v3251_v32 = vld [vmem:[#allocation5 + $0x88] ss:$16 sps:$4 sm:$0xff]  }
 0x103   : > { %v4096_v35 = vsub.f32 %v330_v2, %v427_v33  ;;  %522 = vadd.xlane.f32.xlu0 %v490_v34  ;;  %v4107_v41 = vsub.f32 %v4025_v3, %v429_v37  ;;  %v3240_v3 = vld [vmem:[#allocation5 + $0x64] ss:$16 sps:$4 sm:$0xff]  }
 0x104   : > { %v370_v39 = vpop.xlane.xlu0 %369  ;;  %v372_v45 = vpop.xlane.xlu1 %371  ;;  %1028 = vmatprep.subr.bf16.mxu0 %v3240_v3  ;;  %v4157_v33 = vld [vmem:[%s4011_s22 + $0xd0] sm:$0xff] }
 0x105   : > { %v491_v40 = vmul.f32 %v4096_v35, %v4096_v35  ;;  %v430_v43 = vmul.f32 0.0078125, %v370_v39  ;;  %v493_v47 = vmul.f32 %v4107_v41, %v4107_v41  ;;  %v431_v48 = vmul.f32 0.0078125, %v372_v45  ;;  %1029 = vmatpush1.bf16.msra.mxu0 %v3244_v21  ;;  %v3252_v39 = vld [vmem:[#allocation5 + $0xa4] ss:$16 sps:$4 sm:$0xff]   ;;  %v3256_v45 = vld [vmem:[#allocation5 + $0xa0] ss:$16 sps:$4 sm:$0xff]  }
 0x106   : > { %1030 = vmatprep.subr.bf16.mxu0 %v3246_v26  ;;  %v3268_v3 = vld [vmem:[#allocation5 + $0xe0] ss:$16 sps:$4 sm:$0xff]  }
 0x107   : > { %401 = vadd.xlane.f32.xlu0 %v4101_v38  ;;  %524 = vadd.xlane.f32.xlu1 %v491_v40  ;;  %v4116_v46 = vsub.f32 %v4029_v4, %v430_v43  ;;  %v4125_v51 = vsub.f32 %v4032_v5, %v431_v48  ;;  %v3242_v4 = vld [vmem:[#allocation5 + $0x6c] ss:$16 sps:$4 sm:$0xff]   ;;  %v4193_v26 = vld [vmem:[%s4011_s22 + $0xf0] sm:$0xff] }
 0x108   : > { %v374_v50 = vpop.xlane.xlu0 %373  ;;  %v376_v57 = vpop.xlane.xlu1 %375  ;;  %1221 = vmatprep.subr.bf16.mxu1 %v3242_v4  ;;  %v3254_v40 = vld [vmem:[#allocation5 + $0xac] ss:$16 sps:$4 sm:$0xff]   ;;  %v3269_v4 = vld [vmem:[#allocation5 + $0xe8] ss:$16 sps:$4 sm:$0xff]  }
 0x109   : > { %v494_v52 = vmul.f32 %v4116_v46, %v4116_v46  ;;  %v432_v53 = vmul.f32 0.0078125, %v374_v50  ;;  %v495_v61 = vmul.f32 %v4125_v51, %v4125_v51  ;;  %v433_v62 = vmul.f32 0.0078125, %v376_v57  ;;  %1222 = vmatpush1.bf16.msra.mxu1 %v3245_v22  ;;  %1031 = vmatpush1.bf16.msra.mxu0 %v3250_v31  ;;  %v4166_v48 = vld [vmem:[%s4011_s22 + $0xd8] sm:$0xff]  ;;  %v3262_v57 = vld [vmem:[#allocation5 + $0xc0] ss:$16 sps:$4 sm:$0xff]  }
 0x10a   : > { %1223 = vmatprep.subr.bf16.mxu1 %v3248_v27  ;;  %1032 = vmatprep.subr.bf16.mxu0 %v3252_v39  ;;  %v3789_v27 = vmov 0  }
 0x10b   : > { %526 = vadd.xlane.f32.xlu0 %v492_v42  ;;  %403 = vadd.xlane.f32.xlu1 %v4112_v44  ;;  %v4134_v60 = vsub.f32 %v4035_v6, %v432_v53  ;;  %v4143_v5 = vsub.f32 %v4038_v7, %v433_v62  ;;  %v3260_v53 = vld [vmem:[#allocation5 + $0xcc] ss:$16 sps:$4 sm:$0xff]   ;;  %v3264_v62 = vld [vmem:[#allocation5 + $0xe4] ss:$16 sps:$4 sm:$0xff]  }
 0x10c   : > { %v378_v2 = vpop.xlane.xlu0 %377  ;;  %v380_v24 = vpop.xlane.xlu1 %379  ;;  %1054 = vmatprep.mubr.bf16.mxu0 %v3789_v27  ;;  %1247 = vmatprep.mubr.bf16.mxu1 %v3789_v27 }
 0x10d   : > { %v496_v6 = vmul.f32 %v4134_v60, %v4134_v60  ;;  %v434_v20 = vmul.f32 0.0078125, %v378_v2  ;;  %v497_v28 = vmul.f32 %v4143_v5, %v4143_v5  ;;  %v435_v30 = vmul.f32 0.0078125, %v380_v24  ;;  %1224 = vmatpush1.bf16.msra.mxu1 %v3251_v32  ;;  %1033 = vmatpush1.bf16.msra.mxu0 %v3256_v45 }
 0x10e   : > { %1225 = vmatprep.subr.bf16.mxu1 %v3254_v40 }
 0x10f   : > { %405 = vadd.xlane.f32.xlu0 %v4121_v49  ;;  %528 = vadd.xlane.f32.xlu1 %v493_v47  ;;  %v4152_v7 = vsub.f32 %v4043_v8, %v434_v20  ;;  %v4161_v8 = vsub.f32 %v4046_v9, %v435_v30  ;;  %v3257_v47 = vld [vmem:[#allocation5 + $0xa8] ss:$16 sps:$4 sm:$0xff]  }
 0x110   : > { %v382_v25 = vpop.xlane.xlu0 %381  ;;  %v384_v34 = vpop.xlane.xlu1 %383 }
 0x111   : > { %v498_v42 = vmul.f32 %v4152_v7, %v4152_v7  ;;  %v436_v43 = vmul.f32 0.0078125, %v382_v25  ;;  %1226 = vmatpush1.bf16.msra.mxu1 %v3257_v47  ;;  %v499_v54 = vmul.f32 %v4161_v8, %v4161_v8  ;;  %v437_v55 = vmul.f32 0.0078125, %v384_v34 }
 0x112   : > { %1227 = vmatprep.subr.bf16.mxu1 %v3260_v53 }
 0x113   : > { %407 = vadd.xlane.f32.xlu1 %v4130_v56  ;;  %530 = vadd.xlane.f32.xlu0 %v494_v52  ;;  %v3258_v52 = vld [vmem:[#allocation5 + $0xc4] ss:$16 sps:$4 sm:$0xff]   ;;  %v4170_v9 = vsub.f32 %v4051_v10, %v436_v43  ;;  %v4179_v10 = vsub.f32 %v4054_v11, %v437_v55 }
 0x114   : > { %v386_v37 = vpop.xlane.xlu0 %385  ;;  %v388_v50 = vpop.xlane.xlu1 %387  ;;  %1034 = vmatprep.subr.bf16.mxu0 %v3258_v52 }
 0x115   : > { %1035 = vmatpush1.bf16.msra.mxu0 %v3262_v57  ;;  %1228 = vmatpush1.bf16.msra.mxu1 %v3263_v58  ;;  %v500_v0 = vmul.f32 %v4170_v9, %v4170_v9  ;;  %v438_v2 = vmul.f32 0.0078125, %v386_v37  ;;  %v439_v21 = vmul.f32 0.0078125, %v388_v50  ;;  %v501_v24 = vmul.f32 %v4179_v10, %v4179_v10  ;;  %v4207_v37 = vld [vmem:[%s4011_s22 + $0xf8] sm:$0xff] }
 0x116   : > { %1036 = vmatprep.subr.bf16.mxu0 %v3264_v62  ;;  %1229 = vmatprep.subr.bf16.mxu1 %v3266_v63 }
 0x117   : > { %532 = vadd.xlane.f32.xlu1 %v495_v61  ;;  %409 = vadd.xlane.f32.xlu0 %v4139_v1  ;;  %v4188_v11 = vsub.f32 %v4059_v12, %v438_v2 }
 0x118   : > { %v390_v61 = vpop.xlane.xlu0 %389  ;;  %v392_v20 = vpop.xlane.xlu1 %391 }
 0x119   : > { %1037 = vmatpush1.bf16.msra.mxu0 %v3268_v3  ;;  %1230 = vmatpush1.bf16.msra.mxu1 %v3269_v4  ;;  %v440_v25 = vmul.f32 0.0078125, %v390_v61  ;;  %v441_v30 = vmul.f32 0.0078125, %v392_v20  ;;  %v502_v32 = vmul.f32 %v4188_v11, %v4188_v11 }
 0x11b   : > { %411 = vadd.xlane.f32.xlu1 %v4148_v23  ;;  %534 = vadd.xlane.f32.xlu0 %v496_v6  ;;  %v4184_v6 = vld [vmem:[%s4011_s22 + $0xe8] sm:$0xff]  ;;  %v4202_v12 = vsub.f32 %v4067_v14, %v440_v25  ;;  %v4210_v40 = vsub.f32 %v4070_v15, %v441_v30 }
 0x11c   : > { %v394_v22 = vpop.xlane.xlu0 %393  ;;  %v396_v31 = vpop.xlane.xlu1 %395 }
 0x11d   : > { %v442_v34 = vmul.f32 0.0078125, %v394_v22  ;;  %v504_v14 = vmul.f32 %v4202_v12, %v4202_v12  ;;  %v443_v43 = vmul.f32 0.0078125, %v396_v31  ;;  %v505_v50 = vmul.f32 %v4210_v40, %v4210_v40 }
 0x11f   : > { %536 = vadd.xlane.f32.xlu1 %v497_v28  ;;  %413 = vadd.xlane.f32.xlu0 %v4157_v33  ;;  %v4198_v28 = vsub.f32 %v4064_v13, %v439_v21  ;;  %v4223_v15 = vsub.f32 %v4080_v17, %v443_v43 }
 0x120   : > { %v398_v39 = vpop.xlane.xlu0 %397  ;;  %v400_v47 = vpop.xlane.xlu1 %399 }
 0x121   : > { %v503_v13 = vmul.f32 %v4198_v28, %v4198_v28  ;;  %v444_v45 = vmul.f32 0.0078125, %v398_v39  ;;  %v445_v53 = vmul.f32 0.0078125, %v400_v47  ;;  %v507_v55 = vmul.f32 %v4223_v15, %v4223_v15 }
 0x123   : > { %415 = vadd.xlane.f32.xlu1 %v4166_v48  ;;  %538 = vadd.xlane.f32.xlu0 %v498_v42  ;;  %v4216_v42 = vsub.f32 %v4075_v16, %v442_v34  ;;  %v4226_v52 = vsub.f32 %v4083_v18, %v444_v45 }
 0x125   : > { %v506_v16 = vmul.f32 %v4216_v42, %v4216_v42  ;;  %v508_v57 = vmul.f32 %v4226_v52, %v4226_v52 }
 0x127   : > { %540 = vadd.xlane.f32.xlu1 %v499_v54  ;;  %417 = vadd.xlane.f32.xlu0 %v4175_v59  ;;  %v4231_v54 = vsub.f32 %v4088_v19, %v445_v53 }
 0x129   : > { %v509_v17 = vmul.f32 %v4231_v54, %v4231_v54 }
 0x12b   : > { %419 = vadd.xlane.f32.xlu1 %v4184_v6  ;;  %542 = vadd.xlane.f32.xlu0 %v500_v0 }
 0x12f   : > { %544 = vadd.xlane.f32.xlu1 %v501_v24  ;;  %421 = vadd.xlane.f32.xlu0 %v4193_v26 }
 0x133   : > { %423 = vadd.xlane.f32.xlu1 %v4207_v37  ;;  %546 = vadd.xlane.f32.xlu0 %v502_v32 }
 0x137   : > { %548 = vadd.xlane.f32.xlu1 %v503_v13  ;;  %550 = vadd.xlane.f32.xlu0 %v504_v14 }
 0x13b   : > { %552 = vadd.xlane.f32.xlu1 %v505_v50  ;;  %554 = vadd.xlane.f32.xlu0 %v506_v16 }
 0x13f   : > { %556 = vadd.xlane.f32.xlu1 %v507_v55  ;;  %558 = vadd.xlane.f32.xlu0 %v508_v57  ;;  %v4258_v55 = vld [vmem:[%s5520_s1] ss:$0 sm:$0xff] }
 0x143   : > { %560 = vadd.xlane.f32.xlu1 %v509_v17 }
 0x190   : > { %v523_v18 = vpop.xlane.xlu0 %522 }
 0x191   : > { %v586_v58 = vmul.f32 0.0078125, %v523_v18 }
 0x193   : > { %v618_v61 = vadd.f32 1e-05, %v586_v58 }
 0x194   : > { %v525_v62 = vpop.xlane.xlu1 %524  ;;  %v402_v63 = vpop.xlane.xlu0 %401 }
 0x195   : > { %3302 = vrsqrt.f32 %v618_v61  ;;  %v587_v19 = vmul.f32 0.0078125, %v525_v62  ;;  %v446_v0 = vmul.f32 0.0078125, %v402_v63 }
 0x197   : > { %v619_v2 = vadd.f32 1e-05, %v587_v19  ;;  %v4240_v3 = vsub.f32 %v4101_v38, %v446_v0  ;;  %v4270_v0 = vld [vmem:[%s5521_s2] ss:$0 sm:$0xff] }
 0x198   : > { %v404_v4 = vpop.xlane.xlu1 %403  ;;  %v527_v20 = vpop.xlane.xlu0 %526 }
 0x199   : > { %3304 = vrsqrt.f32 %v619_v2  ;;  %v447_v21 = vmul.f32 0.0078125, %v404_v4  ;;  %v588_v22 = vmul.f32 0.0078125, %v527_v20  ;;  %v510_v24 = vmul.f32 %v4240_v3, %v4240_v3 }
 0x19b   : > { %v4245_v25 = vsub.f32 %v4112_v44, %v447_v21  ;;  %v620_v30 = vadd.f32 1e-05, %v588_v22  ;;  %562 = vadd.xlane.f32.xlu0 %v510_v24 }
 0x19c   : > { %v529_v31 = vpop.xlane.xlu1 %528  ;;  %v406_v32 = vpop.xlane.xlu0 %405 }
 0x19d   : > { %3306 = vrsqrt.f32 %v620_v30  ;;  %v589_v34 = vmul.f32 0.0078125, %v529_v31  ;;  %v448_v39 = vmul.f32 0.0078125, %v406_v32  ;;  %v511_v38 = vmul.f32 %v4245_v25, %v4245_v25 }
 0x19f   : > { %v3303_v13 = vpop.eup %3302  ;;  %v621_v14 = vadd.f32 1e-05, %v589_v34  ;;  %v4250_v43 = vsub.f32 %v4121_v49, %v448_v39  ;;  %564 = vadd.xlane.f32.xlu1 %v511_v38 }
 0x1a0   : > { %v408_v45 = vpop.xlane.xlu1 %407  ;;  %v531_v47 = vpop.xlane.xlu0 %530  ;;  %v682_v44 = vmul.f32 %v3303_v13, %v4092_v29 }
 0x1a1   : > { %3308 = vrsqrt.f32 %v621_v14  ;;  %v449_v50 = vmul.f32 0.0078125, %v408_v45  ;;  %v590_v16 = vmul.f32 0.0078125, %v531_v47  ;;  %v512_v53 = vmul.f32 %v4250_v43, %v4250_v43 }
 0x1a2   : > { %v721_v61 = vmul.f32 %v4258_v55, %v682_v44 }
 0x1a3   : > { %v3305_v57 = vpop.eup %3304  ;;  %v4261_v49 = vsub.f32 %v4130_v56, %v449_v50  ;;  %v622_v17 = vadd.f32 1e-05, %v590_v16  ;;  %566 = vadd.xlane.f32.xlu0 %v512_v53 }
 0x1a4   : > { %v533_v18 = vpop.xlane.xlu1 %532  ;;  %v410_v58 = vpop.xlane.xlu0 %409  ;;  %v683_v29 = vmul.f32 %v3305_v57, %v4096_v35  ;;  %v760_v22 = vadd.f32 %v4270_v0, %v721_v61 }
 0x1a5   : > { %3310 = vrsqrt.f32 %v622_v17  ;;  %v591_v62 = vmul.f32 0.0078125, %v533_v18  ;;  %v450_v63 = vmul.f32 0.0078125, %v410_v58  ;;  %v513_v19 = vmul.f32 %v4261_v49, %v4261_v49 }
 0x1a6   : > { %v722_v56 = vmul.f32 %v4258_v55, %v683_v29 }
 0x1a7   : > { %v3307_v2 = vpop.eup %3306  ;;  %v623_v4 = vadd.f32 1e-05, %v591_v62  ;;  %v4274_v20 = vsub.f32 %v4139_v1, %v450_v63  ;;  %568 = vadd.xlane.f32.xlu1 %v513_v19 }
 0x1a8   : > { %v412_v35 = vpop.xlane.xlu1 %411  ;;  %v535_v21 = vpop.xlane.xlu0 %534  ;;  %v761_v24 = vadd.f32 %v4270_v0, %v722_v56  ;;  %v684_v30 = vmul.f32 %v3307_v2, %v4098_v36 }
 0x1a9   : > { %3312 = vrsqrt.f32 %v623_v4  ;;  %v451_v31 = vmul.f32 0.0078125, %v412_v35  ;;  %v592_v32 = vmul.f32 0.0078125, %v535_v21  ;;  %v514_v34 = vmul.f32 %v4274_v20, %v4274_v20 }
 0x1aa   : > { %v792_v39 = vpack.c.bf16 %v761_v24, %v760_v22  ;;  %v723_v36 = vmul.f32 %v4258_v55, %v684_v30 }
 0x1ab   : > { %v3309_v38 = vpop.eup %3308  ;;  %v4282_v1 = vsub.f32 %v4148_v23, %v451_v31  ;;  %v624_v13 = vadd.f32 1e-05, %v592_v32  ;;  %570 = vadd.xlane.f32.xlu0 %v514_v34 }
 0x1ac   : > { %v537_v14 = vpop.xlane.xlu1 %536  ;;  %1055 = vmatmul.mubr.bf16.vlgmr.msra.gmra.mrb[0].mxu0 %v792_v39  ;;  %1248 = vmatmul.mubr.bf16.vlgmr.msra.gmra.mrb[0].mxu1 %v792_v39  ;;  %v414_v45 = vpop.xlane.xlu0 %413  ;;  %v685_v47 = vmul.f32 %v3309_v38, %v4107_v41  ;;  %v762_v58 = vadd.f32 %v4270_v0, %v723_v36 }
 0x1ad   : > { %3314 = vrsqrt.f32 %v624_v13  ;;  %v593_v44 = vmul.f32 0.0078125, %v537_v14  ;;  %v452_v50 = vmul.f32 0.0078125, %v414_v45  ;;  %v515_v16 = vmul.f32 %v4282_v1, %v4282_v1  ;;  %1064 = vmatprep.mubr.bf16.mxu0 %v3789_v27  ;;  %1257 = vmatprep.mubr.bf16.mxu1 %v3789_v27 }
 0x1ae   : > { %v724_v23 = vmul.f32 %v4258_v55, %v685_v47 }
 0x1af   : > { %v3311_v53 = vpop.eup %3310  ;;  %v625_v57 = vadd.f32 1e-05, %v593_v44  ;;  %v4292_v17 = vsub.f32 %v4157_v33, %v452_v50  ;;  %572 = vadd.xlane.f32.xlu1 %v515_v16 }
 0x1b0   : > { %v416_v41 = vpop.xlane.xlu1 %415  ;;  %v539_v18 = vpop.xlane.xlu0 %538  ;;  %v763_v29 = vadd.f32 %v4270_v0, %v724_v23  ;;  %v686_v61 = vmul.f32 %v3311_v53, %v4116_v46 }
 0x1b1   : > { %3316 = vrsqrt.f32 %v625_v57  ;;  %v453_v62 = vmul.f32 0.0078125, %v416_v41  ;;  %v594_v63 = vmul.f32 0.0078125, %v539_v18  ;;  %v516_v19 = vmul.f32 %v4292_v17, %v4292_v17 }
 0x1b2   : > { %v793_v56 = vpack.c.bf16 %v763_v29, %v762_v58  ;;  %v725_v46 = vmul.f32 %v4258_v55, %v686_v61 }
 0x1b3   : > { %v3313_v2 = vpop.eup %3312  ;;  %v4300_v33 = vsub.f32 %v4166_v48, %v453_v62  ;;  %v626_v4 = vadd.f32 1e-05, %v594_v63  ;;  %574 = vadd.xlane.f32.xlu0 %v516_v19 }
 0x1b4   : > { %v541_v35 = vpop.xlane.xlu1 %540  ;;  %1065 = vmatmul.mubr.bf16.gmra.mrb[4].mxu0 %v793_v56  ;;  %1258 = vmatmul.mubr.bf16.gmra.mrb[4].mxu1 %v793_v56  ;;  %v418_v21 = vpop.xlane.xlu0 %417  ;;  %v687_v22 = vmul.f32 %v3313_v2, %v4125_v51  ;;  %v764_v13 = vadd.f32 %v4270_v0, %v725_v46 }
 0x1b5   : > { %3318 = vrsqrt.f32 %v626_v4  ;;  %v595_v24 = vmul.f32 0.0078125, %v541_v35  ;;  %v454_v30 = vmul.f32 0.0078125, %v418_v21  ;;  %v517_v31 = vmul.f32 %v4300_v33, %v4300_v33  ;;  %1074 = vmatprep.mubr.bf16.mxu0 %v3789_v27  ;;  %1267 = vmatprep.mubr.bf16.mxu1 %v3789_v27 }
 0x1b6   : > { %v726_v48 = vmul.f32 %v4258_v55, %v687_v22 }
 0x1b7   : > { %v3315_v32 = vpop.eup %3314  ;;  %v627_v34 = vadd.f32 1e-05, %v595_v24  ;;  %v4310_v39 = vsub.f32 %v4175_v59, %v454_v30  ;;  %576 = vadd.xlane.f32.xlu1 %v517_v31 }
 0x1b8   : > { %v420_v51 = vpop.xlane.xlu1 %419  ;;  %v543_v38 = vpop.xlane.xlu0 %542  ;;  %v765_v14 = vadd.f32 %v4270_v0, %v726_v48  ;;  %v688_v45 = vmul.f32 %v3315_v32, %v4134_v60 }
 0x1b9   : > { %3320 = vrsqrt.f32 %v627_v34  ;;  %v455_v47 = vmul.f32 0.0078125, %v420_v51  ;;  %v596_v36 = vmul.f32 0.0078125, %v543_v38  ;;  %v518_v44 = vmul.f32 %v4310_v39, %v4310_v39 }
 0x1ba   : > { %v794_v50 = vpack.c.bf16 %v765_v14, %v764_v13  ;;  %v727_v60 = vmul.f32 %v4258_v55, %v688_v45 }
 0x1bb   : > { %v3317_v16 = vpop.eup %3316  ;;  %v4318_v59 = vsub.f32 %v4184_v6, %v455_v47  ;;  %v628_v23 = vadd.f32 1e-05, %v596_v36  ;;  %578 = vadd.xlane.f32.xlu0 %v518_v44 }
 0x1bc   : > { %v545_v53 = vpop.xlane.xlu1 %544  ;;  %1075 = vmatmul.mubr.bf16.gmra.mrb[8].mxu0 %v794_v50  ;;  %1268 = vmatmul.mubr.bf16.gmra.mrb[8].mxu1 %v794_v50  ;;  %v422_v57 = vpop.xlane.xlu0 %421  ;;  %v689_v41 = vmul.f32 %v3317_v16, %v4143_v5  ;;  %v766_v56 = vadd.f32 %v4270_v0, %v727_v60 }
 0x1bd   : > { %3322 = vrsqrt.f32 %v628_v23  ;;  %v597_v18 = vmul.f32 0.0078125, %v545_v53  ;;  %v456_v58 = vmul.f32 0.0078125, %v422_v57  ;;  %v519_v29 = vmul.f32 %v4318_v59, %v4318_v59  ;;  %1084 = vmatprep.mubr.bf16.mxu0 %v3789_v27  ;;  %1277 = vmatprep.mubr.bf16.mxu1 %v3789_v27 }
 0x1be   : > { %v728_v6 = vmul.f32 %v4258_v55, %v689_v41 }
 0x1bf   : > { %v3319_v61 = vpop.eup %3318  ;;  %v629_v62 = vadd.f32 1e-05, %v597_v18  ;;  %v4328_v63 = vsub.f32 %v4193_v26, %v456_v58  ;;  %580 = vadd.xlane.f32.xlu1 %v519_v29 }
 0x1c0   : > { %v424_v5 = vpop.xlane.xlu1 %423  ;;  %v547_v19 = vpop.xlane.xlu0 %546  ;;  %v767_v2 = vadd.f32 %v4270_v0, %v728_v6  ;;  %v690_v4 = vmul.f32 %v3319_v61, %v4152_v7 }
 0x1c1   : > { %3324 = vrsqrt.f32 %v629_v62  ;;  %v457_v35 = vmul.f32 0.0078125, %v424_v5  ;;  %v598_v21 = vmul.f32 0.0078125, %v547_v19  ;;  %v520_v22 = vmul.f32 %v4328_v63, %v4328_v63 }
 0x1c2   : > { %v795_v46 = vpack.c.bf16 %v767_v2, %v766_v56  ;;  %v729_v7 = vmul.f32 %v4258_v55, %v690_v4 }
 0x1c3   : > { %v3321_v24 = vpop.eup %3320  ;;  %v4336_v26 = vsub.f32 %v4207_v37, %v457_v35  ;;  %v630_v30 = vadd.f32 1e-05, %v598_v21  ;;  %582 = vadd.xlane.f32.xlu0 %v520_v22 }
 0x1c4   : > { %v549_v31 = vpop.xlane.xlu1 %548  ;;  %1085 = vmatmul.mubr.bf16.gmra.mrb[12].mxu0 %v795_v46  ;;  %1278 = vmatmul.mubr.bf16.gmra.mrb[12].mxu1 %v795_v46  ;;  %v551_v48 = vpop.xlane.xlu0 %550  ;;  %v691_v32 = vmul.f32 %v3321_v24, %v4161_v8  ;;  %v768_v36 = vadd.f32 %v4270_v0, %v729_v7 }
 0x1c5   : > { %3326 = vrsqrt.f32 %v630_v30  ;;  %v599_v34 = vmul.f32 0.0078125, %v549_v31  ;;  %v600_v51 = vmul.f32 0.0078125, %v551_v48  ;;  %v521_v38 = vmul.f32 %v4336_v26, %v4336_v26  ;;  %1094 = vmatprep.mubr.bf16.mxu0 %v3789_v27  ;;  %1287 = vmatprep.mubr.bf16.mxu1 %v3789_v27 }
 0x1c6   : > { %v730_v37 = vmul.f32 %v4258_v55, %v691_v32 }
 0x1c7   : > { %v3323_v13 = vpop.eup %3322  ;;  %v631_v14 = vadd.f32 1e-05, %v599_v34  ;;  %v632_v45 = vadd.f32 1e-05, %v600_v51  ;;  %584 = vadd.xlane.f32.xlu1 %v521_v38 }
 0x1c8   : > { %v553_v47 = vpop.xlane.xlu1 %552  ;;  %v555_v8 = vpop.xlane.xlu0 %554  ;;  %v769_v44 = vadd.f32 %v4270_v0, %v730_v37  ;;  %v692_v50 = vmul.f32 %v3323_v13, %v4170_v9 }
 0x1c9   : > { %3328 = vrsqrt.f32 %v631_v14  ;;  %v601_v16 = vmul.f32 0.0078125, %v553_v47  ;;  %v602_v41 = vmul.f32 0.0078125, %v555_v8  ;;  %v3271_v47 = vld [vmem:[#allocation7] sm:$0xff]  }
 0x1ca   : > { %v796_v23 = vpack.c.bf16 %v769_v44, %v768_v36  ;;  %3330 = vrsqrt.f32 %v632_v45  ;;  %v731_v58 = vmul.f32 %v4258_v55, %v692_v50  ;;  %v3270_v45 = vld [vmem:[#allocation7 + $0x40] sm:$0xff]  }
 0x1cb   : > { %v3325_v53 = vpop.eup %3324  ;;  %v633_v57 = vadd.f32 1e-05, %v601_v16  ;;  %v634_v61 = vadd.f32 1e-05, %v602_v41  ;;  %v3272_v8 = vld [vmem:[#allocation7 + $0xc0] sm:$0xff]   ;;  %2922 = vmatprep.subr.bf16.mxu0 %v3270_v45  ;;  %v3299_v45 = vld [vmem:[#allocation7 + $0xf8] sm:$0xff]  }
 0x1cc   : > { %v557_v60 = vpop.xlane.xlu1 %556  ;;  %1095 = vmatmul.mubr.bf16.gmra.mrb[16].mxu0 %v796_v23  ;;  %1288 = vmatmul.mubr.bf16.gmra.mrb[16].mxu1 %v796_v23  ;;  %v693_v18 = vmul.f32 %v3325_v53, %v4179_v10  ;;  %v559_v5 = vpop.xlane.xlu0 %558  ;;  %v770_v56 = vadd.f32 %v4270_v0, %v731_v58 }
 0x1cd   : > { %3332 = vrsqrt.f32 %v633_v57  ;;  %v603_v29 = vmul.f32 0.0078125, %v557_v60  ;;  %1104 = vmatprep.mubr.bf16.mxu0 %v3789_v27  ;;  %1297 = vmatprep.mubr.bf16.mxu1 %v3789_v27  ;;  %v604_v22 = vmul.f32 0.0078125, %v559_v5  ;;  %v3276_v5 = vld [vmem:[#allocation7 + $0xc8] sm:$0xff]  }
 0x1ce   : > { %v732_v9 = vmul.f32 %v4258_v55, %v693_v18  ;;  %3034 = vmatprep.subr.bf16.mxu1 %v3272_v8  ;;  %2923 = vmatpush3.bf16.msra.mxu0 %v3271_v47  ;;  %v3300_v47 = vld [vmem:[#allocation7 + $0x38] sm:$0xff]  }
 0x1cf   : > { %v3327_v6 = vpop.eup %3326  ;;  %v635_v62 = vadd.f32 1e-05, %v603_v29  ;;  %v636_v32 = vadd.f32 1e-05, %v604_v22  ;;  %v3283_v22 = vld [vmem:[#allocation7 + $0xd8] sm:$0xff]  }
 0x1d0   : > { %v561_v19 = vpop.xlane.xlu1 %560  ;;  %v771_v2 = vadd.f32 %v4270_v0, %v732_v9  ;;  %v694_v10 = vmul.f32 %v3327_v6, %v4188_v11  ;;  %v3301_v8 = vld [vmem:[#allocation7 + $0xb8] sm:$0xff]  }
 0x1d1   : > { %3334 = vrsqrt.f32 %v635_v62  ;;  %v605_v4 = vmul.f32 0.0078125, %v561_v19  ;;  %v3275_v62 = vld [vmem:[#allocation7 + $0x8] sm:$0xff]  }
 0x1d2   : > { %v797_v35 = vpack.c.bf16 %v771_v2, %v770_v56  ;;  %3336 = vrsqrt.f32 %v634_v61  ;;  %v733_v24 = vmul.f32 %v4258_v55, %v694_v10  ;;  %v3274_v61 = vld [vmem:[#allocation7 + $0x48] sm:$0xff]   ;;  %v3278_v2 = vld [vmem:[#allocation7 + $0x50] sm:$0xff]  }
 0x1d3   : > { %v3329_v21 = vpop.eup %3328  ;;  %v637_v31 = vadd.f32 1e-05, %v605_v4  ;;  %v3277_v19 = vld [vmem:[#allocation7 + $0x88] sm:$0xff]   ;;  %2924 = vmatprep.subr.bf16.mxu0 %v3274_v61  ;;  %v3280_v10 = vld [vmem:[#allocation7 + $0xd0] sm:$0xff]  }
 0x1d4   : > { %1105 = vmatmul.mubr.bf16.gmra.mrb[20].mxu0 %v797_v35  ;;  %1298 = vmatmul.mubr.bf16.gmra.mrb[20].mxu1 %v797_v35  ;;  %v695_v46 = vmul.f32 %v3329_v21, %v4198_v28  ;;  %v3331_v30 = vpop.eup %3330  ;;  %v772_v7 = vadd.f32 %v4270_v0, %v733_v24  ;;  %v3279_v4 = vld [vmem:[#allocation7 + $0x10] sm:$0xff]   ;;  %v3282_v21 = vld [vmem:[#allocation7 + $0x58] sm:$0xff]  }
 0x1d5   : > { %1114 = vmatprep.mubr.bf16.mxu0 %v3789_v27  ;;  %1307 = vmatprep.mubr.bf16.mxu1 %v3789_v27  ;;  %v696_v51 = vmul.f32 %v3331_v30, %v4202_v12  ;;  %3338 = vrsqrt.f32 %v637_v31  ;;  %v3273_v12 = vld [vmem:[#allocation7 + $0x80] sm:$0xff]   ;;  %v3281_v35 = vld [vmem:[#allocation7 + $0x90] sm:$0xff]   ;;  %v3285_v24 = vld [vmem:[#allocation7 + $0x98] sm:$0xff]  }
 0x1d6   : > { %v734_v11 = vmul.f32 %v4258_v55, %v695_v46  ;;  %3340 = vrsqrt.f32 %v636_v32  ;;  %3035 = vmatpush3.bf16.msra.mxu1 %v3273_v12  ;;  %2925 = vmatpush3.bf16.msra.mxu0 %v3275_v62  ;;  %v3284_v46 = vld [vmem:[#allocation7 + $0x18] sm:$0xff]   ;;  %v3286_v30 = vld [vmem:[#allocation7 + $0x60] sm:$0xff]   ;;  %v3290_v32 = vld [vmem:[#allocation7 + $0x68] sm:$0xff]  }
 0x1d7   : > { %v3333_v48 = vpop.eup %3332  ;;  %v735_v14 = vmul.f32 %v4258_v55, %v696_v51  ;;  %3036 = vmatprep.subr.bf16.mxu1 %v3276_v5  ;;  %2926 = vmatprep.subr.bf16.mxu0 %v3278_v2  ;;  %v3287_v31 = vld [vmem:[#allocation7 + $0xe0] sm:$0xff]   ;;  %v3293_v51 = vld [vmem:[#allocation7 + $0xa8] sm:$0xff]  }
 0x1d8   : > { %v773_v34 = vadd.f32 %v4270_v0, %v734_v11  ;;  %v697_v28 = vmul.f32 %v3333_v48, %v4210_v40  ;;  %v3288_v11 = vld [vmem:[#allocation7 + $0x20] sm:$0xff]  }
 0x1d9   : > { %v774_v50 = vadd.f32 %v4270_v0, %v735_v14  ;;  %v3289_v48 = vld [vmem:[#allocation7 + $0xa0] sm:$0xff]   ;;  %v3298_v14 = vld [vmem:[#allocation7 + $0x78] sm:$0xff]  }
 0x1da   : > { %v798_v38 = vpack.c.bf16 %v773_v34, %v772_v7  ;;  %v736_v37 = vmul.f32 %v4258_v55, %v697_v28  ;;  %3037 = vmatpush3.bf16.msra.mxu1 %v3277_v19  ;;  %2927 = vmatpush3.bf16.msra.mxu0 %v3279_v4  ;;  %v3291_v7 = vld [vmem:[#allocation7 + $0xe8] sm:$0xff]   ;;  %v3294_v28 = vld [vmem:[#allocation7 + $0x70] sm:$0xff]  }
 0x1db   : > { %v3335_v13 = vpop.eup %3334  ;;  %3038 = vmatprep.subr.bf16.mxu1 %v3280_v10  ;;  %2928 = vmatprep.subr.bf16.mxu0 %v3282_v21  ;;  %v3292_v34 = vld [vmem:[#allocation7 + $0x28] sm:$0xff]  }
 0x1dc   : > { %1115 = vmatmul.mubr.bf16.gmra.mrb[24].mxu0 %v798_v38  ;;  %1308 = vmatmul.mubr.bf16.gmra.mrb[24].mxu1 %v798_v38  ;;  %v3337_v36 = vpop.eup %3336  ;;  %v775_v40 = vadd.f32 %v4270_v0, %v736_v37  ;;  %v699_v44 = vmul.f32 %v3335_v13, %v4223_v15  ;;  %v3295_v38 = vld [vmem:[#allocation7 + $0xf0] sm:$0xff]  }
 0x1dd   : > { %1124 = vmatprep.mubr.bf16.mxu0 %v3789_v27  ;;  %1317 = vmatprep.mubr.bf16.mxu1 %v3789_v27  ;;  %v698_v16 = vmul.f32 %v3337_v36, %v4216_v42  ;;  %v3296_v37 = vld [vmem:[#allocation7 + $0x30] sm:$0xff]  }
 0x1de   : > { %v799_v23 = vpack.c.bf16 %v775_v40, %v774_v50  ;;  %v738_v53 = vmul.f32 %v4258_v55, %v699_v44  ;;  %3039 = vmatpush3.bf16.msra.mxu1 %v3281_v35  ;;  %2929 = vmatpush3.bf16.msra.mxu0 %v3284_v46  ;;  %v3297_v13 = vld [vmem:[#allocation7 + $0xb0] sm:$0xff]  }
 0x1df   : > { %v3339_v57 = vpop.eup %3338  ;;  %v737_v41 = vmul.f32 %v4258_v55, %v698_v16  ;;  %3040 = vmatprep.subr.bf16.mxu1 %v3283_v22  ;;  %2930 = vmatprep.subr.bf16.mxu0 %v3286_v30 }
 0x1e0   : > { %v3341_v60 = vpop.eup %3340  ;;  %v777_v15 = vadd.f32 %v4270_v0, %v738_v53  ;;  %v701_v18 = vmul.f32 %v3339_v57, %v4231_v54 }
 0x1e1   : > { %v776_v58 = vadd.f32 %v4270_v0, %v737_v41  ;;  %v700_v42 = vmul.f32 %v3341_v60, %v4226_v52 }
 0x1e2   : > { %v740_v9 = vmul.f32 %v4258_v55, %v701_v18  ;;  %3041 = vmatpush3.bf16.msra.mxu1 %v3285_v24  ;;  %2931 = vmatpush3.bf16.msra.mxu0 %v3288_v11 }
 0x1e3   : > { %v800_v29 = vpack.c.bf16 %v777_v15, %v776_v58  ;;  %v739_v6 = vmul.f32 %v4258_v55, %v700_v42  ;;  %3042 = vmatprep.subr.bf16.mxu1 %v3287_v31  ;;  %2932 = vmatprep.subr.bf16.mxu0 %v3290_v32 }
 0x1e4   : > { %1125 = vmatmul.mubr.bf16.gmra.mrb[28].mxu0 %v799_v23  ;;  %1318 = vmatmul.mubr.bf16.gmra.mrb[28].mxu1 %v799_v23  ;;  %v779_v54 = vadd.f32 %v4270_v0, %v740_v9 }
 0x1e5   : > { %1134 = vmatprep.mubr.bf16.mxu0 %v3789_v27  ;;  %1327 = vmatprep.mubr.bf16.mxu1 %v3789_v27  ;;  %v778_v52 = vadd.f32 %v4270_v0, %v739_v6 }
 0x1e6   : > { %3043 = vmatpush3.bf16.msra.mxu1 %v3289_v48  ;;  %2933 = vmatpush3.bf16.msra.mxu0 %v3292_v34 }
 0x1e7   : > { %v801_v56 = vpack.c.bf16 %v779_v54, %v778_v52  ;;  %3044 = vmatprep.subr.bf16.mxu1 %v3291_v7  ;;  %2934 = vmatprep.subr.bf16.mxu0 %v3294_v28 }
 0x1ea   : > { %3045 = vmatpush3.bf16.msra.mxu1 %v3293_v51  ;;  %2935 = vmatpush3.bf16.msra.mxu0 %v3296_v37 }
 0x1eb   : > { %3046 = vmatprep.subr.bf16.mxu1 %v3295_v38  ;;  %2936 = vmatprep.subr.bf16.mxu0 %v3298_v14 }
 0x1ec   : > { %1135 = vmatmul.mubr.bf16.gmra.mrb[32].mxu0 %v800_v29  ;;  %1328 = vmatmul.mubr.bf16.gmra.mrb[32].mxu1 %v800_v29 }
 0x1ed   : > { %1144 = vmatprep.mubr.bf16.mxu0 %v3789_v27  ;;  %1337 = vmatprep.mubr.bf16.mxu1 %v3789_v27 }
 0x1ee   : > { %3047 = vmatpush3.bf16.msra.mxu1 %v3297_v13  ;;  %2937 = vmatpush3.bf16.msra.mxu0 %v3300_v47 }
 0x1ef   : > { %3048 = vmatprep.subr.bf16.mxu1 %v3299_v45 }
 0x1f2   : > { %3049 = vmatpush3.bf16.msra.mxu1 %v3301_v8 }
 0x1f4   : > { %1145 = vmatmul.mubr.bf16.gmra.mrb[36].mxu0 %v801_v56  ;;  %1338 = vmatmul.mubr.bf16.gmra.mrb[36].mxu1 %v801_v56 }
 0x1f5   : > { %1154 = vmatprep.mubr.bf16.mxu0 %v3789_v27  ;;  %1347 = vmatprep.mubr.bf16.mxu1 %v3789_v27 }
 0x228   : > { %v563_v36 = vpop.xlane.xlu0 %562 }
 0x229   : > { %v606_v12 = vmul.f32 0.0078125, %v563_v36 }
 0x22b   : > { %v638_v40 = vadd.f32 1e-05, %v606_v12 }
 0x22c   : > { %v565_v44 = vpop.xlane.xlu1 %564 }
 0x22d   : > { %3342 = vrsqrt.f32 %v638_v40  ;;  %v607_v50 = vmul.f32 0.0078125, %v565_v44 }
 0x22f   : > { %v639_v16 = vadd.f32 1e-05, %v607_v50 }
 0x230   : > { %v567_v23 = vpop.xlane.xlu0 %566 }
 0x231   : > { %3344 = vrsqrt.f32 %v639_v16  ;;  %v608_v53 = vmul.f32 0.0078125, %v567_v23 }
 0x233   : > { %v640_v57 = vadd.f32 1e-05, %v608_v53 }
 0x234   : > { %v569_v41 = vpop.xlane.xlu1 %568 }
 0x235   : > { %3346 = vrsqrt.f32 %v640_v57  ;;  %v609_v60 = vmul.f32 0.0078125, %v569_v41 }
 0x237   : > { %v3343_v15 = vpop.eup %3342  ;;  %v641_v18 = vadd.f32 1e-05, %v609_v60 }
 0x238   : > { %v571_v58 = vpop.xlane.xlu0 %570  ;;  %v702_v42 = vmul.f32 %v3343_v15, %v4240_v3 }
 0x239   : > { %3348 = vrsqrt.f32 %v641_v18  ;;  %v610_v29 = vmul.f32 0.0078125, %v571_v58 }
 0x23a   : > { %v741_v5 = vmul.f32 %v4258_v55, %v702_v42 }
 0x23b   : > { %v3345_v9 = vpop.eup %3344  ;;  %v642_v6 = vadd.f32 1e-05, %v610_v29 }
 0x23c   : > { %v573_v61 = vpop.xlane.xlu1 %572  ;;  %v703_v62 = vmul.f32 %v3345_v9, %v4245_v25  ;;  %v780_v10 = vadd.f32 %v4270_v0, %v741_v5 }
 0x23d   : > { %3350 = vrsqrt.f32 %v642_v6  ;;  %v611_v19 = vmul.f32 0.0078125, %v573_v61 }
 0x23e   : > { %v742_v54 = vmul.f32 %v4258_v55, %v703_v62 }
 0x23f   : > { %v3347_v52 = vpop.eup %3346  ;;  %v643_v56 = vadd.f32 1e-05, %v611_v19 }
 0x240   : > { %v575_v2 = vpop.xlane.xlu0 %574  ;;  %v781_v3 = vadd.f32 %v4270_v0, %v742_v54  ;;  %v704_v4 = vmul.f32 %v3347_v52, %v4250_v43 }
 0x241   : > { %3352 = vrsqrt.f32 %v643_v56  ;;  %v612_v35 = vmul.f32 0.0078125, %v575_v2 }
 0x242   : > { %v802_v21 = vpack.c.bf16 %v781_v3, %v780_v10  ;;  %v743_v30 = vmul.f32 %v4258_v55, %v704_v4 }
 0x243   : > { %v3349_v22 = vpop.eup %3348  ;;  %v644_v25 = vadd.f32 1e-05, %v612_v35 }
 0x244   : > { %v577_v46 = vpop.xlane.xlu1 %576  ;;  %1155 = vmatmul.mubr.bf16.gmra.mrb[40].mxu0 %v802_v21  ;;  %1348 = vmatmul.mubr.bf16.gmra.mrb[40].mxu1 %v802_v21  ;;  %v705_v24 = vmul.f32 %v3349_v22, %v4261_v49  ;;  %v782_v7 = vadd.f32 %v4270_v0, %v743_v30 }
 0x245   : > { %3354 = vrsqrt.f32 %v644_v25  ;;  %v613_v31 = vmul.f32 0.0078125, %v577_v46  ;;  %1164 = vmatprep.mubr.bf16.mxu0 %v3789_v27  ;;  %1357 = vmatprep.mubr.bf16.mxu1 %v3789_v27 }
 0x246   : > { %v744_v43 = vmul.f32 %v4258_v55, %v705_v24 }
 0x247   : > { %v3351_v11 = vpop.eup %3350  ;;  %v645_v48 = vadd.f32 1e-05, %v613_v31 }
 0x248   : > { %v579_v32 = vpop.xlane.xlu0 %578  ;;  %v783_v34 = vadd.f32 %v4270_v0, %v744_v43  ;;  %v706_v51 = vmul.f32 %v3351_v11, %v4274_v20 }
 0x249   : > { %3356 = vrsqrt.f32 %v645_v48  ;;  %v614_v49 = vmul.f32 0.0078125, %v579_v32 }
 0x24a   : > { %v803_v28 = vpack.c.bf16 %v783_v34, %v782_v7  ;;  %v745_v45 = vmul.f32 %v4258_v55, %v706_v51 }
 0x24b   : > { %v3353_v38 = vpop.eup %3352  ;;  %v646_v37 = vadd.f32 1e-05, %v614_v49 }
 0x24c   : > { %v581_v13 = vpop.xlane.xlu1 %580  ;;  %1165 = vmatmul.mubr.bf16.gmra.mrb[44].mxu0 %v803_v28  ;;  %1358 = vmatmul.mubr.bf16.gmra.mrb[44].mxu1 %v803_v28  ;;  %v707_v14 = vmul.f32 %v3353_v38, %v4282_v1  ;;  %v784_v40 = vadd.f32 %v4270_v0, %v745_v45 }
 0x24d   : > { %3358 = vrsqrt.f32 %v646_v37  ;;  %v615_v47 = vmul.f32 0.0078125, %v581_v13  ;;  %1174 = vmatprep.mubr.bf16.mxu0 %v3789_v27  ;;  %1367 = vmatprep.mubr.bf16.mxu1 %v3789_v27 }
 0x24e   : > { %v746_v20 = vmul.f32 %v4258_v55, %v707_v14 }
 0x24f   : > { %v3355_v8 = vpop.eup %3354  ;;  %v647_v36 = vadd.f32 1e-05, %v615_v47 }
 0x250   : > { %v583_v12 = vpop.xlane.xlu0 %582  ;;  %v785_v44 = vadd.f32 %v4270_v0, %v746_v20  ;;  %v708_v50 = vmul.f32 %v3355_v8, %v4292_v17 }
 0x251   : > { %3360 = vrsqrt.f32 %v647_v36  ;;  %v616_v1 = vmul.f32 0.0078125, %v583_v12 }
 0x252   : > { %v804_v16 = vpack.c.bf16 %v785_v44, %v784_v40  ;;  %v747_v60 = vmul.f32 %v4258_v55, %v708_v50 }
 0x253   : > { %v3357_v23 = vpop.eup %3356  ;;  %v648_v53 = vadd.f32 1e-05, %v616_v1 }
 0x254   : > { %v585_v57 = vpop.xlane.xlu1 %584  ;;  %1175 = vmatmul.mubr.bf16.gmra.mrb[48].mxu0 %v804_v16  ;;  %1368 = vmatmul.mubr.bf16.gmra.mrb[48].mxu1 %v804_v16  ;;  %v709_v41 = vmul.f32 %v3357_v23, %v4300_v33  ;;  %v786_v42 = vadd.f32 %v4270_v0, %v747_v60 }
 0x255   : > { %3362 = vrsqrt.f32 %v648_v53  ;;  %v617_v15 = vmul.f32 0.0078125, %v585_v57  ;;  %1184 = vmatprep.mubr.bf16.mxu0 %v3789_v27  ;;  %1377 = vmatprep.mubr.bf16.mxu1 %v3789_v27 }
 0x256   : > { %v748_v17 = vmul.f32 %v4258_v55, %v709_v41 }
 0x257   : > { %v3359_v18 = vpop.eup %3358  ;;  %v649_v58 = vadd.f32 1e-05, %v617_v15 }
 0x258   : > { %v787_v29 = vadd.f32 %v4270_v0, %v748_v17  ;;  %v710_v9 = vmul.f32 %v3359_v18, %v4310_v39 }
 0x259   : > { %3364 = vrsqrt.f32 %v649_v58 }
 0x25a   : > { %v805_v33 = vpack.c.bf16 %v787_v29, %v786_v42  ;;  %v749_v62 = vmul.f32 %v4258_v55, %v710_v9 }
 0x25b   : > { %v3361_v6 = vpop.eup %3360 }
 0x25c   : > { %1185 = vmatmul.mubr.bf16.gmra.mrb[52].mxu0 %v805_v33  ;;  %1378 = vmatmul.mubr.bf16.gmra.mrb[52].mxu1 %v805_v33  ;;  %v711_v61 = vmul.f32 %v3361_v6, %v4318_v59  ;;  %v788_v54 = vadd.f32 %v4270_v0, %v749_v62 }
 0x25d   : > { %1194 = vmatprep.mubr.bf16.mxu0 %v3789_v27  ;;  %1387 = vmatprep.mubr.bf16.mxu1 %v3789_v27 }
 0x25e   : > { %v750_v5 = vmul.f32 %v4258_v55, %v711_v61 }
 0x25f   : > { %v3363_v19 = vpop.eup %3362 }
 0x260   : > { %v789_v39 = vadd.f32 %v4270_v0, %v750_v5  ;;  %v712_v52 = vmul.f32 %v3363_v19, %v4328_v63  ;;  %v842_v63 = vlaneseq }
 0x262   : > { %v806_v56 = vpack.c.bf16 %v789_v39, %v788_v54  ;;  %v751_v10 = vmul.f32 %v4258_v55, %v712_v52  ;;  %v843_v22 = vshrl.u32 %v842_v63, 7 }
 0x263   : > { %v3365_v2 = vpop.eup %3364 }
 0x264   : > { %1195 = vmatmul.mubr.bf16.gmra.mrb[56].mxu0 %v806_v56  ;;  %1388 = vmatmul.mubr.bf16.gmra.mrb[56].mxu1 %v806_v56  ;;  %v713_v59 = vmul.f32 %v3365_v2, %v4336_v26  ;;  %v790_v4 = vadd.f32 %v4270_v0, %v751_v10  ;;  %v844_v25 = vsub.s32 0, %v843_v22  ;;  %v852_v46 = vsub.s32 2, %v843_v22  ;;  %v840_v26 = vld [vmem:[%s5523_s4] sm:$0xf] }
 0x265   : > { %1204 = vmatprep.mubr.bf16.mxu0 %v3789_v27  ;;  %1397 = vmatprep.mubr.bf16.mxu1 %v3789_v27  ;;  %v848_v24 = vsub.s32 1, %v843_v22  ;;  %v856_v30 = vsub.s32 3, %v843_v22 }
 0x266   : > { %v752_v3 = vmul.f32 %v4258_v55, %v713_v59  ;;  %v4438_v27 = vrot.slane %v840_v26, %v844_v25  ;;  %v4440_v55 = vrot.slane %v840_v26, %v852_v46 }
 0x267   : > { %v4442_v31 = vrot.slane %v840_v26, %v848_v24 }
 0x268   : > { %v791_v35 = vadd.f32 %v4270_v0, %v752_v3  ;;  %v4444_v0 = vrot.slane %v840_v26, %v856_v30 }
 0x26a   : > { %v807_v21 = vpack.c.bf16 %v791_v35, %v790_v4 }
 0x26c   : > { %1205 = vmatmul.mubr.bf16.gmra.mrb[60].mxu0 %v807_v21  ;;  %1398 = vmatmul.mubr.bf16.gmra.mrb[60].mxu1 %v807_v21 }
 0x27f   : > { %v1056_v43 = vpop.f32.mrb[0].mxu0  ;;  %v1249_v11 = vpop.f32.mrb[0].mxu1 }
 0x280   : > { %v1057_v48 = vadd.f32 %v1056_v43, %v4438_v27  ;;  %v1250_v32 = vadd.f32 %v1249_v11, %v4440_v55  ;;  %v1058_v7 = vpop.f32.mrb[1].mxu0  ;;  %v1251_v34 = vpop.f32.mrb[1].mxu1 }
 0x281   : > { %v1059_v51 = vadd.f32 %v1058_v7, %v4442_v31  ;;  %v1252_v49 = vadd.f32 %v1251_v34, %v4444_v0  ;;  %v1060_v28 = vpop.f32.mrb[2].mxu0  ;;  %v1253_v38 = vpop.f32.mrb[2].mxu1 }
 0x282   : > { %v1536_v37 = vmul.f32 0.70710677, %v1057_v48  ;;  %v1538_v13 = vmul.f32 0.70710677, %v1250_v32  ;;  %v1061_v47 = vadd.f32 %v1060_v28, %v4438_v27  ;;  %v1254_v20 = vadd.f32 %v1253_v38, %v4440_v55  ;;  %v1062_v8 = vpop.f32.mrb[3].mxu0  ;;  %v1255_v36 = vpop.f32.mrb[3].mxu1 }
 0x283   : > { %v1537_v14 = vmul.f32 0.70710677, %v1059_v51  ;;  %v1539_v45 = vmul.f32 0.70710677, %v1252_v49  ;;  %v1063_v12 = vadd.f32 %v1062_v8, %v4442_v31  ;;  %v1256_v40 = vadd.f32 %v1255_v36, %v4444_v0 }
 0x284   : > { %3366 = verf.f32 %v1536_v37  ;;  %v1540_v44 = vmul.f32 0.70710677, %v1061_v47  ;;  %v1542_v50 = vmul.f32 0.70710677, %v1254_v20  ;;  %v1408_v61 = vmul.f32 0.5, %v1057_v48 }
 0x285   : > { %3368 = verf.f32 %v1538_v13  ;;  %v1541_v1 = vmul.f32 0.70710677, %v1063_v12  ;;  %v1543_v23 = vmul.f32 0.70710677, %v1256_v40  ;;  %v1410_v56 = vmul.f32 0.5, %v1250_v32 }
 0x286   : > { %3370 = verf.f32 %v1537_v14  ;;  %v1409_v2 = vmul.f32 0.5, %v1059_v51  ;;  %v4461_v59 = vmul.f32 0.5, %v1252_v49  ;;  %v1412_v10 = vmul.f32 0.5, %v1061_v47 }
 0x287   : > { %3372 = verf.f32 %v1539_v45  ;;  %v1066_v16 = vpop.f32.mrb[4].mxu0  ;;  %v1259_v57 = vpop.f32.mrb[4].mxu1  ;;  %v1414_v35 = vmul.f32 0.5, %v1254_v20  ;;  %v4463_v46 = vmul.f32 0.5, %v1063_v12  ;;  %v4465_v26 = vmul.f32 0.5, %v1256_v40 }
 0x288   : > { %3374 = verf.f32 %v1540_v44  ;;  %v1067_v53 = vadd.f32 %v1066_v16, %v4438_v27  ;;  %v1068_v41 = vpop.f32.mrb[5].mxu0  ;;  %v1260_v60 = vadd.f32 %v1259_v57, %v4440_v55  ;;  %v1261_v17 = vpop.f32.mrb[5].mxu1 }
 0x289   : > { %3376 = verf.f32 %v1542_v50  ;;  %v1069_v15 = vadd.f32 %v1068_v41, %v4442_v31  ;;  %v1070_v18 = vpop.f32.mrb[6].mxu0  ;;  %v1262_v42 = vadd.f32 %v1261_v17, %v4444_v0  ;;  %v1263_v29 = vpop.f32.mrb[6].mxu1 }
 0x28a   : > { %3378 = verf.f32 %v1541_v1  ;;  %v1544_v58 = vmul.f32 0.70710677, %v1067_v53  ;;  %v1072_v9 = vpop.f32.mrb[7].mxu0  ;;  %v1546_v33 = vmul.f32 0.70710677, %v1260_v60  ;;  %v1265_v6 = vpop.f32.mrb[7].mxu1  ;;  %v1071_v19 = vadd.f32 %v1070_v18, %v4438_v27 }
 0x28b   : > { %3380 = verf.f32 %v1543_v23  ;;  %v1545_v62 = vmul.f32 0.70710677, %v1069_v15  ;;  %v1547_v5 = vmul.f32 0.70710677, %v1262_v42  ;;  %v1264_v54 = vadd.f32 %v1263_v29, %v4440_v55 }
 0x28c   : > { %3382 = verf.f32 %v1544_v58  ;;  %v1073_v39 = vadd.f32 %v1072_v9, %v4442_v31  ;;  %v1548_v21 = vmul.f32 0.70710677, %v1071_v19  ;;  %v1266_v30 = vadd.f32 %v1265_v6, %v4444_v0 }
 0x28d   : > { %3384 = verf.f32 %v1546_v33  ;;  %v1550_v24 = vmul.f32 0.70710677, %v1264_v54  ;;  %v4468_v32 = vmul.f32 0.5, %v1067_v53  ;;  %v4470_v28 = vmul.f32 0.5, %v1260_v60 }
 0x28e   : > { %v3367_v52 = vpop.eup %3366  ;;  %3386 = verf.f32 %v1545_v62  ;;  %v1549_v7 = vmul.f32 0.70710677, %v1073_v39  ;;  %v4472_v38 = vmul.f32 0.5, %v1069_v15  ;;  %v4474_v37 = vmul.f32 0.5, %v1262_v42 }
 0x28f   : > { %v3369_v3 = vpop.eup %3368  ;;  %v1792_v4 = vadd.f32 1.0, %v3367_v52  ;;  %v1076_v63 = vpop.f32.mrb[8].mxu0  ;;  %3388 = verf.f32 %v1547_v5  ;;  %v4480_v36 = vmul.f32 0.5, %v1071_v19  ;;  %v1551_v50 = vmul.f32 0.70710677, %v1266_v30 }
 0x290   : > { %v1269_v22 = vpop.f32.mrb[8].mxu1  ;;  %v3371_v25 = vpop.eup %3370  ;;  %v1794_v48 = vadd.f32 1.0, %v3369_v3  ;;  %3390 = verf.f32 %v1548_v21  ;;  %v1077_v1 = vadd.f32 %v1076_v63, %v4438_v27  ;;  %v4495_v29 = vmul.f32 0.5, %v1264_v54 }
 0x291   : > { %v1078_v43 = vpop.f32.mrb[9].mxu0  ;;  %v3373_v11 = vpop.eup %3372  ;;  %v4478_v47 = vmul.f32 %v1792_v4, %v1408_v61  ;;  %v1793_v20 = vadd.f32 1.0, %v3371_v25  ;;  %3392 = verf.f32 %v1550_v24  ;;  %v1270_v57 = vadd.f32 %v1269_v22, %v4440_v55 }
 0x292   : > { %v1271_v34 = vpop.f32.mrb[9].mxu1  ;;  %v1080_v51 = vpop.f32.mrb[10].mxu0  ;;  %v4485_v23 = vmul.f32 %v1794_v48, %v1410_v56  ;;  %3394 = verf.f32 %v1549_v7  ;;  %v1795_v60 = vadd.f32 1.0, %v3373_v11  ;;  %v1552_v17 = vmul.f32 0.70710677, %v1077_v1 }
 0x293   : > { %v3375_v49 = vpop.eup %3374  ;;  %v1273_v13 = vpop.f32.mrb[10].mxu1  ;;  %v1079_v18 = vadd.f32 %v1078_v43, %v4442_v31  ;;  %v4497_v9 = vmul.f32 0.5, %v1073_v39  ;;  %v4499_v33 = vmul.f32 0.5, %v1266_v30  ;;  %v4503_v62 = vmul.f32 %v1793_v20, %v1409_v2 }
 0x294   : > { %v4476_v14 = vpop.f32.mrb[11].mxu0  ;;  %v3377_v45 = vpop.eup %3376  ;;  %v1796_v8 = vadd.f32 1.0, %v3375_v49  ;;  %3396 = verf.f32 %v1551_v50  ;;  %v1554_v3 = vmul.f32 0.70710677, %v1270_v57  ;;  %v4516_v2 = vmul.f32 %v1795_v60, %v4461_v59 }
 0x295   : > { %v4482_v12 = vpop.f32.mrb[11].mxu1  ;;  %v3379_v40 = vpop.eup %3378  ;;  %v1798_v44 = vadd.f32 1.0, %v3377_v45  ;;  %3398 = verf.f32 %v1552_v17  ;;  %v1553_v63 = vmul.f32 0.70710677, %v1079_v18  ;;  %v1272_v22 = vadd.f32 %v1271_v34, %v4444_v0 }
 0x296   : > { %v3381_v16 = vpop.eup %3380  ;;  %v4487_v53 = vmul.f32 %v1796_v8, %v1412_v10  ;;  %v1797_v19 = vadd.f32 1.0, %v3379_v40  ;;  %v4523_v43 = vmul.f32 0.5, %v1077_v1  ;;  %3400 = verf.f32 %v1554_v3 }
 0x297   : > { %v3383_v41 = vpop.eup %3382  ;;  %v4490_v15 = vmul.f32 %v1798_v44, %v1414_v35  ;;  %v1086_v6 = vpop.f32.mrb[12].mxu0  ;;  %v1799_v10 = vadd.f32 1.0, %v3381_v16  ;;  %v1081_v11 = vadd.f32 %v1080_v51, %v4438_v27  ;;  %v1274_v48 = vadd.f32 %v1273_v13, %v4440_v55 }
 0x298   : > { %v3385_v58 = vpop.eup %3384  ;;  %v2048_v42 = vpack.c.bf16 %v4487_v53, %v4478_v47  ;;  %v4501_v61 = vpop.f32.mrb[12].mxu1  ;;  %v1800_v39 = vadd.f32 1.0, %v3383_v41  ;;  %v1925_v59 = vmul.f32 %v1797_v19, %v4463_v46  ;;  %v4528_v45 = vmul.f32 0.5, %v1270_v57 }
 0x299   : > { %v2050_v5 = vpack.c.bf16 %v4490_v15, %v4485_v23  ;;  %v4507_v52 = vpop.f32.mrb[13].mxu0  ;;  %v4509_v56 = vpop.f32.mrb[13].mxu1  ;;  %v1802_v21 = vadd.f32 1.0, %v3385_v58  ;;  %3402 = verf.f32 %v1553_v63  ;;  %v1927_v34 = vmul.f32 %v1799_v10, %v4465_v26 }
 0x29a   : > { %v3387_v54 = vpop.eup %3386  ;;  %v4511_v4 = vpop.f32.mrb[14].mxu0  ;;  %v4532_v20 = vmul.f32 %v1800_v39, %v4468_v32  ;;  %v1555_v8 = vmul.f32 0.70710677, %v1272_v22  ;;  %v1556_v40 = vmul.f32 0.70710677, %v1081_v11  ;;  %v4537_v13 = vmul.f32 0.5, %v1079_v18 }
 0x29b   : > { %v4513_v35 = vpop.f32.mrb[14].mxu1  ;;  %v4519_v25 = vpop.f32.mrb[15].mxu0  ;;  %v1801_v49 = vadd.f32 1.0, %v3387_v54  ;;  %v4535_v50 = vmul.f32 %v1802_v21, %v4470_v28  ;;  %v1558_v1 = vmul.f32 0.70710677, %v1274_v48  ;;  %v1083_v57 = vadd.f32 %v4476_v14, %v4442_v31 }
 0x29c   : > { %v4521_v24 = vpop.f32.mrb[15].mxu1  ;;  %v3389_v30 = vpop.eup %3388  ;;  %3404 = verf.f32 %v1555_v8  ;;  %v1276_v26 = vadd.f32 %v4482_v12, %v4444_v0  ;;  %v4550_v60 = vmul.f32 0.5, %v1272_v22  ;;  %v1087_v17 = vadd.f32 %v1086_v6, %v4438_v27 }
 0x29d   : > { %v3391_v7 = vpop.eup %3390  ;;  %v1803_v51 = vadd.f32 1.0, %v3389_v30  ;;  %v4548_v28 = vmul.f32 %v1801_v49, %v4472_v38  ;;  %3406 = verf.f32 %v1556_v40  ;;  %v4557_v19 = vmul.f32 0.5, %v1081_v11 }
 0x29e   : > { %v3393_v44 = vpop.eup %3392  ;;  %v1804_v16 = vadd.f32 1.0, %v3391_v7  ;;  %3408 = verf.f32 %v1558_v1  ;;  %v1557_v12 = vmul.f32 0.70710677, %v1083_v57  ;;  %v1559_v21 = vmul.f32 0.70710677, %v1276_v26 }
 0x29f   : > { %v3395_v46 = vpop.eup %3394  ;;  %v4543_v32 = vpop.f32.mrb[16].mxu0  ;;  %v1806_v14 = vadd.f32 1.0, %v3393_v44  ;;  %v4564_v39 = vmul.f32 %v1803_v51, %v4474_v37  ;;  %v1560_v6 = vmul.f32 0.70710677, %v1087_v17  ;;  %v1280_v11 = vadd.f32 %v4501_v61, %v4440_v55 }
 0x2a0   : > { %v4545_v41 = vpop.f32.mrb[16].mxu1  ;;  %v4553_v18 = vpop.f32.mrb[17].mxu0  ;;  %v1805_v3 = vadd.f32 1.0, %v3395_v46  ;;  %v4569_v30 = vmul.f32 %v1804_v16, %v4480_v36  ;;  %3410 = verf.f32 %v1557_v12  ;;  %v1089_v7 = vadd.f32 %v4507_v52, %v4442_v31 }
 0x2a1   : > { %v4555_v58 = vpop.f32.mrb[17].mxu1  ;;  %v4559_v54 = vpop.f32.mrb[18].mxu0  ;;  %3412 = verf.f32 %v1559_v21  ;;  %v1282_v37 = vadd.f32 %v4509_v56, %v4444_v0  ;;  %v2049_v8 = vpack.c.bf16 %v1925_v59, %v4503_v62  ;;  %v2051_v40 = vpack.c.bf16 %v1927_v34, %v4516_v2 }
 0x2a2   : > { %v4561_v10 = vpop.f32.mrb[18].mxu1  ;;  %v3397_v38 = vpop.eup %3396  ;;  %v4582_v36 = vmul.f32 %v1806_v14, %v4495_v29  ;;  %v4584_v1 = vmul.f32 0.5, %v1274_v48  ;;  %v1562_v61 = vmul.f32 0.70710677, %v1280_v11  ;;  %v4587_v52 = vmul.f32 %v1805_v3, %v4497_v9 }
 0x2a3   : > { %v4566_v63 = vpop.f32.mrb[19].mxu0  ;;  %v3399_v22 = vpop.eup %3398  ;;  %v1807_v51 = vadd.f32 1.0, %v3397_v38  ;;  %3414 = verf.f32 %v1560_v6  ;;  %v1561_v12 = vmul.f32 0.70710677, %v1089_v7  ;;  %2407 = vmatprep.mubr.bf16.mxu0 %v2049_v8  ;;  %2568 = vmatprep.mubr.bf16.mxu1 %v2051_v40  ;;  %v4589_v62 = vmul.f32 0.5, %v1083_v57 }
 0x2a4   : > { %v4575_v49 = vpop.f32.mrb[19].mxu1  ;;  %v3401_v44 = vpop.eup %3400  ;;  %v1808_v16 = vadd.f32 1.0, %v3399_v22  ;;  %v4591_v56 = vmul.f32 0.5, %v1276_v26  ;;  %v1563_v2 = vmul.f32 0.70710677, %v1282_v37  ;;  %v1091_v29 = vadd.f32 %v4511_v4, %v4438_v27  ;;  %2408 = vmatmul.mubr.bf16.vlgmr.msra.gmra.mrb[64].mxu0 %v2048_v42  ;;  %2569 = vmatmul.mubr.bf16.vlgmr.msra.gmra.mrb[64].mxu1 %v2050_v5 }
 0x2a5   : > { %v3403_v46 = vpop.eup %3402  ;;  %v1810_v59 = vadd.f32 1.0, %v3401_v44  ;;  %3416 = verf.f32 %v1562_v61  ;;  %v1284_v34 = vadd.f32 %v4513_v35, %v4440_v55  ;;  %v1093_v4 = vadd.f32 %v4519_v25, %v4442_v31 }
 0x2a6   : > { %v3405_v53 = vpop.eup %3404  ;;  %v4614_v23 = vmul.f32 %v1807_v51, %v4499_v33  ;;  %v1809_v15 = vadd.f32 1.0, %v3403_v46  ;;  %3418 = verf.f32 %v1561_v12  ;;  %v1564_v42 = vmul.f32 0.70710677, %v1091_v29 }
 0x2a7   : > { %v4601_v9 = vpop.f32.mrb[20].mxu0  ;;  %v4603_v48 = vpop.f32.mrb[20].mxu1  ;;  %v4621_v35 = vmul.f32 %v1808_v16, %v4523_v43  ;;  %v4623_v25 = vmul.f32 0.5, %v1087_v17  ;;  %3420 = verf.f32 %v1563_v2  ;;  %v1566_v38 = vmul.f32 0.70710677, %v1284_v34 }
 0x2a8   : > { %v4609_v57 = vpop.f32.mrb[21].mxu0  ;;  %v4611_v47 = vpop.f32.mrb[21].mxu1  ;;  %v4627_v33 = vmul.f32 0.5, %v1280_v11  ;;  %v4629_v6 = vmul.f32 0.5, %v1089_v7  ;;  %v1565_v22 = vmul.f32 0.70710677, %v1093_v4  ;;  %v1286_v8 = vadd.f32 %v4521_v24, %v4444_v0 }
 0x2a9   : > { %v4616_v5 = vpop.f32.mrb[22].mxu0  ;;  %v4618_v26 = vpop.f32.mrb[22].mxu1  ;;  %v4636_v43 = vmul.f32 %v1810_v59, %v4528_v45  ;;  %v4638_v17 = vmul.f32 0.5, %v1282_v37  ;;  %3422 = verf.f32 %v1564_v42  ;;  %v1097_v44 = vadd.f32 %v4543_v32, %v4438_v27 }
 0x2aa   : > { %v3407_v14 = vpop.eup %3406  ;;  %v4625_v3 = vpop.f32.mrb[23].mxu0  ;;  %v4643_v11 = vmul.f32 %v1809_v15, %v4537_v13  ;;  %v1811_v7 = vadd.f32 1.0, %v3405_v53  ;;  %3424 = verf.f32 %v1566_v38  ;;  %v1567_v61 = vmul.f32 0.70710677, %v1286_v8 }
 0x2ab   : > { %v3409_v21 = vpop.eup %3408  ;;  %v4633_v40 = vpop.f32.mrb[23].mxu1  ;;  %v1812_v24 = vadd.f32 1.0, %v3407_v14  ;;  %3426 = verf.f32 %v1565_v22  ;;  %v1568_v12 = vmul.f32 0.70710677, %v1097_v44  ;;  %v1290_v37 = vadd.f32 %v4545_v41, %v4440_v55 }
 0x2ac   : > { %v3411_v51 = vpop.eup %3410  ;;  %v1814_v16 = vadd.f32 1.0, %v3409_v21  ;;  %3428 = verf.f32 %v1567_v61  ;;  %v1099_v32 = vadd.f32 %v4553_v18, %v4442_v31  ;;  %v4653_v15 = vmul.f32 0.5, %v1091_v29 }
 0x2ad   : > { %v3413_v46 = vpop.eup %3412  ;;  %v1813_v45 = vadd.f32 1.0, %v3411_v51  ;;  %3430 = verf.f32 %v1568_v12  ;;  %v1292_v42 = vadd.f32 %v4555_v58, %v4444_v0  ;;  %v4662_v41 = vmul.f32 %v1811_v7, %v4550_v60 }
 0x2ae   : > { %v3415_v59 = vpop.eup %3414  ;;  %v1815_v53 = vadd.f32 1.0, %v3413_v46  ;;  %v4664_v18 = vmul.f32 0.5, %v1284_v34  ;;  %v4666_v21 = vmul.f32 0.5, %v1093_v4  ;;  %v1570_v22 = vmul.f32 0.70710677, %v1290_v37 }
 0x2af   : > { %v4649_v2 = vpop.f32.mrb[24].mxu0  ;;  %v4651_v13 = vpop.f32.mrb[24].mxu1  ;;  %v4673_v46 = vmul.f32 %v1812_v24, %v4557_v19  ;;  %v4676_v58 = vmul.f32 %v1814_v16, %v4584_v1  ;;  %v4678_v12 = vmul.f32 0.5, %v1286_v8  ;;  %v4680_v60 = vmul.f32 0.5, %v1097_v44 }
 0x2b0   : > { %v4657_v14 = vpop.f32.mrb[25].mxu0  ;;  %v4659_v38 = vpop.f32.mrb[25].mxu1  ;;  %v2053_v19 = vpack.c.bf16 %v4587_v52, %v4548_v28  ;;  %v4692_v1 = vmul.f32 %v1815_v53, %v4591_v56  ;;  %3432 = verf.f32 %v1570_v22  ;;  %v1571_v8 = vmul.f32 0.70710677, %v1292_v42 }
 0x2b1   : > { %5540 = vst [vmem:[#allocation12_spill] sm:$0xff] %v4659_v38  ;;  %v4668_v51 = vpop.f32.mrb[26].mxu0  ;;  %v4670_v29 = vpop.f32.mrb[26].mxu1  ;;  %v1569_v38 = vmul.f32 0.70710677, %v1099_v32  ;;  %v2055_v44 = vpack.c.bf16 %v4614_v23, %v4564_v39  ;;  %v2052_v56 = vpack.c.bf16 %v4569_v30, %v4532_v20  ;;  %v2054_v39 = vpack.c.bf16 %v4582_v36, %v4535_v50 }
 0x2b2   : > { %5541 = vst [vmem:[#allocation13_spill] sm:$0xff] %v4668_v51  ;;  %5542 = vst [vmem:[#allocation14_spill] sm:$0xff] %v4670_v29  ;;  %v3417_v61 = vpop.eup %3416  ;;  %v4682_v34 = vpop.f32.mrb[27].mxu0  ;;  %v4687_v51 = vmul.f32 %v1813_v45, %v4589_v62  ;;  %v1816_v29 = vadd.f32 1.0, %v3415_v59  ;;  %2415 = vmatprep.mubr.bf16.mxu0 %v2053_v19  ;;  %v1101_v62 = vadd.f32 %v4559_v54, %v4438_v27  ;;  %v4702_v59 = vmul.f32 0.5, %v1099_v32 }
 0x2b3   : > { %v4684_v4 = vpop.f32.mrb[27].mxu1  ;;  %v3419_v7 = vpop.eup %3418  ;;  %v1818_v16 = vadd.f32 1.0, %v3417_v61  ;;  %v1294_v45 = vadd.f32 %v4561_v10, %v4440_v55  ;;  %2576 = vmatprep.mubr.bf16.mxu1 %v2055_v44  ;;  %3434 = verf.f32 %v1569_v38  ;;  %v4713_v61 = vmul.f32 0.5, %v1292_v42  ;;  %2416 = vmatmul.mubr.bf16.gmra.mrb[68].mxu0 %v2052_v56 }
 0x2b4   : > { %5543 = vst [vmem:[#allocation15_spill] sm:$0xff] %v4684_v4  ;;  %v3421_v24 = vpop.eup %3420  ;;  %v4696_v4 = vmul.f32 0.5, %v1290_v37  ;;  %v1817_v52 = vadd.f32 1.0, %v3419_v7  ;;  %v4709_v37 = vmul.f32 %v1816_v29, %v4623_v25  ;;  %v1572_v54 = vmul.f32 0.70710677, %v1101_v62  ;;  %2577 = vmatmul.mubr.bf16.gmra.mrb[68].mxu1 %v2054_v39 }
 0x2b5   : > { %v3423_v28 = vpop.eup %3422  ;;  %v1819_v53 = vadd.f32 1.0, %v3421_v24  ;;  %3436 = verf.f32 %v1571_v8  ;;  %v1574_v32 = vmul.f32 0.70710677, %v1294_v45  ;;  %v1103_v20 = vadd.f32 %v4566_v63, %v4442_v31 }
 0x2b6   : > { %v3425_v23 = vpop.eup %3424  ;;  %v4722_v25 = vmul.f32 %v1818_v16, %v4627_v33  ;;  %3438 = verf.f32 %v1572_v54  ;;  %v1296_v42 = vadd.f32 %v4575_v49, %v4444_v0  ;;  %v1107_v38 = vadd.f32 %v4601_v9, %v4438_v27 }
 0x2b7   : > { %v4711_v22 = vpop.f32.mrb[28].mxu0  ;;  %v3427_v10 = vpop.eup %3426  ;;  %v4733_v19 = vmul.f32 %v1817_v52, %v4629_v6  ;;  %v1820_v24 = vadd.f32 1.0, %v3423_v28  ;;  %v1822_v8 = vadd.f32 1.0, %v3425_v23  ;;  %3440 = verf.f32 %v1574_v32 }
 0x2b8   : > { %v4717_v50 = vpop.f32.mrb[28].mxu1  ;;  %v4719_v30 = vpop.f32.mrb[29].mxu0  ;;  %v4740_v49 = vmul.f32 %v1819_v53, %v4638_v17  ;;  %v1821_v16 = vadd.f32 1.0, %v3427_v10  ;;  %v1573_v9 = vmul.f32 0.70710677, %v1103_v20  ;;  %v1300_v6 = vadd.f32 %v4603_v48, %v4440_v55 }
 0x2b9   : > { %v3429_v36 = vpop.eup %3428  ;;  %v4728_v29 = vpop.f32.mrb[29].mxu1  ;;  %v1575_v56 = vmul.f32 0.70710677, %v1296_v42  ;;  %v1576_v52 = vmul.f32 0.70710677, %v1107_v38  ;;  %v1109_v23 = vadd.f32 %v4609_v57, %v4442_v31  ;;  %v1302_v17 = vadd.f32 %v4611_v47, %v4444_v0 }
 0x2ba   : > { %v4730_v7 = vpop.f32.mrb[30].mxu0  ;;  %v3431_v63 = vpop.eup %3430  ;;  %v1823_v39 = vadd.f32 1.0, %v3429_v36  ;;  %3442 = verf.f32 %v1573_v9  ;;  %v4753_v10 = vmul.f32 %v1820_v24, %v4653_v15  ;;  %v4758_v32 = vmul.f32 0.5, %v1294_v45 }
 0x2bb   : > { %5544 = vst [vmem:[#allocation16_spill] sm:$0xff] %v4730_v7  ;;  %v4735_v33 = vpop.f32.mrb[30].mxu1  ;;  %v4737_v44 = vpop.f32.mrb[31].mxu0  ;;  %v1824_v54 = vadd.f32 1.0, %v3431_v63  ;;  %v4742_v7 = vmul.f32 0.5, %v1101_v62  ;;  %v4756_v62 = vmul.f32 %v1822_v8, %v4664_v18  ;;  %v4761_v36 = vmul.f32 %v1821_v16, %v4666_v21 }
 0x2bc   : > { %v4746_v28 = vpop.f32.mrb[31].mxu1  ;;  %v3433_v53 = vpop.eup %3432  ;;  %v1578_v48 = vmul.f32 0.70710677, %v1300_v6  ;;  %v4763_v63 = vmul.f32 0.5, %v1103_v20  ;;  %3444 = verf.f32 %v1575_v56  ;;  %v1577_v57 = vmul.f32 0.70710677, %v1109_v23 }
 0x2bd   : > { %v4770_v15 = vmul.f32 %v1823_v39, %v4678_v12  ;;  %v4773_v18 = vmul.f32 %v1824_v54, %v4680_v60  ;;  %v4775_v45 = vmul.f32 0.5, %v1296_v42  ;;  %v4777_v24 = vmul.f32 0.5, %v1107_v38  ;;  %v3435_v8 = vpop.eup %3434 }
 0x2be   : > { %v1826_v16 = vadd.f32 1.0, %v3433_v53  ;;  %3446 = verf.f32 %v1576_v52  ;;  %v1579_v56 = vmul.f32 0.70710677, %v1302_v17  ;;  %v2059_v42 = vpack.c.bf16 %v4692_v1, %v4662_v41 }
 0x2bf   : > { %v4765_v9 = vpop.f32.mrb[32].mxu0  ;;  %v4767_v47 = vpop.f32.mrb[32].mxu1  ;;  %3448 = verf.f32 %v1578_v48  ;;  %v1111_v38 = vadd.f32 %v4616_v5, %v4438_v27  ;;  %v1304_v54 = vadd.f32 %v4618_v26, %v4440_v55  ;;  %v2058_v48 = vpack.c.bf16 %v4676_v58, %v4636_v43 }
 0x2c0   : > { %5545 = vst [vmem:[#allocation17_spill] sm:$0xff] %v4767_v47  ;;  %v4779_v21 = vpop.f32.mrb[33].mxu0  ;;  %v4781_v20 = vpop.f32.mrb[33].mxu1  ;;  %v2057_v47 = vpack.c.bf16 %v4687_v51, %v4643_v11  ;;  %3450 = verf.f32 %v1577_v57  ;;  %v2056_v51 = vpack.c.bf16 %v4673_v46, %v4621_v35  ;;  %v1113_v41 = vadd.f32 %v4625_v3, %v4442_v31  ;;  %2584 = vmatprep.mubr.bf16.mxu1 %v2059_v42 }
 0x2c1   : > { %v4785_v12 = vpop.f32.mrb[34].mxu0  ;;  %v4787_v39 = vpop.f32.mrb[34].mxu1  ;;  %v1825_v1 = vadd.f32 1.0, %v3435_v8  ;;  %3452 = verf.f32 %v1579_v56  ;;  %v1580_v26 = vmul.f32 0.70710677, %v1111_v38  ;;  %2585 = vmatmul.mubr.bf16.gmra.mrb[72].mxu1 %v2058_v48  ;;  %v4810_v46 = vmul.f32 %v1826_v16, %v4696_v4 }
 0x2c2   : > { %5546 = vst [vmem:[#allocation18_spill] sm:$0xff] %v4787_v39  ;;  %v3437_v60 = vpop.eup %3436  ;;  %v4795_v52 = vpop.f32.mrb[35].mxu0  ;;  %2423 = vmatprep.mubr.bf16.mxu0 %v2057_v47  ;;  %v4805_v39 = vmul.f32 0.5, %v1300_v6  ;;  %v1582_v57 = vmul.f32 0.70710677, %v1304_v54  ;;  %v1306_v3 = vadd.f32 %v4633_v40, %v4444_v0  ;;  %v1117_v43 = vadd.f32 %v4649_v2, %v4438_v27 }
 0x2c3   : > { %5547 = vst [vmem:[#allocation19_spill] sm:$0xff] %v4795_v52  ;;  %v4797_v53 = vpop.f32.mrb[35].mxu1  ;;  %v3439_v11 = vpop.eup %3438  ;;  %v4807_v52 = vmul.f32 0.5, %v1109_v23  ;;  %2424 = vmatmul.mubr.bf16.gmra.mrb[72].mxu0 %v2056_v51  ;;  %v1581_v35 = vmul.f32 0.70710677, %v1113_v41  ;;  %3454 = verf.f32 %v1580_v26  ;;  %v1310_v23 = vadd.f32 %v4651_v13, %v4440_v55 }
 0x2c4   : > { %5548 = vst [vmem:[#allocation20_spill] sm:$0xff] %v4797_v53  ;;  %v3441_v5 = vpop.eup %3440  ;;  %v1827_v53 = vadd.f32 1.0, %v3437_v60  ;;  %v1828_v6 = vadd.f32 1.0, %v3439_v11  ;;  %3456 = verf.f32 %v1582_v57  ;;  %v4823_v4 = vmul.f32 %v1825_v1, %v4702_v59 }
 0x2c5   : > { %v3443_v58 = vpop.eup %3442  ;;  %v1830_v47 = vadd.f32 1.0, %v3441_v5  ;;  %v4825_v16 = vmul.f32 0.5, %v1302_v17  ;;  %v1583_v40 = vmul.f32 0.70710677, %v1306_v3  ;;  %v1119_v2 = vadd.f32 %v4657_v14, %v4442_v31 }
 0x2c6   : > { %v3445_v11 = vpop.eup %3444  ;;  %v4834_v13 = vmul.f32 %v1827_v53, %v4713_v61  ;;  %v4836_v51 = vmul.f32 0.5, %v1111_v38  ;;  %3458 = verf.f32 %v1581_v35  ;;  %v1584_v48 = vmul.f32 0.70710677, %v1117_v43 }
 0x2c7   : > { %v4818_v8 = vpop.f32.mrb[36].mxu0  ;;  %v4820_v56 = vpop.f32.mrb[36].mxu1  ;;  %v1829_v17 = vadd.f32 1.0, %v3443_v58  ;;  %v4840_v5 = vmul.f32 0.5, %v1304_v54  ;;  %3460 = verf.f32 %v1583_v40  ;;  %v1586_v1 = vmul.f32 0.70710677, %v1310_v23 }
 0x2c8   : > { %v4829_v60 = vpop.f32.mrb[37].mxu0  ;;  %v4831_v42 = vpop.f32.mrb[37].mxu1  ;;  %v4850_v61 = vmul.f32 %v1830_v47, %v4758_v32  ;;  %v4852_v38 = vmul.f32 0.5, %v1113_v41  ;;  %3462 = verf.f32 %v1584_v48  ;;  %v1831_v35 = vadd.f32 1.0, %v3445_v11 }
 0x2c9   : > { %5549 = vst [vmem:[#allocation21_spill] sm:$0xff] %v4831_v42  ;;  %v4838_v59 = vpop.f32.mrb[38].mxu0  ;;  %v4842_v14 = vpop.f32.mrb[38].mxu1  ;;  %v4847_v42 = vmul.f32 %v1828_v6, %v4742_v7  ;;  %v4856_v58 = vmul.f32 0.5, %v1306_v3  ;;  %3464 = verf.f32 %v1586_v1  ;;  %v1585_v40 = vmul.f32 0.70710677, %v1119_v2 }
 0x2ca   : > { %5550 = vst [vmem:[#allocation22_spill] sm:$0xff] %v4838_v59  ;;  %5551 = vst [vmem:[#allocation23_spill] sm:$0xff] %v4842_v14  ;;  %v4844_v26 = vpop.f32.mrb[39].mxu0  ;;  %v3447_v57 = vpop.eup %3446  ;;  %v5554_v7 = vld [vmem:[#allocation12_spill] sm:$0xff]  ;;  %v2061_v32 = vpack.c.bf16 %v4761_v36, %v4733_v19  ;;  %v2063_v41 = vpack.c.bf16 %v4770_v15, %v4740_v49  ;;  %v4867_v48 = vmul.f32 %v1829_v17, %v4763_v63  ;;  %v4869_v11 = vmul.f32 0.5, %v1310_v23  ;;  %v5555_v1 = vld [vmem:[#allocation13_spill] sm:$0xff] }
 0x2cb   : > { %5552 = vst [vmem:[#allocation24_spill] sm:$0xff] %v4844_v26  ;;  %v4854_v53 = vpop.f32.mrb[39].mxu1  ;;  %v3449_v54 = vpop.eup %3448  ;;  %v4858_v26 = vmul.f32 0.5, %v1117_v43  ;;  %v1312_v6 = vadd.f32 %v5554_v7, %v4444_v0  ;;  %v1832_v3 = vadd.f32 1.0, %v3447_v57  ;;  %v1121_v43 = vadd.f32 %v5555_v1, %v4438_v27  ;;  %v5556_v7 = vld [vmem:[#allocation14_spill] sm:$0xff] }
 0x2cc   : > { %5553 = vst [vmem:[#allocation25_spill] sm:$0xff] %v4854_v53  ;;  %v3451_v14 = vpop.eup %3450  ;;  %v1834_v53 = vadd.f32 1.0, %v3449_v54  ;;  %2431 = vmatprep.mubr.bf16.mxu0 %v2061_v32  ;;  %2592 = vmatprep.mubr.bf16.mxu1 %v2063_v41  ;;  %v1314_v19 = vadd.f32 %v5556_v7, %v4440_v55  ;;  %v2060_v49 = vpack.c.bf16 %v4753_v10, %v4709_v37  ;;  %3466 = verf.f32 %v1585_v40  ;;  %v5557_v10 = vld [vmem:[#allocation15_spill] sm:$0xff] }
 0x2cd   : > { %v3453_v47 = vpop.eup %3452  ;;  %v1587_v59 = vmul.f32 0.70710677, %v1312_v6  ;;  %v1833_v15 = vadd.f32 1.0, %v3451_v14  ;;  %v1588_v63 = vmul.f32 0.70710677, %v1121_v43  ;;  %v2062_v23 = vpack.c.bf16 %v4756_v62, %v4722_v25 }
 0x2ce   : > { %v3455_v36 = vpop.eup %3454  ;;  %v1959_v57 = vmul.f32 %v1831_v35, %v4775_v45  ;;  %v1835_v54 = vadd.f32 1.0, %v3453_v47  ;;  %v1590_v32 = vmul.f32 0.70710677, %v1314_v19  ;;  %2432 = vmatmul.mubr.bf16.gmra.mrb[76].mxu0 %v2060_v49  ;;  %v1123_v37 = vadd.f32 %v4682_v34, %v4442_v31 }
 0x2cf   : > { %v3457_v17 = vpop.eup %3456  ;;  %3468 = verf.f32 %v1587_v59  ;;  %v1836_v41 = vadd.f32 1.0, %v3455_v36  ;;  %2593 = vmatmul.mubr.bf16.gmra.mrb[76].mxu1 %v2062_v23  ;;  %v1316_v14 = vadd.f32 %v5557_v10, %v4444_v0  ;;  %v4884_v7 = vmul.f32 0.5, %v1119_v2  ;;  %v5558_v10 = vld [vmem:[#allocation16_spill] sm:$0xff] }
 0x2d0   : > { %3470 = verf.f32 %v1588_v63  ;;  %v3459_v40 = vpop.eup %3458  ;;  %v1838_v1 = vadd.f32 1.0, %v3457_v17  ;;  %v1127_v25 = vadd.f32 %v4711_v22, %v4438_v27  ;;  %v4889_v45 = vmul.f32 %v1832_v3, %v4777_v24 }
 0x2d1   : > { %3472 = verf.f32 %v1590_v32  ;;  %v3461_v62 = vpop.eup %3460  ;;  %v4892_v59 = vmul.f32 %v1834_v53, %v4805_v39  ;;  %v4895_v34 = vmul.f32 %v1833_v15, %v4807_v52  ;;  %v1589_v35 = vmul.f32 0.70710677, %v1123_v37 }
 0x2d2   : > { %v3463_v47 = vpop.eup %3462  ;;  %v4898_v49 = vmul.f32 %v1835_v54, %v4825_v16  ;;  %v4900_v2 = vmul.f32 0.5, %v1312_v6  ;;  %v4902_v36 = vmul.f32 0.5, %v1121_v43  ;;  %v1591_v22 = vmul.f32 0.70710677, %v1316_v14 }
 0x2d3   : > { %v3465_v63 = vpop.eup %3464  ;;  %v4905_v24 = vmul.f32 %v1836_v41, %v4836_v51  ;;  %v4907_v3 = vmul.f32 0.5, %v1314_v19  ;;  %v1592_v39 = vmul.f32 0.70710677, %v1127_v25  ;;  %v1320_v52 = vadd.f32 %v4717_v50, %v4440_v55 }
 0x2d4   : > { %v4912_v53 = vmul.f32 %v1838_v1, %v4840_v5  ;;  %v1837_v16 = vadd.f32 1.0, %v3459_v40  ;;  %3474 = verf.f32 %v1589_v35  ;;  %v1129_v6 = vadd.f32 %v4719_v30, %v4442_v31 }
 0x2d5   : > { %v1839_v43 = vadd.f32 1.0, %v3461_v62  ;;  %v4916_v15 = vmul.f32 0.5, %v1123_v37  ;;  %3476 = verf.f32 %v1591_v22  ;;  %v1594_v51 = vmul.f32 0.70710677, %v1320_v52 }
 0x2d6   : > { %v1840_v23 = vadd.f32 1.0, %v3463_v47  ;;  %v1842_v19 = vadd.f32 1.0, %v3465_v63  ;;  %3478 = verf.f32 %v1592_v39  ;;  %v1593_v17 = vmul.f32 0.70710677, %v1129_v6  ;;  %v3467_v54 = vpop.eup %3466 }
 0x2d7   : > { %3480 = verf.f32 %v1594_v51  ;;  %v1322_v50 = vadd.f32 %v4728_v29, %v4444_v0  ;;  %v2065_v5 = vpack.c.bf16 %v4867_v48, %v4823_v4  ;;  %v2067_v32 = vpack.c.bf16 %v1959_v57, %v4834_v13 }
 0x2d8   : > { %v4924_v41 = vmul.f32 %v1837_v16, %v4852_v38  ;;  %v4926_v37 = vmul.f32 0.5, %v1316_v14  ;;  %v1131_v40 = vadd.f32 %v5558_v10, %v4438_v27  ;;  %v1324_v1 = vadd.f32 %v4735_v33, %v4440_v55 }
 0x2d9   : > { %v3469_v30 = vpop.eup %3468  ;;  %v4933_v29 = vmul.f32 %v1839_v43, %v4856_v58  ;;  %v4935_v35 = vmul.f32 0.5, %v1127_v25  ;;  %v1595_v4 = vmul.f32 0.70710677, %v1322_v50  ;;  %2439 = vmatprep.mubr.bf16.mxu0 %v2065_v5  ;;  %2600 = vmatprep.mubr.bf16.mxu1 %v2067_v32  ;;  %v2064_v13 = vpack.c.bf16 %v4847_v42, %v4773_v18  ;;  %v5559_v43 = vld [vmem:[#allocation17_spill] sm:$0xff] }
 0x2da   : > { %v3471_v62 = vpop.eup %3470  ;;  %v4940_v48 = vmul.f32 %v1840_v23, %v4858_v26  ;;  %v4943_v57 = vmul.f32 %v1842_v19, %v4869_v11  ;;  %v4945_v33 = vmul.f32 0.5, %v1320_v52  ;;  %v1596_v14 = vmul.f32 0.70710677, %v1131_v40 }
 0x2db   : > { %v3473_v38 = vpop.eup %3472  ;;  %v1841_v58 = vadd.f32 1.0, %v3467_v54  ;;  %v1843_v47 = vadd.f32 1.0, %v3469_v30  ;;  %3482 = verf.f32 %v1593_v17  ;;  %v1598_v25 = vmul.f32 0.70710677, %v1324_v1  ;;  %2440 = vmatmul.mubr.bf16.gmra.mrb[80].mxu0 %v2064_v13 }
 0x2dc   : > { %v1844_v22 = vadd.f32 1.0, %v3471_v62  ;;  %3484 = verf.f32 %v1595_v4  ;;  %v2066_v18 = vpack.c.bf16 %v4850_v61, %v4810_v46  ;;  %v1133_v42 = vadd.f32 %v4737_v44, %v4442_v31 }
 0x2dd   : > { %v1846_v26 = vadd.f32 1.0, %v3473_v38  ;;  %3486 = verf.f32 %v1596_v14  ;;  %v1326_v11 = vadd.f32 %v4746_v28, %v4444_v0  ;;  %v1137_v63 = vadd.f32 %v4765_v9, %v4438_v27 }
 0x2de   : > { %v3475_v39 = vpop.eup %3474  ;;  %v4955_v52 = vmul.f32 0.5, %v1129_v6  ;;  %3488 = verf.f32 %v1598_v25  ;;  %2601 = vmatmul.mubr.bf16.gmra.mrb[80].mxu1 %v2066_v18  ;;  %v1597_v16 = vmul.f32 0.70710677, %v1133_v42  ;;  %v1330_v46 = vadd.f32 %v5559_v43, %v4440_v55 }
 0x2df   : > { %v3477_v61 = vpop.eup %3476  ;;  %v4960_v44 = vmul.f32 %v1841_v58, %v4884_v7  ;;  %v4962_v51 = vmul.f32 0.5, %v1322_v50  ;;  %v4964_v23 = vmul.f32 0.5, %v1131_v40  ;;  %v1599_v28 = vmul.f32 0.70710677, %v1326_v11 }
 0x2e0   : > { %v3479_v19 = vpop.eup %3478  ;;  %v4967_v9 = vmul.f32 %v1843_v47, %v4900_v2  ;;  %v4969_v6 = vmul.f32 0.5, %v1324_v1  ;;  %3490 = verf.f32 %v1597_v16  ;;  %v1600_v17 = vmul.f32 0.70710677, %v1137_v63 }
 0x2e1   : > { %v3481_v54 = vpop.eup %3480  ;;  %v4972_v5 = vmul.f32 %v1844_v22, %v4902_v36  ;;  %v4975_v7 = vmul.f32 %v1846_v26, %v4907_v3  ;;  %3492 = verf.f32 %v1599_v28  ;;  %v1602_v50 = vmul.f32 0.70710677, %v1330_v46 }
 0x2e2   : > { %v1845_v32 = vadd.f32 1.0, %v3475_v39  ;;  %v4977_v30 = vmul.f32 0.5, %v1133_v42  ;;  %3494 = verf.f32 %v1600_v17  ;;  %v1139_v2 = vadd.f32 %v4779_v21, %v4442_v31 }
 0x2e3   : > { %v1847_v10 = vadd.f32 1.0, %v3477_v61  ;;  %v4981_v40 = vmul.f32 0.5, %v1326_v11  ;;  %v1332_v1 = vadd.f32 %v4781_v20, %v4444_v0  ;;  %v2069_v36 = vpack.c.bf16 %v4924_v41, %v4895_v34  ;;  %v5560_v34 = vld [vmem:[#allocation18_spill] sm:$0xff] }
 0x2e4   : > { %v1848_v3 = vadd.f32 1.0, %v3479_v19  ;;  %v1850_v62 = vadd.f32 1.0, %v3481_v54  ;;  %v1601_v4 = vmul.f32 0.70710677, %v1139_v2  ;;  %v2071_v13 = vpack.c.bf16 %v4933_v29, %v4898_v49 }
 0x2e5   : > { %v3483_v38 = vpop.eup %3482  ;;  %v4989_v14 = vmul.f32 0.5, %v1137_v63  ;;  %3496 = verf.f32 %v1602_v50  ;;  %v1603_v21 = vmul.f32 0.70710677, %v1332_v1  ;;  %2447 = vmatprep.mubr.bf16.mxu0 %v2069_v36  ;;  %v1141_v58 = vadd.f32 %v4785_v12, %v4438_v27 }
 0x2e6   : > { %v3485_v47 = vpop.eup %3484  ;;  %v1973_v20 = vmul.f32 %v1845_v32, %v4916_v15  ;;  %3498 = verf.f32 %v1601_v4  ;;  %2608 = vmatprep.mubr.bf16.mxu1 %v2071_v13  ;;  %v1334_v41 = vadd.f32 %v5560_v34, %v4440_v55  ;;  %v2068_v49 = vpack.c.bf16 %v4905_v24, %v4889_v45  ;;  %v5561_v24 = vld [vmem:[#allocation19_spill] sm:$0xff] }
 0x2e7   : > { %v3487_v29 = vpop.eup %3486  ;;  %v1975_v25 = vmul.f32 %v1847_v10, %v4926_v37  ;;  %v4999_v22 = vmul.f32 0.5, %v1330_v46  ;;  %3500 = verf.f32 %v1603_v21  ;;  %v1604_v18 = vmul.f32 0.70710677, %v1141_v58 }
 0x2e8   : > { %v3489_v42 = vpop.eup %3488  ;;  %v5002_v12 = vmul.f32 %v1848_v3, %v4935_v35  ;;  %v5005_v15 = vmul.f32 %v1850_v62, %v4945_v33  ;;  %v1849_v26 = vadd.f32 1.0, %v3483_v38  ;;  %v1606_v11 = vmul.f32 0.70710677, %v1334_v41  ;;  %2448 = vmatmul.mubr.bf16.gmra.mrb[84].mxu0 %v2068_v49  ;;  %v5562_v35 = vld [vmem:[#allocation20_spill] sm:$0xff] }
 0x2e9   : > { %v1851_v63 = vadd.f32 1.0, %v3485_v47  ;;  %3502 = verf.f32 %v1604_v18  ;;  %v2070_v45 = vpack.c.bf16 %v4912_v53, %v4892_v59  ;;  %v1143_v37 = vadd.f32 %v5561_v24, %v4442_v31 }
 0x2ea   : > { %v3491_v39 = vpop.eup %3490  ;;  %v1852_v16 = vadd.f32 1.0, %v3487_v29  ;;  %3504 = verf.f32 %v1606_v11  ;;  %v1336_v43 = vadd.f32 %v5562_v35, %v4444_v0  ;;  %v5015_v33 = vadd.f32 %v4818_v8, %v4438_v27  ;;  %v5566_v35 = vld [vmem:[#allocation24_spill] sm:$0xff] }
 0x2eb   : > { %v3493_v46 = vpop.eup %3492  ;;  %v1854_v61 = vadd.f32 1.0, %v3489_v42  ;;  %v5017_v28 = vmul.f32 0.5, %v1139_v2  ;;  %2609 = vmatmul.mubr.bf16.gmra.mrb[84].mxu1 %v2070_v45  ;;  %v1605_v19 = vmul.f32 0.70710677, %v1143_v37  ;;  %v5021_v59 = vadd.f32 %v4820_v56, %v4440_v55  ;;  %v5564_v42 = vld [vmem:[#allocation22_spill] sm:$0xff] }
 0x2ec   : > { %v3495_v53 = vpop.eup %3494  ;;  %v5024_v17 = vmul.f32 %v1849_v26, %v4955_v52  ;;  %v5026_v54 = vmul.f32 0.5, %v1332_v1  ;;  %v1476_v50 = vmul.f32 0.5, %v1141_v58  ;;  %v1607_v32 = vmul.f32 0.70710677, %v1336_v43 }
 0x2ed   : > { %v5029_v8 = vmul.f32 %v1851_v63, %v4962_v51  ;;  %v1853_v10 = vadd.f32 1.0, %v3491_v39  ;;  %v1855_v2 = vadd.f32 1.0, %v3493_v46  ;;  %3506 = verf.f32 %v1605_v19  ;;  %v5567_v46 = vld [vmem:[#allocation25_spill] sm:$0xff] }
 0x2ee   : > { %v5032_v36 = vmul.f32 %v1852_v16, %v4964_v23  ;;  %v1478_v3 = vmul.f32 0.5, %v1334_v41  ;;  %3508 = verf.f32 %v1607_v32  ;;  %v1608_v56 = vmul.f32 0.70710677, %v5015_v33  ;;  %v5563_v23 = vld [vmem:[#allocation21_spill] sm:$0xff] }
 0x2ef   : > { %v3497_v62 = vpop.eup %3496  ;;  %v5036_v52 = vmul.f32 %v1854_v61, %v4969_v6  ;;  %v1856_v1 = vadd.f32 1.0, %v3495_v53  ;;  %v1610_v4 = vmul.f32 0.70710677, %v5021_v59  ;;  %v5041_v51 = vadd.f32 %v4829_v60, %v4442_v31 }
 0x2f0   : > { %v3499_v13 = vpop.eup %3498  ;;  %v1477_v38 = vmul.f32 0.5, %v1143_v37  ;;  %v5045_v21 = vadd.f32 %v5563_v23, %v4444_v0  ;;  %v2073_v58 = vpack.c.bf16 %v1973_v20, %v4960_v44  ;;  %v2075_v47 = vpack.c.bf16 %v1975_v25, %v4967_v9 }
 0x2f1   : > { %v3501_v34 = vpop.eup %3500  ;;  %v1981_v6 = vmul.f32 %v1853_v10, %v4977_v30  ;;  %v1983_v41 = vmul.f32 %v1855_v2, %v4981_v40  ;;  %v1479_v49 = vmul.f32 0.5, %v1336_v43  ;;  %v1609_v29 = vmul.f32 0.70710677, %v5041_v51  ;;  %v5565_v30 = vld [vmem:[#allocation23_spill] sm:$0xff] }
 0x2f2   : > { %v1858_v60 = vadd.f32 1.0, %v3497_v62  ;;  %3510 = verf.f32 %v1608_v56  ;;  %v1611_v18 = vmul.f32 0.70710677, %v5045_v21  ;;  %2455 = vmatprep.mubr.bf16.mxu0 %v2073_v58  ;;  %2616 = vmatprep.mubr.bf16.mxu1 %v2075_v47  ;;  %v1151_v26 = vadd.f32 %v5564_v42, %v4438_v27 }
 0x2f3   : > { %v3503_v44 = vpop.eup %3502  ;;  %v5056_v9 = vmul.f32 %v1856_v1, %v4989_v14  ;;  %3512 = verf.f32 %v1610_v4  ;;  %v1344_v40 = vadd.f32 %v5565_v30, %v4440_v55  ;;  %v2072_v20 = vpack.c.bf16 %v4972_v5, %v4940_v48 }
 0x2f4   : > { %v3505_v25 = vpop.eup %3504  ;;  %v1857_v11 = vadd.f32 1.0, %v3499_v13  ;;  %v1859_v63 = vadd.f32 1.0, %v3501_v34  ;;  %v1860_v45 = vadd.f32 1.0, %v3503_v44  ;;  %3514 = verf.f32 %v1609_v29 }
 0x2f5   : > { %v1862_v24 = vadd.f32 1.0, %v3505_v25  ;;  %3516 = verf.f32 %v1611_v18  ;;  %v1612_v37 = vmul.f32 0.70710677, %v1151_v26  ;;  %v1614_v39 = vmul.f32 0.70710677, %v1344_v40  ;;  %2456 = vmatmul.mubr.bf16.gmra.mrb[88].mxu0 %v2072_v20 }
 0x2f6   : > { %v1988_v16 = vmul.f32 %v1860_v45, %v1476_v50  ;;  %v2074_v14 = vpack.c.bf16 %v4975_v7, %v4943_v57  ;;  %v1153_v43 = vadd.f32 %v5566_v35, %v4442_v31  ;;  %v1346_v48 = vadd.f32 %v5567_v46, %v4444_v0 }
 0x2f7   : > { %v3507_v5 = vpop.eup %3506  ;;  %v5068_v61 = vmul.f32 %v1862_v24, %v1478_v3  ;;  %3518 = verf.f32 %v1612_v37  ;;  %v2077_v19 = vpack.c.bf16 %v1981_v6, %v5024_v17  ;;  %v2079_v53 = vpack.c.bf16 %v1983_v41, %v5029_v8 }
 0x2f8   : > { %v3509_v32 = vpop.eup %3508  ;;  %v1986_v50 = vmul.f32 %v1858_v60, %v4999_v22  ;;  %v1861_v10 = vadd.f32 1.0, %v3507_v5  ;;  %3520 = verf.f32 %v1614_v39  ;;  %2617 = vmatmul.mubr.bf16.gmra.mrb[88].mxu1 %v2074_v14  ;;  %v1613_v57 = vmul.f32 0.70710677, %v1153_v43 }
 0x2f9   : > { %v1985_v7 = vmul.f32 %v1857_v11, %v5017_v28  ;;  %v1863_v2 = vadd.f32 1.0, %v3509_v32  ;;  %v1615_v56 = vmul.f32 0.70710677, %v1346_v48  ;;  %2463 = vmatprep.mubr.bf16.mxu0 %v2077_v19  ;;  %2624 = vmatprep.mubr.bf16.mxu1 %v2079_v53  ;;  %v2076_v3 = vpack.c.bf16 %v5032_v36, %v5002_v12 }
 0x2fa   : > { %v1987_v17 = vmul.f32 %v1859_v63, %v5026_v54  ;;  %v1989_v62 = vmul.f32 %v1861_v10, %v1477_v38  ;;  %3522 = verf.f32 %v1613_v57  ;;  %v2078_v22 = vpack.c.bf16 %v5036_v52, %v5005_v15 }
 0x2fb   : > { %v1991_v8 = vmul.f32 %v1863_v2, %v1479_v49  ;;  %3524 = verf.f32 %v1615_v56  ;;  %v2080_v1 = vpack.c.bf16 %v1988_v16, %v5056_v9  ;;  %v2082_v28 = vpack.c.bf16 %v5068_v61, %v1986_v50 }
 0x2fc   : > { %v3511_v4 = vpop.eup %3510  ;;  %v2081_v13 = vpack.c.bf16 %v1989_v62, %v1985_v7  ;;  %v1480_v52 = vmul.f32 0.5, %v5015_v33  ;;  %v1484_v34 = vmul.f32 0.5, %v1151_v26  ;;  %v1482_v41 = vmul.f32 0.5, %v5021_v59 }
 0x2fd   : > { %v3513_v23 = vpop.eup %3512  ;;  %2464 = vmatmul.mubr.bf16.gmra.mrb[92].mxu0 %v2076_v3  ;;  %v2083_v58 = vpack.c.bf16 %v1991_v8, %v1987_v17  ;;  %v1864_v54 = vadd.f32 1.0, %v3511_v4  ;;  %v1486_v29 = vmul.f32 0.5, %v1344_v40  ;;  %v1481_v44 = vmul.f32 0.5, %v5041_v51 }
 0x2fe   : > { %v3515_v47 = vpop.eup %3514  ;;  %2471 = vmatprep.mubr.bf16.mxu0 %v2081_v13  ;;  %v1866_v38 = vadd.f32 1.0, %v3513_v23  ;;  %v1485_v63 = vmul.f32 0.5, %v1153_v43  ;;  %v1483_v33 = vmul.f32 0.5, %v5045_v21  ;;  %v1487_v26 = vmul.f32 0.5, %v1346_v48 }
 0x2ff   : > { %v3517_v12 = vpop.eup %3516  ;;  %v1865_v49 = vadd.f32 1.0, %v3515_v47  ;;  %v1992_v42 = vmul.f32 %v1864_v54, %v1480_v52 }
 0x300   : > { %2625 = vmatmul.mubr.bf16.gmra.mrb[92].mxu1 %v2078_v22  ;;  %v1867_v9 = vadd.f32 1.0, %v3517_v12  ;;  %v1994_v25 = vmul.f32 %v1866_v38, %v1482_v41 }
 0x301   : > { %v3519_v36 = vpop.eup %3518  ;;  %2632 = vmatprep.mubr.bf16.mxu1 %v2083_v58  ;;  %v1993_v37 = vmul.f32 %v1865_v49, %v1481_v44 }
 0x302   : > { %v3521_v15 = vpop.eup %3520  ;;  %v1868_v6 = vadd.f32 1.0, %v3519_v36  ;;  %v1995_v16 = vmul.f32 %v1867_v9, %v1483_v33 }
 0x303   : > { %v1870_v60 = vadd.f32 1.0, %v3521_v15 }
 0x304   : > { %v3523_v18 = vpop.eup %3522  ;;  %v1996_v30 = vmul.f32 %v1868_v6, %v1484_v34 }
 0x305   : > { %v3525_v20 = vpop.eup %3524  ;;  %v1998_v11 = vmul.f32 %v1870_v60, %v1486_v29  ;;  %v1869_v45 = vadd.f32 1.0, %v3523_v18  ;;  %2472 = vmatmul.mubr.bf16.gmra.mrb[96].mxu0 %v2080_v1 }
 0x306   : > { %v1871_v24 = vadd.f32 1.0, %v3525_v20  ;;  %v2084_v59 = vpack.c.bf16 %v1996_v30, %v1992_v42 }
 0x307   : > { %v1997_v40 = vmul.f32 %v1869_v45, %v1485_v63  ;;  %v2086_v39 = vpack.c.bf16 %v1998_v11, %v1994_v25 }
 0x308   : > { %v1999_v14 = vmul.f32 %v1871_v24, %v1487_v26  ;;  %2633 = vmatmul.mubr.bf16.gmra.mrb[96].mxu1 %v2082_v28 }
 0x309   : > { %v2085_v51 = vpack.c.bf16 %v1997_v40, %v1993_v37 }
 0x30a   : > { %v2087_v35 = vpack.c.bf16 %v1999_v14, %v1995_v16 }
 0x30b   : > { %2479 = vmatprep.mubr.bf16.mxu0 %v2085_v51 }
 0x30c   : > { %2640 = vmatprep.mubr.bf16.mxu1 %v2087_v35 }
 0x30d   : > { %2480 = vmatmul.mubr.bf16.gmra.mrb[100].mxu0 %v2084_v59 }
 0x310   : > { %2641 = vmatmul.mubr.bf16.gmra.mrb[100].mxu1 %v2086_v39 }
 0x317   : > { %v1156_v43 = vpop.f32.mrb[40].mxu0  ;;  %v1349_v46 = vpop.f32.mrb[40].mxu1 }
 0x318   : > { %v1157_v5 = vadd.f32 %v1156_v43, %v4438_v27  ;;  %v1350_v21 = vadd.f32 %v1349_v46, %v4440_v55  ;;  %v1158_v48 = vpop.f32.mrb[41].mxu0  ;;  %v1351_v61 = vpop.f32.mrb[41].mxu1 }
 0x319   : > { %v1159_v19 = vadd.f32 %v1158_v48, %v4442_v31  ;;  %v1352_v53 = vadd.f32 %v1351_v61, %v4444_v0  ;;  %v1160_v32 = vpop.f32.mrb[42].mxu0  ;;  %v1353_v50 = vpop.f32.mrb[42].mxu1 }
 0x31a   : > { %v1616_v10 = vmul.f32 0.70710677, %v1157_v5  ;;  %v1618_v57 = vmul.f32 0.70710677, %v1350_v21  ;;  %v1161_v56 = vadd.f32 %v1160_v32, %v4438_v27  ;;  %v1354_v3 = vadd.f32 %v1353_v50, %v4440_v55  ;;  %v1162_v17 = vpop.f32.mrb[43].mxu0  ;;  %v1355_v62 = vpop.f32.mrb[43].mxu1 }
 0x31b   : > { %v1617_v7 = vmul.f32 0.70710677, %v1159_v19  ;;  %v1619_v2 = vmul.f32 0.70710677, %v1352_v53  ;;  %v1163_v22 = vadd.f32 %v1162_v17, %v4442_v31  ;;  %v1356_v8 = vadd.f32 %v1355_v62, %v4444_v0 }
 0x31c   : > { %3526 = verf.f32 %v1616_v10  ;;  %v1620_v1 = vmul.f32 0.70710677, %v1161_v56  ;;  %v1622_v28 = vmul.f32 0.70710677, %v1354_v3  ;;  %v1488_v20 = vmul.f32 0.5, %v1157_v5 }
 0x31d   : > { %3528 = verf.f32 %v1618_v57  ;;  %v1621_v4 = vmul.f32 0.70710677, %v1163_v22  ;;  %v1623_v23 = vmul.f32 0.70710677, %v1356_v8  ;;  %v1490_v25 = vmul.f32 0.5, %v1350_v21 }
 0x31e   : > { %3530 = verf.f32 %v1617_v7  ;;  %v1489_v11 = vmul.f32 0.5, %v1159_v19  ;;  %v1491_v45 = vmul.f32 0.5, %v1352_v53  ;;  %v1492_v33 = vmul.f32 0.5, %v1161_v56 }
 0x31f   : > { %3532 = verf.f32 %v1619_v2  ;;  %v1166_v13 = vpop.f32.mrb[44].mxu0  ;;  %v1359_v47 = vpop.f32.mrb[44].mxu1  ;;  %v5101_v39 = vmul.f32 0.5, %v1354_v3  ;;  %v5103_v16 = vmul.f32 0.5, %v1163_v22  ;;  %v5105_v43 = vmul.f32 0.5, %v1356_v8 }
 0x320   : > { %3534 = verf.f32 %v1620_v1  ;;  %v1167_v58 = vadd.f32 %v1166_v13, %v4438_v27  ;;  %v1168_v12 = vpop.f32.mrb[45].mxu0  ;;  %v1360_v54 = vadd.f32 %v1359_v47, %v4440_v55  ;;  %v1361_v38 = vpop.f32.mrb[45].mxu1 }
 0x321   : > { %3536 = verf.f32 %v1622_v28  ;;  %v1169_v36 = vadd.f32 %v1168_v12, %v4442_v31  ;;  %v1170_v15 = vpop.f32.mrb[46].mxu0  ;;  %v1362_v34 = vadd.f32 %v1361_v38, %v4444_v0  ;;  %v1363_v6 = vpop.f32.mrb[46].mxu1 }
 0x322   : > { %3538 = verf.f32 %v1621_v4  ;;  %v1624_v52 = vmul.f32 0.70710677, %v1167_v58  ;;  %v1172_v41 = vpop.f32.mrb[47].mxu0  ;;  %v1626_v49 = vmul.f32 0.70710677, %v1360_v54  ;;  %v1365_v29 = vpop.f32.mrb[47].mxu1  ;;  %v1171_v42 = vadd.f32 %v1170_v15, %v4438_v27 }
 0x323   : > { %3540 = verf.f32 %v1623_v23  ;;  %v1625_v60 = vmul.f32 0.70710677, %v1169_v36  ;;  %v1627_v18 = vmul.f32 0.70710677, %v1362_v34  ;;  %v1364_v44 = vadd.f32 %v1363_v6, %v4440_v55 }
 0x324   : > { %3542 = verf.f32 %v1624_v52  ;;  %v1173_v9 = vadd.f32 %v1172_v41, %v4442_v31  ;;  %v1628_v26 = vmul.f32 0.70710677, %v1171_v42  ;;  %v1366_v24 = vadd.f32 %v1365_v29, %v4444_v0 }
 0x325   : > { %3544 = verf.f32 %v1626_v49  ;;  %v1630_v14 = vmul.f32 0.70710677, %v1364_v44  ;;  %v5107_v46 = vmul.f32 0.5, %v1167_v58  ;;  %v5109_v53 = vmul.f32 0.5, %v1360_v54 }
 0x326   : > { %v3527_v30 = vpop.eup %3526  ;;  %3546 = verf.f32 %v1625_v60  ;;  %v1629_v5 = vmul.f32 0.70710677, %v1173_v9  ;;  %v5111_v32 = vmul.f32 0.5, %v1169_v36  ;;  %v1631_v56 = vmul.f32 0.70710677, %v1366_v24 }
 0x327   : > { %v3529_v63 = vpop.eup %3528  ;;  %v1176_v59 = vpop.f32.mrb[48].mxu0  ;;  %3548 = verf.f32 %v1627_v18  ;;  %v1872_v19 = vadd.f32 1.0, %v3527_v30  ;;  %v5115_v22 = vmul.f32 0.5, %v1362_v34  ;;  %v5119_v13 = vmul.f32 0.5, %v1171_v42 }
 0x328   : > { %v1369_v37 = vpop.f32.mrb[48].mxu1  ;;  %v3531_v40 = vpop.eup %3530  ;;  %3550 = verf.f32 %v1628_v26  ;;  %v1874_v7 = vadd.f32 1.0, %v3529_v63  ;;  %v1177_v8 = vadd.f32 %v1176_v59, %v4438_v27  ;;  %v5124_v12 = vmul.f32 0.5, %v1364_v44 }
 0x329   : > { %v1178_v51 = vpop.f32.mrb[49].mxu0  ;;  %v3533_v35 = vpop.eup %3532  ;;  %3552 = verf.f32 %v1630_v14  ;;  %v1873_v2 = vadd.f32 1.0, %v3531_v40  ;;  %v1370_v1 = vadd.f32 %v1369_v37, %v4440_v55  ;;  %v5122_v47 = vmul.f32 %v1872_v19, %v1488_v20 }
 0x32a   : > { %v1371_v21 = vpop.f32.mrb[49].mxu1  ;;  %v1180_v48 = vpop.f32.mrb[50].mxu0  ;;  %3554 = verf.f32 %v1629_v5  ;;  %v1875_v62 = vadd.f32 1.0, %v3533_v35  ;;  %v1179_v23 = vadd.f32 %v1178_v51, %v4442_v31  ;;  %v5126_v54 = vmul.f32 0.5, %v1173_v9 }
 0x32b   : > { %v3535_v61 = vpop.eup %3534  ;;  %v1373_v50 = vpop.f32.mrb[50].mxu1  ;;  %3556 = verf.f32 %v1631_v56  ;;  %v1632_v36 = vmul.f32 0.70710677, %v1177_v8  ;;  %v5128_v15 = vmul.f32 %v1874_v7, %v1490_v25  ;;  %v5130_v52 = vmul.f32 %v1873_v2, %v1489_v11 }
 0x32c   : > { %v1182_v10 = vpop.f32.mrb[51].mxu0  ;;  %v3537_v57 = vpop.eup %3536  ;;  %v1876_v4 = vadd.f32 1.0, %v3535_v61  ;;  %v5132_v34 = vmul.f32 0.5, %v1366_v24  ;;  %v1634_v6 = vmul.f32 0.70710677, %v1370_v1  ;;  %v5134_v60 = vmul.f32 %v1875_v62, %v1491_v45 }
 0x32d   : > { %v5113_v3 = vpop.f32.mrb[51].mxu1  ;;  %v3539_v17 = vpop.eup %3538  ;;  %v1878_v18 = vadd.f32 1.0, %v3537_v57  ;;  %3558 = verf.f32 %v1632_v36  ;;  %v1633_v25 = vmul.f32 0.70710677, %v1179_v23  ;;  %v1372_v45 = vadd.f32 %v1371_v21, %v4444_v0 }
 0x32e   : > { %v3541_v28 = vpop.eup %3540  ;;  %v1877_v42 = vadd.f32 1.0, %v3539_v17  ;;  %v5138_v30 = vmul.f32 %v1876_v4, %v1492_v33  ;;  %3560 = verf.f32 %v1634_v6  ;;  %v1181_v37 = vadd.f32 %v1180_v48, %v4438_v27 }
 0x32f   : > { %v3543_v58 = vpop.eup %3542  ;;  %v1186_v41 = vpop.f32.mrb[52].mxu0  ;;  %v1879_v20 = vadd.f32 1.0, %v3541_v28  ;;  %3562 = verf.f32 %v1633_v25  ;;  %v1374_v35 = vadd.f32 %v1373_v50, %v4440_v55  ;;  %v1183_v5 = vadd.f32 %v1182_v10, %v4442_v31 }
 0x330   : > { %v3545_v38 = vpop.eup %3544  ;;  %v1379_v49 = vpop.f32.mrb[52].mxu1  ;;  %v1880_v24 = vadd.f32 1.0, %v3543_v58  ;;  %v5153_v19 = vmul.f32 %v1878_v18, %v5101_v39  ;;  %v5156_v57 = vmul.f32 %v1877_v42, %v5103_v16  ;;  %v5158_v21 = vmul.f32 0.5, %v1177_v8 }
 0x331   : > { %v3547_v29 = vpop.eup %3546  ;;  %v1188_v44 = vpop.f32.mrb[53].mxu0  ;;  %v1882_v59 = vadd.f32 1.0, %v3545_v38  ;;  %v1635_v48 = vmul.f32 0.70710677, %v1372_v45  ;;  %v5161_v2 = vmul.f32 %v1879_v20, %v5105_v43  ;;  %v5163_v56 = vmul.f32 0.5, %v1370_v1 }
 0x332   : > { %v5136_v9 = vpop.f32.mrb[53].mxu1  ;;  %v5140_v11 = vpop.f32.mrb[54].mxu0  ;;  %v1881_v51 = vadd.f32 1.0, %v3547_v29  ;;  %v5165_v17 = vmul.f32 0.5, %v1179_v23  ;;  %v1636_v50 = vmul.f32 0.70710677, %v1181_v37  ;;  %v5168_v10 = vmul.f32 %v1880_v24, %v5107_v46 }
 0x333   : > { %v5142_v63 = vpop.f32.mrb[54].mxu1  ;;  %v3549_v26 = vpop.eup %3548  ;;  %v5171_v39 = vmul.f32 %v1882_v59, %v5109_v53  ;;  %v1638_v62 = vmul.f32 0.70710677, %v1374_v35  ;;  %3564 = verf.f32 %v1635_v48  ;;  %v1637_v43 = vmul.f32 0.70710677, %v1183_v5 }
 0x334   : > { %v5146_v40 = vpop.f32.mrb[55].mxu0  ;;  %v5148_v14 = vpop.f32.mrb[55].mxu1  ;;  %v1883_v16 = vadd.f32 1.0, %v3549_v26  ;;  %v5174_v28 = vmul.f32 %v1881_v51, %v5111_v32  ;;  %3566 = verf.f32 %v1636_v50  ;;  %v1376_v46 = vadd.f32 %v5113_v3, %v4444_v0 }
 0x335   : > { %v3551_v33 = vpop.eup %3550  ;;  %3568 = verf.f32 %v1638_v62  ;;  %v1187_v32 = vadd.f32 %v1186_v41, %v4438_v27  ;;  %v1380_v29 = vadd.f32 %v1379_v49, %v4440_v55  ;;  %v1189_v26 = vadd.f32 %v1188_v44, %v4442_v31 }
 0x336   : > { %v3553_v61 = vpop.eup %3552  ;;  %v1884_v4 = vadd.f32 1.0, %v3551_v33  ;;  %v5193_v25 = vmul.f32 %v1883_v16, %v5115_v22  ;;  %3570 = verf.f32 %v1637_v43  ;;  %v1639_v3 = vmul.f32 0.70710677, %v1376_v46 }
 0x337   : > { %v3555_v7 = vpop.eup %3554  ;;  %v5176_v1 = vpop.f32.mrb[56].mxu0  ;;  %v1886_v58 = vadd.f32 1.0, %v3553_v61  ;;  %v5200_v41 = vmul.f32 0.5, %v1372_v45  ;;  %v5202_v49 = vmul.f32 0.5, %v1181_v37  ;;  %v1640_v51 = vmul.f32 0.70710677, %v1187_v32 }
 0x338   : > { %v3557_v8 = vpop.eup %3556  ;;  %v5178_v23 = vpop.f32.mrb[56].mxu1  ;;  %v1885_v36 = vadd.f32 1.0, %v3555_v7  ;;  %v1382_v61 = vadd.f32 %v5136_v9, %v4444_v0  ;;  %v5207_v22 = vmul.f32 %v1884_v4, %v5119_v13  ;;  %v5212_v44 = vmul.f32 0.5, %v1374_v35 }
 0x339   : > { %v5182_v53 = vpop.f32.mrb[57].mxu0  ;;  %v5184_v38 = vpop.f32.mrb[57].mxu1  ;;  %v1887_v6 = vadd.f32 1.0, %v3557_v8  ;;  %v5210_v48 = vmul.f32 %v1886_v58, %v5124_v12  ;;  %v1642_v7 = vmul.f32 0.70710677, %v1380_v29  ;;  %v5220_v37 = vmul.f32 0.5, %v1183_v5 }
 0x33a   : > { %v5188_v18 = vpop.f32.mrb[58].mxu0  ;;  %v5190_v42 = vpop.f32.mrb[58].mxu1  ;;  %v5215_v16 = vmul.f32 %v1885_v36, %v5126_v54  ;;  %3572 = verf.f32 %v1639_v3  ;;  %v1641_v13 = vmul.f32 0.70710677, %v1189_v26  ;;  %v1643_v8 = vmul.f32 0.70710677, %v1382_v61 }
 0x33b   : > { %v3559_v20 = vpop.eup %3558  ;;  %v5196_v24 = vpop.f32.mrb[59].mxu0  ;;  %v5218_v45 = vmul.f32 %v1887_v6, %v5132_v34  ;;  %3574 = verf.f32 %v1640_v51  ;;  %v2089_v12 = vpack.c.bf16 %v5156_v57, %v5130_v52  ;;  %v2091_v35 = vpack.c.bf16 %v5161_v2, %v5134_v60 }
 0x33c   : > { %v5198_v59 = vpop.f32.mrb[59].mxu1  ;;  %v3561_v33 = vpop.eup %3560  ;;  %v1888_v9 = vadd.f32 1.0, %v3559_v20  ;;  %v1191_v54 = vadd.f32 %v5140_v11, %v4438_v27  ;;  %3576 = verf.f32 %v1642_v7  ;;  %v1384_v43 = vadd.f32 %v5142_v63, %v4440_v55 }
 0x33d   : > { %v3563_v50 = vpop.eup %3562  ;;  %v1890_v62 = vadd.f32 1.0, %v3561_v33  ;;  %v2088_v58 = vpack.c.bf16 %v5138_v30, %v5122_v47  ;;  %v5240_v57 = vmul.f32 0.5, %v1376_v46  ;;  %v5242_v11 = vmul.f32 0.5, %v1187_v32  ;;  %2487 = vmatprep.mubr.bf16.mxu0 %v2089_v12  ;;  %2648 = vmatprep.mubr.bf16.mxu1 %v2091_v35 }
 0x33e   : > { %v1889_v5 = vadd.f32 1.0, %v3563_v50  ;;  %v3565_v60 = vpop.eup %3564  ;;  %v1644_v2 = vmul.f32 0.70710677, %v1191_v54  ;;  %v2090_v6 = vpack.c.bf16 %v5153_v19, %v5128_v15  ;;  %v5250_v30 = vmul.f32 0.5, %v1380_v29 }
 0x33f   : > { %v5228_v4 = vpop.f32.mrb[60].mxu0  ;;  %v5230_v34 = vpop.f32.mrb[60].mxu1  ;;  %3578 = verf.f32 %v1641_v13  ;;  %v1646_v3 = vmul.f32 0.70710677, %v1384_v43  ;;  %2488 = vmatmul.mubr.bf16.gmra.mrb[104].mxu0 %v2088_v58  ;;  %v1193_v46 = vadd.f32 %v5146_v40, %v4442_v31  ;;  %v5259_v15 = vmul.f32 %v1888_v9, %v5158_v21 }
 0x340   : > { %v5236_v36 = vpop.f32.mrb[61].mxu0  ;;  %v5238_v52 = vpop.f32.mrb[61].mxu1  ;;  %v5261_v19 = vmul.f32 0.5, %v1189_v26  ;;  %3580 = verf.f32 %v1643_v8  ;;  %2649 = vmatmul.mubr.bf16.gmra.mrb[104].mxu1 %v2090_v6  ;;  %v1386_v29 = vadd.f32 %v5148_v14, %v4444_v0  ;;  %v5266_v50 = vmul.f32 %v1890_v62, %v5163_v56 }
 0x341   : > { %v5246_v20 = vpop.f32.mrb[62].mxu0  ;;  %v5248_v63 = vpop.f32.mrb[62].mxu1  ;;  %v5269_v40 = vmul.f32 %v1889_v5, %v5165_v17  ;;  %v1891_v13 = vadd.f32 1.0, %v3565_v60  ;;  %v5271_v12 = vmul.f32 0.5, %v1382_v61  ;;  %3582 = verf.f32 %v1644_v2 }
 0x342   : > { %v3567_v47 = vpop.eup %3566  ;;  %v5254_v32 = vpop.f32.mrb[63].mxu0  ;;  %v1645_v21 = vmul.f32 0.70710677, %v1193_v46  ;;  %v1647_v26 = vmul.f32 0.70710677, %v1386_v29  ;;  %3584 = verf.f32 %v1646_v3  ;;  %v1197_v8 = vadd.f32 %v5176_v1, %v4438_v27 }
 0x343   : > { %v5256_v33 = vpop.f32.mrb[63].mxu1  ;;  %v3569_v51 = vpop.eup %3568  ;;  %v1892_v35 = vadd.f32 1.0, %v3567_v47  ;;  %v1390_v14 = vadd.f32 %v5178_v23, %v4440_v55  ;;  %v1199_v17 = vadd.f32 %v5182_v53, %v4442_v31  ;;  %v2093_v61 = vpack.c.bf16 %v5215_v16, %v5174_v28 }
 0x344   : > { %v3571_v7 = vpop.eup %3570  ;;  %v1894_v9 = vadd.f32 1.0, %v3569_v51  ;;  %3586 = verf.f32 %v1645_v21  ;;  %v5281_v58 = vmul.f32 0.5, %v1191_v54  ;;  %v1648_v60 = vmul.f32 0.70710677, %v1197_v8 }
 0x345   : > { %v3573_v56 = vpop.eup %3572  ;;  %v1893_v62 = vadd.f32 1.0, %v3571_v7  ;;  %3588 = verf.f32 %v1647_v26  ;;  %v1392_v1 = vadd.f32 %v5184_v38, %v4444_v0  ;;  %v5286_v2 = vmul.f32 %v1891_v13, %v5200_v41  ;;  %2495 = vmatprep.mubr.bf16.mxu0 %v2093_v61 }
 0x346   : > { %v3575_v5 = vpop.eup %3574  ;;  %v5289_v23 = vmul.f32 %v1892_v35, %v5202_v49  ;;  %v5291_v6 = vmul.f32 0.5, %v1384_v43  ;;  %v1650_v53 = vmul.f32 0.70710677, %v1390_v14  ;;  %v5294_v28 = vmul.f32 %v1894_v9, %v5212_v44 }
 0x347   : > { %v3577_v47 = vpop.eup %3576  ;;  %v1895_v16 = vadd.f32 1.0, %v3573_v56  ;;  %v5296_v54 = vmul.f32 0.5, %v1193_v46  ;;  %v5298_v3 = vmul.f32 0.5, %v1386_v29  ;;  %v5301_v38 = vmul.f32 %v1893_v62, %v5220_v37 }
 0x348   : > { %v1896_v41 = vadd.f32 1.0, %v3575_v5  ;;  %3590 = verf.f32 %v1648_v60  ;;  %v1649_v49 = vmul.f32 0.70710677, %v1199_v17  ;;  %v5303_v43 = vmul.f32 0.5, %v1197_v8 }
 0x349   : > { %v3579_v51 = vpop.eup %3578  ;;  %3592 = verf.f32 %v1650_v53  ;;  %v1651_v7 = vmul.f32 0.70710677, %v1392_v1  ;;  %v2095_v44 = vpack.c.bf16 %v5218_v45, %v5193_v25  ;;  %v1898_v35 = vadd.f32 1.0, %v3577_v47 }
 0x34a   : > { %v3581_v13 = vpop.eup %3580  ;;  %3594 = verf.f32 %v1649_v49  ;;  %v1201_v46 = vadd.f32 %v5188_v18, %v4438_v27  ;;  %v1394_v37 = vadd.f32 %v5190_v42, %v4440_v55  ;;  %v2023_v29 = vmul.f32 %v1895_v16, %v5240_v57 }
 0x34b   : > { %3596 = verf.f32 %v1651_v7  ;;  %2656 = vmatprep.mubr.bf16.mxu1 %v2095_v44  ;;  %v2092_v21 = vpack.c.bf16 %v5207_v22, %v5168_v10  ;;  %v2094_v26 = vpack.c.bf16 %v5210_v48, %v5171_v39  ;;  %v3583_v25 = vpop.eup %3582  ;;  %v5317_v45 = vmul.f32 %v1896_v41, %v5242_v11 }
 0x34c   : > { %v1897_v9 = vadd.f32 1.0, %v3579_v51  ;;  %v5319_v8 = vmul.f32 0.5, %v1390_v14  ;;  %v1652_v18 = vmul.f32 0.70710677, %v1201_v46  ;;  %v3585_v56 = vpop.eup %3584  ;;  %v1899_v42 = vadd.f32 1.0, %v3581_v13 }
 0x34d   : > { %v1654_v62 = vmul.f32 0.70710677, %v1394_v37  ;;  %2496 = vmatmul.mubr.bf16.gmra.mrb[108].mxu0 %v2092_v21  ;;  %2657 = vmatmul.mubr.bf16.gmra.mrb[108].mxu1 %v2094_v26  ;;  %v1203_v57 = vadd.f32 %v5196_v24, %v4442_v31  ;;  %v1396_v10 = vadd.f32 %v5198_v59, %v4444_v0  ;;  %v5326_v22 = vmul.f32 %v1898_v35, %v5250_v30 }
 0x34e   : > { %v3587_v39 = vpop.eup %3586  ;;  %v5328_v48 = vmul.f32 0.5, %v1199_v17  ;;  %3598 = verf.f32 %v1652_v18  ;;  %v5332_v11 = vadd.f32 %v5228_v4, %v4438_v27  ;;  %v1900_v61 = vadd.f32 1.0, %v3583_v25 }
 0x34f   : > { %v3589_v14 = vpop.eup %3588  ;;  %3600 = verf.f32 %v1654_v62  ;;  %v1653_v5 = vmul.f32 0.70710677, %v1203_v57  ;;  %v5336_v24 = vadd.f32 %v5230_v34, %v4440_v55  ;;  %v5339_v59 = vmul.f32 %v1897_v9, %v5261_v19 }
 0x350   : > { %v1902_v30 = vadd.f32 1.0, %v3585_v56  ;;  %v5341_v60 = vmul.f32 0.5, %v1392_v1  ;;  %v1655_v17 = vmul.f32 0.70710677, %v1396_v10  ;;  %v5344_v53 = vmul.f32 %v1899_v42, %v5271_v12 }
 0x351   : > { %v1901_v4 = vadd.f32 1.0, %v3587_v39  ;;  %v1903_v47 = vadd.f32 1.0, %v3589_v14  ;;  %3602 = verf.f32 %v1653_v5  ;;  %v1524_v41 = vmul.f32 0.5, %v1201_v46 }
 0x352   : > { %v3591_v16 = vpop.eup %3590  ;;  %v1526_v49 = vmul.f32 0.5, %v1394_v37  ;;  %3604 = verf.f32 %v1655_v17  ;;  %v1656_v34 = vmul.f32 0.70710677, %v5332_v11  ;;  %v5348_v19 = vmul.f32 %v1900_v61, %v5281_v58 }
 0x353   : > { %v3593_v51 = vpop.eup %3592  ;;  %v1658_v1 = vmul.f32 0.70710677, %v5336_v24  ;;  %v5353_v7 = vadd.f32 %v5236_v36, %v4442_v31  ;;  %v5357_v12 = vadd.f32 %v5238_v52, %v4444_v0  ;;  %v5360_v13 = vmul.f32 %v1902_v30, %v5291_v6 }
 0x354   : > { %v3595_v44 = vpop.eup %3594  ;;  %v1525_v35 = vmul.f32 0.5, %v1203_v57  ;;  %v2097_v46 = vpack.c.bf16 %v5301_v38, %v5269_v40  ;;  %v2099_v58 = vpack.c.bf16 %v2023_v29, %v5286_v2  ;;  %v2029_v21 = vmul.f32 %v1901_v4, %v5296_v54 }
 0x355   : > { %v3597_v37 = vpop.eup %3596  ;;  %v2031_v36 = vmul.f32 %v1903_v47, %v5298_v3  ;;  %v1527_v26 = vmul.f32 0.5, %v1396_v10  ;;  %v1657_v25 = vmul.f32 0.70710677, %v5353_v7  ;;  %v1904_v52 = vadd.f32 1.0, %v3591_v16 }
 0x356   : > { %3606 = verf.f32 %v1656_v34  ;;  %v1659_v9 = vmul.f32 0.70710677, %v5357_v12  ;;  %2503 = vmatprep.mubr.bf16.mxu0 %v2097_v46  ;;  %2664 = vmatprep.mubr.bf16.mxu1 %v2099_v58  ;;  %v1211_v6 = vadd.f32 %v5246_v20, %v4438_v27  ;;  %v1906_v40 = vadd.f32 1.0, %v3593_v51 }
 0x357   : > { %3608 = verf.f32 %v1658_v1  ;;  %v1404_v2 = vadd.f32 %v5248_v63, %v4440_v55  ;;  %v2096_v54 = vpack.c.bf16 %v5289_v23, %v5259_v15  ;;  %v1905_v38 = vadd.f32 1.0, %v3595_v44 }
 0x358   : > { %v3599_v3 = vpop.eup %3598  ;;  %v1907_v29 = vadd.f32 1.0, %v3597_v37  ;;  %3610 = verf.f32 %v1657_v25  ;;  %v1660_v18 = vmul.f32 0.70710677, %v1211_v6  ;;  %v2098_v27 = vpack.c.bf16 %v5294_v28, %v5266_v50 }
 0x359   : > { %v3601_v56 = vpop.eup %3600  ;;  %v1908_v42 = vadd.f32 1.0, %v3599_v3  ;;  %3612 = verf.f32 %v1659_v9  ;;  %v1662_v62 = vmul.f32 0.70710677, %v1404_v2  ;;  %2504 = vmatmul.mubr.bf16.gmra.mrb[112].mxu0 %v2096_v54  ;;  %v1213_v55 = vadd.f32 %v5254_v32, %v4442_v31 }
 0x35a   : > { %v1910_v20 = vadd.f32 1.0, %v3601_v56  ;;  %3614 = verf.f32 %v1660_v18  ;;  %v1406_v63 = vadd.f32 %v5256_v33, %v4444_v0  ;;  %2665 = vmatmul.mubr.bf16.gmra.mrb[112].mxu1 %v2098_v27  ;;  %v2101_v57 = vpack.c.bf16 %v2029_v21, %v5339_v59 }
 0x35b   : > { %v3603_v15 = vpop.eup %3602  ;;  %v2036_v23 = vmul.f32 %v1908_v42, %v1524_v41  ;;  %3616 = verf.f32 %v1662_v62  ;;  %v2103_v10 = vpack.c.bf16 %v2031_v36, %v5344_v53  ;;  %v2032_v14 = vmul.f32 %v1904_v52, %v5303_v43 }
 0x35c   : > { %v3605_v39 = vpop.eup %3604  ;;  %v2038_v50 = vmul.f32 %v1910_v20, %v1526_v49  ;;  %v1909_v28 = vadd.f32 1.0, %v3603_v15  ;;  %v1661_v61 = vmul.f32 0.70710677, %v1213_v55  ;;  %v2034_v5 = vmul.f32 %v1906_v40, %v5319_v8  ;;  %2511 = vmatprep.mubr.bf16.mxu0 %v2101_v57 }
 0x35d   : > { %v1911_v31 = vadd.f32 1.0, %v3605_v39  ;;  %v1663_v32 = vmul.f32 0.70710677, %v1406_v63  ;;  %2672 = vmatprep.mubr.bf16.mxu1 %v2103_v10  ;;  %v2100_v0 = vpack.c.bf16 %v5348_v19, %v5317_v45  ;;  %v2033_v33 = vmul.f32 %v1905_v38, %v5328_v48 }
 0x35e   : > { %v2037_v59 = vmul.f32 %v1909_v28, %v1525_v35  ;;  %3618 = verf.f32 %v1661_v61  ;;  %v2102_v30 = vpack.c.bf16 %v5360_v13, %v5326_v22  ;;  %v2035_v43 = vmul.f32 %v1907_v29, %v5341_v60 }
 0x35f   : > { %v2039_v17 = vmul.f32 %v1911_v31, %v1527_v26  ;;  %3620 = verf.f32 %v1663_v32  ;;  %v2104_v53 = vpack.c.bf16 %v2036_v23, %v2032_v14  ;;  %v2106_v47 = vpack.c.bf16 %v2038_v50, %v2034_v5 }
 0x360   : > { %v3607_v8 = vpop.eup %3606  ;;  %v2105_v4 = vpack.c.bf16 %v2037_v59, %v2033_v33  ;;  %v1528_v60 = vmul.f32 0.5, %v5332_v11  ;;  %v1532_v19 = vmul.f32 0.5, %v1211_v6  ;;  %v1530_v44 = vmul.f32 0.5, %v5336_v24 }
 0x361   : > { %v3609_v16 = vpop.eup %3608  ;;  %2512 = vmatmul.mubr.bf16.gmra.mrb[116].mxu0 %v2100_v0  ;;  %v2107_v41 = vpack.c.bf16 %v2039_v17, %v2035_v43  ;;  %v1912_v48 = vadd.f32 1.0, %v3607_v8  ;;  %v1534_v13 = vmul.f32 0.5, %v1404_v2  ;;  %v1529_v9 = vmul.f32 0.5, %v5353_v7 }
 0x362   : > { %v3611_v49 = vpop.eup %3610  ;;  %2519 = vmatprep.mubr.bf16.mxu0 %v2105_v4  ;;  %2673 = vmatmul.mubr.bf16.gmra.mrb[116].mxu1 %v2102_v30  ;;  %v1914_v51 = vadd.f32 1.0, %v3609_v16  ;;  %v1533_v40 = vmul.f32 0.5, %v1213_v55  ;;  %v1531_v6 = vmul.f32 0.5, %v5357_v12  ;;  %v1535_v3 = vmul.f32 0.5, %v1406_v63  ;;  %v5398_v12 = vld [vmem:[%s5525_s6] ss:$0 sm:$0xff] }
 0x363   : > { %v3613_v45 = vpop.eup %3612  ;;  %2680 = vmatprep.mubr.bf16.mxu1 %v2107_v41  ;;  %v2040_v46 = vmul.f32 %v1912_v48, %v1528_v60  ;;  %v1913_v58 = vadd.f32 1.0, %v3611_v49 }
 0x364   : > { %v3615_v34 = vpop.eup %3614  ;;  %v2042_v36 = vmul.f32 %v1914_v51, %v1530_v44  ;;  %v1915_v26 = vadd.f32 1.0, %v3613_v45 }
 0x365   : > { %v3617_v22 = vpop.eup %3616  ;;  %v1916_v1 = vadd.f32 1.0, %v3615_v34  ;;  %v2041_v38 = vmul.f32 %v1913_v58, %v1529_v9 }
 0x366   : > { %v1918_v35 = vadd.f32 1.0, %v3617_v22  ;;  %v2043_v18 = vmul.f32 %v1915_v26, %v1531_v6 }
 0x367   : > { %v2044_v37 = vmul.f32 %v1916_v1, %v1532_v19 }
 0x368   : > { %v3619_v21 = vpop.eup %3618  ;;  %v2046_v25 = vmul.f32 %v1918_v35, %v1534_v13 }
 0x369   : > { %v3621_v52 = vpop.eup %3620  ;;  %v1917_v54 = vadd.f32 1.0, %v3619_v21  ;;  %2520 = vmatmul.mubr.bf16.gmra.mrb[120].mxu0 %v2104_v53  ;;  %v2108_v11 = vpack.c.bf16 %v2044_v37, %v2040_v46 }
 0x36a   : > { %v1919_v24 = vadd.f32 1.0, %v3621_v52  ;;  %v2110_v2 = vpack.c.bf16 %v2046_v25, %v2042_v36  ;;  %2681 = vmatmul.mubr.bf16.gmra.mrb[120].mxu1 %v2106_v47 }
 0x36b   : > { %v2045_v29 = vmul.f32 %v1917_v54, %v1533_v40 }
 0x36c   : > { %v2047_v56 = vmul.f32 %v1919_v24, %v1535_v3 }
 0x36d   : > { %v2109_v42 = vpack.c.bf16 %v2045_v29, %v2041_v38 }
 0x36e   : > { %v2111_v62 = vpack.c.bf16 %v2047_v56, %v2043_v18 }
 0x36f   : > { %2527 = vmatprep.mubr.bf16.mxu0 %v2109_v42 }
 0x370   : > { %2688 = vmatprep.mubr.bf16.mxu1 %v2111_v62 }
 0x371   : > { %2528 = vmatmul.mubr.bf16.gmra.mrb[124].mxu0 %v2108_v11 }
 0x372   : > { %2689 = vmatmul.mubr.bf16.gmra.mrb[124].mxu1 %v2110_v2 }
 0x377   : > { %v2938_v7 = vpop.f32.mrb[64].mxu0  ;;  %v3050_v27 = vpop.f32.mrb[64].mxu1 }
 0x378   : > { %v2939_v20 = vpop.f32.mrb[65].mxu0  ;;  %v3051_v55 = vpop.f32.mrb[65].mxu1 }
 0x379   : > { %v2940_v63 = vadd.f32 %v2939_v20, %v2938_v7  ;;  %v3052_v15 = vadd.f32 %v3051_v55, %v3050_v27  ;;  %v2941_v23 = vpop.f32.mrb[66].mxu0  ;;  %v3053_v57 = vpop.f32.mrb[66].mxu1 }
 0x37a   : > { %v2942_v10 = vpop.f32.mrb[67].mxu0  ;;  %v3054_v39 = vpop.f32.mrb[67].mxu1 }
 0x37b   : > { %v2410_v14 = vadd.f32 %v2940_v63, %v5398_v12  ;;  %v2943_v50 = vadd.f32 %v2942_v10, %v2941_v23  ;;  %v3055_v28 = vadd.f32 %v3054_v39, %v3053_v57 }
 0x37d   : > { %v2571_v61 = vadd.f32 %v3052_v15, %v2410_v14  ;;  %v2413_v5 = vadd.f32 %v2943_v50, %v5398_v12 }
 0x37f   : > { %2697 = vst [vmem:[%s5404_s15] sm:$0xff] %v2571_v61  ;;  %v2574_v31 = vadd.f32 %v3055_v28, %v2413_v5 }
 0x381   : > { %2698 = vst [vmem:[%s5404_s15 + $0x8] sm:$0xff] %v2574_v31 }
 0x386   : > { %v2944_v32 = vpop.f32.mrb[68].mxu0 }
 0x387   : > { %v3056_v0 = vpop.f32.mrb[68].mxu1  ;;  %v2945_v33 = vpop.f32.mrb[69].mxu0 }
 0x388   : > { %v3057_v59 = vpop.f32.mrb[69].mxu1  ;;  %v2946_v30 = vadd.f32 %v2945_v33, %v2944_v32  ;;  %v2947_v17 = vpop.f32.mrb[70].mxu0 }
 0x389   : > { %v3058_v43 = vadd.f32 %v3057_v59, %v3056_v0  ;;  %v3059_v53 = vpop.f32.mrb[70].mxu1  ;;  %v2948_v8 = vpop.f32.mrb[71].mxu0 }
 0x38a   : > { %v3060_v4 = vpop.f32.mrb[71].mxu1  ;;  %v2418_v47 = vadd.f32 %v2946_v30, %v5398_v12  ;;  %v2949_v16 = vadd.f32 %v2948_v8, %v2947_v17 }
 0x38b   : > { %v3061_v41 = vadd.f32 %v3060_v4, %v3059_v53 }
 0x38c   : > { %v2579_v49 = vadd.f32 %v3058_v43, %v2418_v47  ;;  %v2421_v45 = vadd.f32 %v2949_v16, %v5398_v12 }
 0x38e   : > { %2699 = vst [vmem:[%s5404_s15 + $0x10] sm:$0xff] %v2579_v49  ;;  %v2582_v48 = vadd.f32 %v3061_v41, %v2421_v45 }
 0x390   : > { %2700 = vst [vmem:[%s5404_s15 + $0x18] sm:$0xff] %v2582_v48 }
 0x394   : > { %v3062_v51 = vpop.f32.mrb[72].mxu1 }
 0x395   : > { %v3063_v60 = vpop.f32.mrb[73].mxu1 }
 0x396   : > { %v2950_v34 = vpop.f32.mrb[72].mxu0  ;;  %v3064_v1 = vadd.f32 %v3063_v60, %v3062_v51  ;;  %v3065_v13 = vpop.f32.mrb[74].mxu1 }
 0x397   : > { %v2951_v22 = vpop.f32.mrb[73].mxu0  ;;  %v3066_v46 = vpop.f32.mrb[75].mxu1 }
 0x398   : > { %v2952_v19 = vadd.f32 %v2951_v22, %v2950_v34  ;;  %v2953_v44 = vpop.f32.mrb[74].mxu0  ;;  %v3067_v21 = vadd.f32 %v3066_v46, %v3065_v13 }
 0x399   : > { %v2954_v35 = vpop.f32.mrb[75].mxu0 }
 0x39a   : > { %v2426_v58 = vadd.f32 %v2952_v19, %v5398_v12  ;;  %v2955_v37 = vadd.f32 %v2954_v35, %v2953_v44 }
 0x39c   : > { %v2587_v36 = vadd.f32 %v3064_v1, %v2426_v58  ;;  %v2429_v26 = vadd.f32 %v2955_v37, %v5398_v12 }
 0x39e   : > { %2701 = vst [vmem:[%s5404_s15 + $0x20] sm:$0xff] %v2587_v36  ;;  %v2590_v25 = vadd.f32 %v3067_v21, %v2429_v26 }
 0x3a0   : > { %2702 = vst [vmem:[%s5404_s15 + $0x28] sm:$0xff] %v2590_v25 }
 0x3a1   : > { %v2956_v52 = vpop.f32.mrb[76].mxu0 }
 0x3a2   : > { %v3068_v9 = vpop.f32.mrb[76].mxu1  ;;  %v2957_v40 = vpop.f32.mrb[77].mxu0 }
 0x3a3   : > { %v2958_v54 = vadd.f32 %v2957_v40, %v2956_v52  ;;  %v3069_v11 = vpop.f32.mrb[77].mxu1  ;;  %v2959_v6 = vpop.f32.mrb[78].mxu0 }
 0x3a4   : > { %v3070_v3 = vadd.f32 %v3069_v11, %v3068_v9  ;;  %v3071_v24 = vpop.f32.mrb[78].mxu1  ;;  %v2960_v2 = vpop.f32.mrb[79].mxu0 }
 0x3a5   : > { %v2434_v38 = vadd.f32 %v2958_v54, %v5398_v12  ;;  %v2961_v29 = vadd.f32 %v2960_v2, %v2959_v6  ;;  %v3072_v18 = vpop.f32.mrb[79].mxu1 }
 0x3a6   : > { %v3073_v56 = vadd.f32 %v3072_v18, %v3071_v24 }
 0x3a7   : > { %v2595_v42 = vadd.f32 %v3070_v3, %v2434_v38  ;;  %v2437_v62 = vadd.f32 %v2961_v29, %v5398_v12 }
 0x3a9   : > { %2703 = vst [vmem:[%s5404_s15 + $0x30] sm:$0xff] %v2595_v42  ;;  %v2598_v7 = vadd.f32 %v3073_v56, %v2437_v62 }
 0x3ab   : > { %2704 = vst [vmem:[%s5404_s15 + $0x38] sm:$0xff] %v2598_v7 }
 0x3ae   : > { %v2962_v27 = vpop.f32.mrb[80].mxu0 }
 0x3af   : > { %v2963_v20 = vpop.f32.mrb[81].mxu0 }
 0x3b0   : > { %v2964_v55 = vadd.f32 %v2963_v20, %v2962_v27  ;;  %v2965_v63 = vpop.f32.mrb[82].mxu0 }
 0x3b1   : > { %v3074_v15 = vpop.f32.mrb[80].mxu1  ;;  %v2966_v23 = vpop.f32.mrb[83].mxu0 }
 0x3b2   : > { %v2442_v57 = vadd.f32 %v2964_v55, %v5398_v12  ;;  %v3075_v10 = vpop.f32.mrb[81].mxu1  ;;  %v2967_v39 = vadd.f32 %v2966_v23, %v2965_v63 }
 0x3b3   : > { %v3076_v14 = vadd.f32 %v3075_v10, %v3074_v15  ;;  %v3077_v50 = vpop.f32.mrb[82].mxu1 }
 0x3b4   : > { %v2445_v28 = vadd.f32 %v2967_v39, %v5398_v12  ;;  %v3078_v61 = vpop.f32.mrb[83].mxu1 }
 0x3b5   : > { %v2603_v5 = vadd.f32 %v3076_v14, %v2442_v57  ;;  %v3079_v31 = vadd.f32 %v3078_v61, %v3077_v50 }
 0x3b7   : > { %2705 = vst [vmem:[%s5404_s15 + $0x40] sm:$0xff] %v2603_v5  ;;  %v2606_v32 = vadd.f32 %v3079_v31, %v2445_v28 }
 0x3b9   : > { %2706 = vst [vmem:[%s5404_s15 + $0x48] sm:$0xff] %v2606_v32 }
 0x3bb   : > { %v2968_v0 = vpop.f32.mrb[84].mxu0 }
 0x3bc   : > { %v2969_v33 = vpop.f32.mrb[85].mxu0 }
 0x3bd   : > { %v2970_v59 = vadd.f32 %v2969_v33, %v2968_v0  ;;  %v2971_v30 = vpop.f32.mrb[86].mxu0 }
 0x3be   : > { %v3080_v43 = vpop.f32.mrb[84].mxu1  ;;  %v2972_v17 = vpop.f32.mrb[87].mxu0 }
 0x3bf   : > { %v2450_v53 = vadd.f32 %v2970_v59, %v5398_v12  ;;  %v3081_v8 = vpop.f32.mrb[85].mxu1  ;;  %v2973_v4 = vadd.f32 %v2972_v17, %v2971_v30 }
 0x3c0   : > { %v3082_v47 = vadd.f32 %v3081_v8, %v3080_v43  ;;  %v3083_v16 = vpop.f32.mrb[86].mxu1 }
 0x3c1   : > { %v2453_v41 = vadd.f32 %v2973_v4, %v5398_v12  ;;  %v3084_v49 = vpop.f32.mrb[87].mxu1 }
 0x3c2   : > { %v2611_v45 = vadd.f32 %v3082_v47, %v2450_v53  ;;  %v3085_v48 = vadd.f32 %v3084_v49, %v3083_v16 }
 0x3c4   : > { %2707 = vst [vmem:[%s5404_s15 + $0x50] sm:$0xff] %v2611_v45  ;;  %v2614_v34 = vadd.f32 %v3085_v48, %v2453_v41 }
 0x3c6   : > { %2708 = vst [vmem:[%s5404_s15 + $0x58] sm:$0xff] %v2614_v34 }
 0x3c8   : > { %v2974_v51 = vpop.f32.mrb[88].mxu0 }
 0x3c9   : > { %v2975_v22 = vpop.f32.mrb[89].mxu0 }
 0x3ca   : > { %v2976_v60 = vadd.f32 %v2975_v22, %v2974_v51  ;;  %v2977_v19 = vpop.f32.mrb[90].mxu0 }
 0x3cb   : > { %v3086_v1 = vpop.f32.mrb[88].mxu1  ;;  %v2978_v44 = vpop.f32.mrb[91].mxu0 }
 0x3cc   : > { %v2458_v13 = vadd.f32 %v2976_v60, %v5398_v12  ;;  %v3087_v35 = vpop.f32.mrb[89].mxu1  ;;  %v2979_v46 = vadd.f32 %v2978_v44, %v2977_v19 }
 0x3cd   : > { %v3088_v58 = vadd.f32 %v3087_v35, %v3086_v1  ;;  %v3089_v37 = vpop.f32.mrb[90].mxu1 }
 0x3ce   : > { %v2461_v21 = vadd.f32 %v2979_v46, %v5398_v12  ;;  %v3090_v36 = vpop.f32.mrb[91].mxu1 }
 0x3cf   : > { %v2619_v26 = vadd.f32 %v3088_v58, %v2458_v13  ;;  %v3091_v25 = vadd.f32 %v3090_v36, %v3089_v37 }
 0x3d0   : > { %v2980_v52 = vpop.f32.mrb[92].mxu0 }
 0x3d1   : > { %2709 = vst [vmem:[%s5404_s15 + $0x60] sm:$0xff] %v2619_v26  ;;  %v2622_v9 = vadd.f32 %v3091_v25, %v2461_v21  ;;  %v2981_v40 = vpop.f32.mrb[93].mxu0 }
 0x3d2   : > { %v2982_v54 = vadd.f32 %v2981_v40, %v2980_v52  ;;  %v2983_v11 = vpop.f32.mrb[94].mxu0 }
 0x3d3   : > { %2710 = vst [vmem:[%s5404_s15 + $0x68] sm:$0xff] %v2622_v9  ;;  %v3092_v6 = vpop.f32.mrb[92].mxu1  ;;  %v2984_v3 = vpop.f32.mrb[95].mxu0 }
 0x3d4   : > { %v2466_v24 = vadd.f32 %v2982_v54, %v5398_v12  ;;  %v3093_v2 = vpop.f32.mrb[93].mxu1  ;;  %v2985_v38 = vadd.f32 %v2984_v3, %v2983_v11 }
 0x3d5   : > { %v3094_v29 = vadd.f32 %v3093_v2, %v3092_v6  ;;  %v3095_v18 = vpop.f32.mrb[94].mxu1 }
 0x3d6   : > { %v2469_v56 = vadd.f32 %v2985_v38, %v5398_v12  ;;  %v3096_v42 = vpop.f32.mrb[95].mxu1 }
 0x3d7   : > { %v2627_v62 = vadd.f32 %v3094_v29, %v2466_v24  ;;  %v3097_v7 = vadd.f32 %v3096_v42, %v3095_v18 }
 0x3d8   : > { %v2986_v27 = vpop.f32.mrb[96].mxu0 }
 0x3d9   : > { %2711 = vst [vmem:[%s5404_s15 + $0x70] sm:$0xff] %v2627_v62  ;;  %v2630_v20 = vadd.f32 %v3097_v7, %v2469_v56  ;;  %v2987_v55 = vpop.f32.mrb[97].mxu0 }
 0x3da   : > { %v2988_v63 = vadd.f32 %v2987_v55, %v2986_v27  ;;  %v2989_v15 = vpop.f32.mrb[98].mxu0 }
 0x3db   : > { %2712 = vst [vmem:[%s5404_s15 + $0x78] sm:$0xff] %v2630_v20  ;;  %v3098_v23 = vpop.f32.mrb[96].mxu1  ;;  %v2990_v57 = vpop.f32.mrb[99].mxu0 }
 0x3dc   : > { %v2474_v10 = vadd.f32 %v2988_v63, %v5398_v12  ;;  %v3099_v39 = vpop.f32.mrb[97].mxu1  ;;  %v2991_v14 = vadd.f32 %v2990_v57, %v2989_v15 }
 0x3dd   : > { %v3100_v50 = vadd.f32 %v3099_v39, %v3098_v23  ;;  %v3101_v28 = vpop.f32.mrb[98].mxu1 }
 0x3de   : > { %v2477_v61 = vadd.f32 %v2991_v14, %v5398_v12  ;;  %v3102_v5 = vpop.f32.mrb[99].mxu1 }
 0x3df   : > { %v2635_v31 = vadd.f32 %v3100_v50, %v2474_v10  ;;  %v3103_v32 = vadd.f32 %v3102_v5, %v3101_v28 }
 0x3e0   : > { %v2992_v0 = vpop.f32.mrb[100].mxu0 }
 0x3e1   : > { %2713 = vst [vmem:[%s5404_s15 + $0x80] sm:$0xff] %v2635_v31  ;;  %v2638_v33 = vadd.f32 %v3103_v32, %v2477_v61  ;;  %v2993_v59 = vpop.f32.mrb[101].mxu0 }
 0x3e2   : > { %v2994_v30 = vadd.f32 %v2993_v59, %v2992_v0  ;;  %v2995_v43 = vpop.f32.mrb[102].mxu0 }
 0x3e3   : > { %2714 = vst [vmem:[%s5404_s15 + $0x88] sm:$0xff] %v2638_v33  ;;  %v3104_v17 = vpop.f32.mrb[100].mxu1  ;;  %v2996_v53 = vpop.f32.mrb[103].mxu0 }
 0x3e4   : > { %v2482_v8 = vadd.f32 %v2994_v30, %v5398_v12  ;;  %v3105_v4 = vpop.f32.mrb[101].mxu1  ;;  %v2997_v47 = vadd.f32 %v2996_v53, %v2995_v43 }
 0x3e5   : > { %v3106_v16 = vadd.f32 %v3105_v4, %v3104_v17  ;;  %v3107_v41 = vpop.f32.mrb[102].mxu1 }
 0x3e6   : > { %v2485_v49 = vadd.f32 %v2997_v47, %v5398_v12  ;;  %v3108_v45 = vpop.f32.mrb[103].mxu1 }
 0x3e7   : > { %v2643_v48 = vadd.f32 %v3106_v16, %v2482_v8  ;;  %v3109_v34 = vadd.f32 %v3108_v45, %v3107_v41 }
 0x3e9   : > { %2715 = vst [vmem:[%s5404_s15 + $0x90] sm:$0xff] %v2643_v48  ;;  %v2646_v51 = vadd.f32 %v3109_v34, %v2485_v49 }
 0x3eb   : > { %2716 = vst [vmem:[%s5404_s15 + $0x98] sm:$0xff] %v2646_v51 }
 0x412   : > { %v2998_v22 = vpop.f32.mrb[104].mxu0 }
 0x413   : > { %v3110_v60 = vpop.f32.mrb[104].mxu1  ;;  %v2999_v19 = vpop.f32.mrb[105].mxu0 }
 0x414   : > { %v3000_v1 = vadd.f32 %v2999_v19, %v2998_v22  ;;  %v3111_v44 = vpop.f32.mrb[105].mxu1  ;;  %v3001_v13 = vpop.f32.mrb[106].mxu0 }
 0x415   : > { %v3112_v35 = vadd.f32 %v3111_v44, %v3110_v60  ;;  %v3113_v46 = vpop.f32.mrb[106].mxu1  ;;  %v3002_v58 = vpop.f32.mrb[107].mxu0 }
 0x416   : > { %v2490_v37 = vadd.f32 %v3000_v1, %v5398_v12  ;;  %v3003_v21 = vadd.f32 %v3002_v58, %v3001_v13  ;;  %v3114_v36 = vpop.f32.mrb[107].mxu1 }
 0x417   : > { %v3115_v26 = vadd.f32 %v3114_v36, %v3113_v46 }
 0x418   : > { %v2651_v25 = vadd.f32 %v3112_v35, %v2490_v37  ;;  %v2493_v52 = vadd.f32 %v3003_v21, %v5398_v12 }
 0x41a   : > { %2717 = vst [vmem:[%s5404_s15 + $0xa0] sm:$0xff] %v2651_v25  ;;  %v2654_v9 = vadd.f32 %v3115_v26, %v2493_v52 }
 0x41c   : > { %2718 = vst [vmem:[%s5404_s15 + $0xa8] sm:$0xff] %v2654_v9 }
 0x420   : > { %v3004_v40 = vpop.f32.mrb[108].mxu0  ;;  %v3116_v54 = vpop.f32.mrb[108].mxu1 }
 0x421   : > { %v3005_v11 = vpop.f32.mrb[109].mxu0  ;;  %v3117_v6 = vpop.f32.mrb[109].mxu1 }
 0x422   : > { %v3006_v3 = vadd.f32 %v3005_v11, %v3004_v40  ;;  %v3118_v24 = vadd.f32 %v3117_v6, %v3116_v54  ;;  %v3007_v2 = vpop.f32.mrb[110].mxu0  ;;  %v3119_v38 = vpop.f32.mrb[110].mxu1 }
 0x423   : > { %v3008_v29 = vpop.f32.mrb[111].mxu0  ;;  %v3120_v18 = vpop.f32.mrb[111].mxu1 }
 0x424   : > { %v2498_v56 = vadd.f32 %v3006_v3, %v5398_v12  ;;  %v3009_v42 = vadd.f32 %v3008_v29, %v3007_v2  ;;  %v3121_v62 = vadd.f32 %v3120_v18, %v3119_v38 }
 0x426   : > { %v2659_v7 = vadd.f32 %v3118_v24, %v2498_v56  ;;  %v2501_v27 = vadd.f32 %v3009_v42, %v5398_v12 }
 0x428   : > { %2719 = vst [vmem:[%s5404_s15 + $0xb0] sm:$0xff] %v2659_v7  ;;  %v2662_v20 = vadd.f32 %v3121_v62, %v2501_v27 }
 0x42a   : > { %2720 = vst [vmem:[%s5404_s15 + $0xb8] sm:$0xff] %v2662_v20 }
 0x42c   : > { %v3010_v55 = vpop.f32.mrb[112].mxu0 }
 0x42d   : > { %v3011_v63 = vpop.f32.mrb[113].mxu0  ;;  %v3122_v15 = vpop.f32.mrb[112].mxu1 }
 0x42e   : > { %v3012_v23 = vadd.f32 %v3011_v63, %v3010_v55  ;;  %v3013_v57 = vpop.f32.mrb[114].mxu0  ;;  %v3123_v10 = vpop.f32.mrb[113].mxu1 }
 0x42f   : > { %v3014_v39 = vpop.f32.mrb[115].mxu0  ;;  %v3124_v50 = vadd.f32 %v3123_v10, %v3122_v15  ;;  %v3125_v28 = vpop.f32.mrb[114].mxu1 }
 0x430   : > { %v2506_v14 = vadd.f32 %v3012_v23, %v5398_v12  ;;  %v3015_v61 = vadd.f32 %v3014_v39, %v3013_v57  ;;  %v3126_v5 = vpop.f32.mrb[115].mxu1 }
 0x431   : > { %v3127_v0 = vadd.f32 %v3126_v5, %v3125_v28 }
 0x432   : > { %v2667_v31 = vadd.f32 %v3124_v50, %v2506_v14  ;;  %v2509_v32 = vadd.f32 %v3015_v61, %v5398_v12 }
 0x434   : > { %2721 = vst [vmem:[%s5404_s15 + $0xc0] sm:$0xff] %v2667_v31  ;;  %v2670_v33 = vadd.f32 %v3127_v0, %v2509_v32  ;;  %v3016_v59 = vpop.f32.mrb[116].mxu0 }
 0x435   : > { %v3017_v30 = vpop.f32.mrb[117].mxu0  ;;  %v3128_v43 = vpop.f32.mrb[116].mxu1 }
 0x436   : > { %2722 = vst [vmem:[%s5404_s15 + $0xc8] sm:$0xff] %v2670_v33  ;;  %v3018_v17 = vadd.f32 %v3017_v30, %v3016_v59  ;;  %v3019_v53 = vpop.f32.mrb[118].mxu0  ;;  %v3129_v8 = vpop.f32.mrb[117].mxu1 }
 0x437   : > { %v3020_v4 = vpop.f32.mrb[119].mxu0  ;;  %v3130_v16 = vadd.f32 %v3129_v8, %v3128_v43  ;;  %v3131_v41 = vpop.f32.mrb[118].mxu1 }
 0x438   : > { %v2514_v47 = vadd.f32 %v3018_v17, %v5398_v12  ;;  %v3021_v49 = vadd.f32 %v3020_v4, %v3019_v53  ;;  %v3132_v45 = vpop.f32.mrb[119].mxu1 }
 0x439   : > { %v3133_v51 = vadd.f32 %v3132_v45, %v3131_v41 }
 0x43a   : > { %v2675_v48 = vadd.f32 %v3130_v16, %v2514_v47  ;;  %v2517_v34 = vadd.f32 %v3021_v49, %v5398_v12 }
 0x43c   : > { %2723 = vst [vmem:[%s5404_s15 + $0xd0] sm:$0xff] %v2675_v48  ;;  %v2678_v22 = vadd.f32 %v3133_v51, %v2517_v34  ;;  %v3022_v60 = vpop.f32.mrb[120].mxu0 }
 0x43d   : > { %v3023_v19 = vpop.f32.mrb[121].mxu0  ;;  %v3134_v1 = vpop.f32.mrb[120].mxu1 }
 0x43e   : > { %2724 = vst [vmem:[%s5404_s15 + $0xd8] sm:$0xff] %v2678_v22  ;;  %v3024_v44 = vadd.f32 %v3023_v19, %v3022_v60  ;;  %v3025_v13 = vpop.f32.mrb[122].mxu0  ;;  %v3135_v35 = vpop.f32.mrb[121].mxu1 }
 0x43f   : > { %v3026_v46 = vpop.f32.mrb[123].mxu0  ;;  %v3136_v37 = vadd.f32 %v3135_v35, %v3134_v1  ;;  %v3137_v21 = vpop.f32.mrb[122].mxu1 }
 0x440   : > { %v2522_v58 = vadd.f32 %v3024_v44, %v5398_v12  ;;  %v3027_v36 = vadd.f32 %v3026_v46, %v3025_v13  ;;  %v3138_v26 = vpop.f32.mrb[123].mxu1 }
 0x441   : > { %v3139_v9 = vadd.f32 %v3138_v26, %v3137_v21 }
 0x442   : > { %v2683_v25 = vadd.f32 %v3136_v37, %v2522_v58  ;;  %v2525_v52 = vadd.f32 %v3027_v36, %v5398_v12 }
 0x444   : > { %2725 = vst [vmem:[%s5404_s15 + $0xe0] sm:$0xff] %v2683_v25  ;;  %v2686_v40 = vadd.f32 %v3139_v9, %v2525_v52  ;;  %v3028_v54 = vpop.f32.mrb[124].mxu0 }
 0x445   : > { %v3029_v11 = vpop.f32.mrb[125].mxu0  ;;  %v3140_v6 = vpop.f32.mrb[124].mxu1 }
 0x446   : > { %2726 = vst [vmem:[%s5404_s15 + $0xe8] sm:$0xff] %v2686_v40  ;;  %v3030_v3 = vadd.f32 %v3029_v11, %v3028_v54  ;;  %v3031_v24 = vpop.f32.mrb[126].mxu0  ;;  %v3141_v2 = vpop.f32.mrb[125].mxu1 }
 0x447   : > { %v3032_v38 = vpop.f32.mrb[127].mxu0  ;;  %v3142_v18 = vadd.f32 %v3141_v2, %v3140_v6  ;;  %v3143_v56 = vpop.f32.mrb[126].mxu1 }
 0x448   : > { %v2530_v29 = vadd.f32 %v3030_v3, %v5398_v12  ;;  %v3033_v42 = vadd.f32 %v3032_v38, %v3031_v24  ;;  %v3144_v62 = vpop.f32.mrb[127].mxu1 }
 0x449   : > { %v3145_v20 = vadd.f32 %v3144_v62, %v3143_v56 }
 0x44a   : > { %v2691_v7 = vadd.f32 %v3142_v18, %v2530_v29  ;;  %v2533_v27 = vadd.f32 %v3033_v42, %v5398_v12 }
 0x44c   : > { %2727 = vst [vmem:[%s5404_s15 + $0xf0] sm:$0xff] %v2691_v7  ;;  %v2694_v55 = vadd.f32 %v3145_v20, %v2533_v27 }
 0x44e   : > { %2728 = vst [vmem:[%s5404_s15 + $0xf8] sm:$0xff] %v2694_v55 }
 0x44f   : > { %3721 = shalt.err (!%p3718_p2)
}
 0x450   : > { %s3722_s10 = scalar_lea.hbm %s5471_s30, 4096  ;;  %s3726_s15 = scalar_lea.hbm %s5526_s7, 8192 }
 0x451   : > { %p3723_p13 = scmp.ne.s32.totalorder %s5471_s30, %s3722_s10  ;;  %p3727_p4 = scmp.lt.u32.totalorder %s5471_s30, %s5526_s7 }
 0x452   : > { %p3728_p7 = scmp.lt.u32.totalorder %s3726_s15, %s3722_s10  ;;  %p3730_p11 = scmp.lt.u32.totalorder %s3722_s10, %s5471_s30 }
 0x453   : > { %p3724_p6 = pnand %p3723_p13, %p5568_p0 }
 0x454   : > { %p3729_p8 = por %p3728_p7, %p3727_p4 }
 0x455   : > { %p3725_p10 = pneg %p3724_p6 }
 0x456   : > { %p3731_p1 = por %p3730_p11, %p3729_p8 }
 0x458   : > { %p3732_p3 = pnand %p3731_p1, %p3725_p10 }
 0x45a   : > { %3735 = shalt.err (!%p3732_p3)
}
 0x45b   : > { %s3791_s22 = smov 128   ;;  %s3792_s9 = smov 8  }
 0x45c   : > { %3156 = dma.vmem_to_hbm [thread:$0]  (%p5568_p0), %s5473_s21, 4096, %s5471_s30, %s2730_s28, %s3791_s22, %s3791_s22, %s3792_s9  }
 0x45d PF: > { %s2758_s11 = sand.u32 1, %s3766_s24   ;;  %p5569_p5 = scmp.ne.s32.totalorder %s5531_s8, 0 }
 0x45e   : > { %p5570_p9 = scmp.ge.s32.totalorder %s3778_s27, 2  ;;  %s2759_s23 = scalar_lea.sflag [#allocation4], %s2758_s11 }
 0x460   : > { %p3170_p12 = pnand %p5570_p9, %p5569_p5 }
 0x462   : > { %3761 = dma.done.wait (!%p3170_p12), %s2759_s23, 4096  }
 0x463   : > { %3763 = vsyncadd (!%p3170_p12), %s2759_s23, 4294963200  ;;  %p21_p2 = scmp.ge.s32.totalorder %s3943_s13, 4   ;;  %s5571_s24 = smov %s3770_s25 }
 0x464   : > { %s5572_s25 = smov %s3774_s26  ;;  %s5573_s26 = smov %s3952_s17 }
 0x465   : > { %s5574_s27 = smov %s3943_s13  ;;  %23 = sbr.rel (!%p21_p2) target bundleno = 6 (0x6), region = 101 }
 0x46c   :  { %2764 = vsyncpa [#allocation3], 1 }
 0x46d   :  { %2766 = vsyncpa [#allocation3 + $0x1], 1 }
 0x46e   :  { %2767 = vsyncpa [#allocation6], 1 }
 0x46f   :  { %2768 = vsyncpa [#allocation4], 1 }
 0x470   :  { %2770 = vsyncpa [#allocation4 + $0x1], 1 }

</bundles_post_ra>
